<compile_context>
chip_gen: v5e
topology: v5e:2x2
jax: 0.10.0
libtpu: 0.0.40
codegen_flags: <defaults>
</compile_context>

<pallas_src>
import numpy as np

import jax
import jax.numpy as jnp
from jax import lax
from jax.experimental import pallas as pl
from jax.experimental.pallas import tpu as pltpu

# ---------------- small ViT configuration (consistent with the module) -------
IMG = 16            # img_size
PATCH = 4           # patch_size
IN_CH = 3           # in_channel
EMBED = 32          # embed_dim
DEPTH = 2           # depth
HEADS = 4           # num_heads
NUM_CLASSES = 10    # num_classes
HEAD_DIM = EMBED // HEADS
MLP_HIDDEN = int(EMBED * 4.0)
GRID_HW = IMG // PATCH
NUM_PATCHES = GRID_HW * GRID_HW
SEQ = NUM_PATCHES + 1          # +1 cls token
LN_EPS = 1e-6                  # norm_layer = partial(nn.LayerNorm, eps=1e-6)
CPP = IN_CH * PATCH * PATCH    # flattened patch length (48)

_SQRT_HALF = 0.7071067811865476


# --------------------------- in-kernel math helpers ---------------------------
def _erf_approx(x):
    # TODO(synk): lax.erf lowering is not guaranteed in Mosaic; use the
    # Abramowitz & Stegun 7.1.26 rational approximation (|err| <= 1.5e-7),
    # which only needs exp / abs / arithmetic (all VPU/EUP-supported).
    p = 0.3275911
    a1, a2, a3, a4, a5 = (0.254829592, -0.284496736, 1.421413741,
                          -1.453152027, 1.061405429)
    ax = jnp.abs(x)
    t = 1.0 / (1.0 + p * ax)
    poly = t * (a1 + t * (a2 + t * (a3 + t * (a4 + t * a5))))
    y = 1.0 - poly * jnp.exp(-ax * ax)
    return jnp.where(x < 0.0, -y, y)


def _gelu_exact(x):
    # matches nn.GELU() (exact erf form) to ~1e-7
    return 0.5 * x * (1.0 + _erf_approx(x * _SQRT_HALF))


def _layernorm(x, g, b):
    mu = jnp.mean(x, axis=-1, keepdims=True)
    xc = x - mu
    var = jnp.mean(xc * xc, axis=-1, keepdims=True)
    return xc * lax.rsqrt(var + LN_EPS) * g + b


def _mm(a, b):
    return jnp.dot(a, b, preferred_element_type=jnp.float32)


# ----------------------------- fused Pallas kernel ----------------------------
def _vit_fused_kernel(
        x_aug_ref, wpe_ref, addpos_ref, attn_bias_ref, head_mask_ref,
        cls_sel_ref,
        ln1_g_ref, ln1_b_ref, wq_ref, bq_ref, wk_ref, bk_ref, wv_ref, bv_ref,
        wo_ref, bo_ref, ln2_g_ref, ln2_b_ref, w1_ref, b1_ref, w2_ref, b2_ref,
        norm_g_ref, norm_b_ref, head_w_ref, head_b_ref,
        logits_ref):
    # ---- patch embedding (bias folded in as an extra weight row) + cls/pos ---
    # x_aug rows: [patch_vec | 1] for patch tokens, all-zero rows for cls;
    # addpos rows: pos_emb (+ cls_token on the cls rows).
    h = _mm(x_aug_ref[...], wpe_ref[...]) + addpos_ref[...]        # (T, E)

    attn_bias = attn_bias_ref[...]                                 # (T, T)
    head_masks = [head_mask_ref[i] for i in range(HEADS)]          # (1, E) each

    for d in range(DEPTH):
        # --------------------------- attention branch ------------------------
        y = _layernorm(h, ln1_g_ref[d], ln1_b_ref[d])
        q = _mm(y, wq_ref[d]) + bq_ref[d]        # scale pre-folded into wq/bq
        k = _mm(y, wk_ref[d]) + bk_ref[d]
        v = _mm(y, wv_ref[d]) + bv_ref[d]

        attn_out = jnp.zeros_like(h)
        for hm in head_masks:
            # Mask Q to this head's lanes; contracting against full-width K
            # then only picks up this head's dot products (others contribute
            # exact zeros) -> no per-head slicing / reshape / transpose.
            s = lax.dot_general(q * hm, k, (((1,), (1,)), ((), ())),
                                preferred_element_type=jnp.float32)
            s = s + attn_bias                    # block-diag batch mask (-1e30)
            s = s - jnp.max(s, axis=-1, keepdims=True)
            p = jnp.exp(s)
            p = p / jnp.sum(p, axis=-1, keepdims=True)
            attn_out = attn_out + _mm(p, v) * hm  # keep this head's lanes only
        h = h + _mm(attn_out, wo_ref[d]) + bo_ref[d]   # proj + residual

        # ------------------------------ MLP branch ----------------------------
        y = _layernorm(h, ln2_g_ref[d], ln2_b_ref[d])
        y = _mm(y, w1_ref[d]) + b1_ref[d]
        y = _gelu_exact(y)
        y = _mm(y, w2_ref[d]) + b2_ref[d]
        h = h + y

    # ---- final norm on the cls rows only (LayerNorm is per-token) + head -----
    cls_feat = _mm(cls_sel_ref[...], h)                            # (B, E)
    cls_feat = _layernorm(cls_feat, norm_g_ref[...], norm_b_ref[...])
    logits = _mm(cls_feat, head_w_ref[...]) + head_b_ref[...]      # (B, NC)
    logits_ref[...] = logits.astype(logits_ref.dtype)


# ------------------------- kernel-ready parameter prep ------------------------
def prepare_kernel_params(params):
    """One-time transform of ViT parameters into fused-kernel-ready arrays."""
    scale = HEAD_DIM ** (-0.5)
    blocks = params["blocks"]

    def stack(name):
        return jnp.stack([blk[name] for blk in blocks], axis=0)

    qkv_w = stack("qkv_w")                              # (D, E, 3E)
    qkv_b = stack("qkv_b")                              # (D, 3E)

    return {
        # patch projection with the bias folded in as an extra input row
        "wpe": jnp.concatenate(
            [params["patch_w"], params["patch_b"].reshape(1, EMBED)], axis=0),
        # additive term per sequence position: pos_emb (+ cls token at row 0)
        "addpos_seq": jnp.concatenate(
            [params["pos_emb"][0, :1] + params["cls_token"].reshape(1, EMBED),
             params["pos_emb"][0, 1:]], axis=0),
        "ln1_g": stack("ln1_g").reshape(DEPTH, 1, EMBED),
        "ln1_b": stack("ln1_b").reshape(DEPTH, 1, EMBED),
        # attention scale folded into the Q projection (weights + bias)
        "wq": qkv_w[:, :, :EMBED] * scale,
        "bq": (qkv_b[:, :EMBED] * scale).reshape(DEPTH, 1, EMBED),
        "wk": qkv_w[:, :, EMBED:2 * EMBED],
        "bk": qkv_b[:, EMBED:2 * EMBED].reshape(DEPTH, 1, EMBED),
        "wv": qkv_w[:, :, 2 * EMBED:],
        "bv": qkv_b[:, 2 * EMBED:].reshape(DEPTH, 1, EMBED),
        "wo": stack("proj_w"),
        "bo": stack("proj_b").reshape(DEPTH, 1, EMBED),
        "ln2_g": stack("ln2_g").reshape(DEPTH, 1, EMBED),
        "ln2_b": stack("ln2_b").reshape(DEPTH, 1, EMBED),
        "w1": stack("fc1_w"),
        "b1": stack("fc1_b").reshape(DEPTH, 1, MLP_HIDDEN),
        "w2": stack("fc2_w"),
        "b2": stack("fc2_b").reshape(DEPTH, 1, EMBED),
        "norm_g": params["norm_g"].reshape(1, EMBED),
        "norm_b": params["norm_b"].reshape(1, EMBED),
        "head_w": params["head_w"],
        "head_b": params["head_b"].reshape(1, NUM_CLASSES),
    }


def _head_masks():
    m = np.zeros((HEADS, 1, EMBED), np.float32)
    for h in range(HEADS):
        m[h, 0, h * HEAD_DIM:(h + 1) * HEAD_DIM] = 1.0
    return jnp.asarray(m)


def _batch_block_bias(b):
    t = b * SEQ
    bias = np.full((t, t), -1e30, np.float32)
    for i in range(b):
        bias[i * SEQ:(i + 1) * SEQ, i * SEQ:(i + 1) * SEQ] = 0.0
    return jnp.asarray(bias)


def _cls_selector(b):
    sel = np.zeros((b, b * SEQ), np.float32)
    for i in range(b):
        sel[i, i * SEQ] = 1.0
    return jnp.asarray(sel)


# --------------------------------- forward ------------------------------------
def vit_forward_pallas(x, kp):
    """x: (B, C, H, W) float32 (NCHW, like PyTorch Conv2d input)."""
    b = x.shape[0]
    t = b * SEQ

    # --- XLA-side glue: pure data rearrangement, all math is in the kernel ---
    # Conv2d(kernel=stride=PATCH) == matmul over flattened patches.
    p = x.reshape(b, IN_CH, GRID_HW, PATCH, GRID_HW, PATCH)
    p = p.transpose(0, 2, 4, 1, 3, 5).reshape(b, NUM_PATCHES, CPP)
    # augmented rows: [patch_vec | 1] for patch tokens, all-zeros for cls token
    p = jnp.concatenate([p, jnp.ones((b, NUM_PATCHES, 1), x.dtype)], axis=-1)
    x_aug = jnp.concatenate(
        [jnp.zeros((b, 1, CPP + 1), x.dtype), p], axis=1).reshape(t, CPP + 1)
    addpos = jnp.tile(kp["addpos_seq"], (b, 1))                   # (T, E)

    attn_bias = _batch_block_bias(b)
    head_masks = _head_masks()
    cls_sel = _cls_selector(b)

    args = (x_aug, kp["wpe"], addpos, attn_bias, head_masks, cls_sel,
            kp["ln1_g"], kp["ln1_b"], kp["wq"], kp["bq"], kp["wk"], kp["bk"],
            kp["wv"], kp["bv"], kp["wo"], kp["bo"], kp["ln2_g"], kp["ln2_b"],
            kp["w1"], kp["b1"], kp["w2"], kp["b2"],
            kp["norm_g"], kp["norm_b"], kp["head_w"], kp["head_b"])

    return pl.pallas_call(
        _vit_fused_kernel,
        out_shape=jax.ShapeDtypeStruct((b, NUM_CLASSES), x.dtype),
        in_specs=[pl.BlockSpec(memory_space=pltpu.MemorySpace.VMEM)
                  for _ in args],
        out_specs=pl.BlockSpec(memory_space=pltpu.MemorySpace.VMEM),
    )(*args)


# ----------------------------- pure-JAX reference -----------------------------
def vit_forward_reference(x, params):
    """Reference forward matching the PyTorch module (inference, no dropout)."""
    b = x.shape[0]
    p = x.reshape(b, IN_CH, GRID_HW, PATCH, GRID_HW, PATCH)
    p = p.transpose(0, 2, 4, 1, 3, 5).reshape(b * NUM_PATCHES, CPP)
    tok = (p @ params["patch_w"] + params["patch_b"]).reshape(b, NUM_PATCHES, EMBED)
    cls = jnp.broadcast_to(params["cls_token"], (b, 1, EMBED))
    h = jnp.concatenate([cls, tok], axis=1) + params["pos_emb"]

    def layernorm(z, g, bb):
        mu = jnp.mean(z, axis=-1, keepdims=True)
        zc = z - mu
        var = jnp.mean(zc * zc, axis=-1, keepdims=True)
        return zc * lax.rsqrt(var + LN_EPS) * g + bb

    scale = HEAD_DIM ** (-0.5)
    for blk in params["blocks"]:
        y = layernorm(h, blk["ln1_g"], blk["ln1_b"])
        qkv = y @ blk["qkv_w"] + blk["qkv_b"]
        qkv = qkv.reshape(b, SEQ, 3, HEADS, HEAD_DIM).transpose(2, 0, 3, 1, 4)
        q, k, v = qkv[0], qkv[1], qkv[2]
        s = jnp.einsum("bhnd,bhmd->bhnm", q, k) * scale
        pr = jax.nn.softmax(s, axis=-1)
        a = jnp.einsum("bhnm,bhmd->bhnd", pr, v)
        a = a.transpose(0, 2, 1, 3).reshape(b, SEQ, EMBED)
        h = h + (a @ blk["proj_w"] + blk["proj_b"])

        y = layernorm(h, blk["ln2_g"], blk["ln2_b"])
        y = y @ blk["fc1_w"] + blk["fc1_b"]
        y = jax.nn.gelu(y, approximate=False)        # exact-erf GELU (nn.GELU)
        y = y @ blk["fc2_w"] + blk["fc2_b"]
        h = h + y

    h = layernorm(h, params["norm_g"], params["norm_b"])
    cls_out = h[:, 0]
    return cls_out @ params["head_w"] + params["head_b"]


# ------------------------------ parameter init --------------------------------
def _trunc_normal(key, shape, std):
    return std * jax.random.truncated_normal(key, -2.0, 2.0, shape, jnp.float32)


def init_params(key):
    keys = iter(jax.random.split(key, 4 + 4 * DEPTH))
    # Conv2d patch projection, kaiming_normal_(mode='fan_out'): std = sqrt(2/(E*P*P))
    fan_out = EMBED * PATCH * PATCH
    conv_w = jnp.sqrt(2.0 / fan_out) * jax.random.normal(
        next(keys), (EMBED, IN_CH, PATCH, PATCH), jnp.float32)
    params = {
        # stored as (C*P*P, E) so the kernel computes patches @ W
        "patch_w": conv_w.reshape(EMBED, CPP).T,
        "patch_b": jnp.zeros((EMBED,), jnp.float32),
        "cls_token": _trunc_normal(next(keys), (1, 1, EMBED), 0.02),
        "pos_emb": _trunc_normal(next(keys), (1, SEQ, EMBED), 0.02),
        "head_w": _trunc_normal(next(keys), (EMBED, NUM_CLASSES), 0.01),
        "head_b": jnp.zeros((NUM_CLASSES,), jnp.float32),
        "norm_g": jnp.ones((EMBED,), jnp.float32),
        "norm_b": jnp.zeros((EMBED,), jnp.float32),
        "blocks": [],
    }
    for _ in range(DEPTH):
        blk = {
            "ln1_g": jnp.ones((EMBED,), jnp.float32),
            "ln1_b": jnp.zeros((EMBED,), jnp.float32),
            "qkv_w": _trunc_normal(next(keys), (EMBED, 3 * EMBED), 0.01),
            "qkv_b": jnp.zeros((3 * EMBED,), jnp.float32),          # qkv_bias=True
            "proj_w": _trunc_normal(next(keys), (EMBED, EMBED), 0.01),
            "proj_b": jnp.zeros((EMBED,), jnp.float32),
            "ln2_g": jnp.ones((EMBED,), jnp.float32),
            "ln2_b": jnp.zeros((EMBED,), jnp.float32),
            "fc1_w": _trunc_normal(next(keys), (EMBED, MLP_HIDDEN), 0.01),
            "fc1_b": jnp.zeros((MLP_HIDDEN,), jnp.float32),
            "fc2_w": _trunc_normal(next(keys), (MLP_HIDDEN, EMBED), 0.01),
            "fc2_b": jnp.zeros((EMBED,), jnp.float32),
        }
        params["blocks"].append(blk)
    return params


# ------------------------------------ main -------------------------------------
if __name__ == "__main__":
    root = jax.random.PRNGKey(0)
    pkey, xkey = jax.random.split(root)
    params = init_params(pkey)
    kparams = prepare_kernel_params(params)
    x = jax.random.normal(xkey, (2, IN_CH, IMG, IMG), jnp.float32)

    fwd = jax.jit(vit_forward_pallas)
    logits = jax.block_until_ready(fwd(x, kparams))
    assert logits.shape == (2, NUM_CLASSES)

    ref = vit_forward_reference(x, params)
    np.testing.assert_allclose(np.asarray(logits), np.asarray(ref),
                               rtol=1e-4, atol=2e-5)
    print("KERNEL_OK")
</pallas_src>

<mosaic_0001>
module attributes {stable_mosaic.version = 11 : i64} {
  func.func @_vit_fused_kernel(%arg0: memref<34x49xf32, #tpu.memory_space<vmem>>, %arg1: memref<49x32xf32, #tpu.memory_space<vmem>>, %arg2: memref<34x32xf32, #tpu.memory_space<vmem>>, %arg3: memref<34x34xf32, #tpu.memory_space<vmem>>, %arg4: memref<4x1x32xf32, #tpu.memory_space<vmem>>, %arg5: memref<2x34xf32, #tpu.memory_space<vmem>>, %arg6: memref<2x1x32xf32, #tpu.memory_space<vmem>>, %arg7: memref<2x1x32xf32, #tpu.memory_space<vmem>>, %arg8: memref<2x32x32xf32, #tpu.memory_space<vmem>>, %arg9: memref<2x1x32xf32, #tpu.memory_space<vmem>>, %arg10: memref<2x32x32xf32, #tpu.memory_space<vmem>>, %arg11: memref<2x1x32xf32, #tpu.memory_space<vmem>>, %arg12: memref<2x32x32xf32, #tpu.memory_space<vmem>>, %arg13: memref<2x1x32xf32, #tpu.memory_space<vmem>>, %arg14: memref<2x32x32xf32, #tpu.memory_space<vmem>>, %arg15: memref<2x1x32xf32, #tpu.memory_space<vmem>>, %arg16: memref<2x1x32xf32, #tpu.memory_space<vmem>>, %arg17: memref<2x1x32xf32, #tpu.memory_space<vmem>>, %arg18: memref<2x32x128xf32, #tpu.memory_space<vmem>>, %arg19: memref<2x1x128xf32, #tpu.memory_space<vmem>>, %arg20: memref<2x128x32xf32, #tpu.memory_space<vmem>>, %arg21: memref<2x1x32xf32, #tpu.memory_space<vmem>>, %arg22: memref<1x32xf32, #tpu.memory_space<vmem>>, %arg23: memref<1x32xf32, #tpu.memory_space<vmem>>, %arg24: memref<32x10xf32, #tpu.memory_space<vmem>>, %arg25: memref<1x10xf32, #tpu.memory_space<vmem>>, %arg26: memref<2x10xf32, #tpu.memory_space<vmem>>) attributes {dimension_semantics = [], scalar_prefetch = 0 : i64, scratch_operands = 0 : i64, tpu.core_type = #tpu.core_type<tc>} {
    %c0 = arith.constant 0 : index
    %c0_0 = arith.constant 0 : index
    %0 = vector.load %arg0[%c0, %c0_0] : memref<34x49xf32, #tpu.memory_space<vmem>>, vector<34x49xf32>
    %c0_1 = arith.constant 0 : index
    %c0_2 = arith.constant 0 : index
    %1 = vector.load %arg1[%c0_1, %c0_2] : memref<49x32xf32, #tpu.memory_space<vmem>>, vector<49x32xf32>
    %cst = arith.constant dense<0.000000e+00> : vector<34x32xf32>
    %2 = tpu.matmul %0, %1, %cst {dimension_numbers = #tpu.dot_dimension_numbers<[1], [0], [0], [1], [0, 0, 1, 1], [], []>} : vector<34x49xf32>, vector<49x32xf32>, vector<34x32xf32> -> vector<34x32xf32>
    %c0_3 = arith.constant 0 : index
    %c0_4 = arith.constant 0 : index
    %3 = vector.load %arg2[%c0_3, %c0_4] : memref<34x32xf32, #tpu.memory_space<vmem>>, vector<34x32xf32>
    %4 = arith.addf %2, %3 : vector<34x32xf32>
    %c0_5 = arith.constant 0 : index
    %c0_6 = arith.constant 0 : index
    %5 = vector.load %arg3[%c0_5, %c0_6] : memref<34x34xf32, #tpu.memory_space<vmem>>, vector<34x34xf32>
    %c0_7 = arith.constant 0 : index
    %c0_8 = arith.constant 0 : index
    %c0_9 = arith.constant 0 : index
    %6 = vector.load %arg4[%c0_7, %c0_8, %c0_9] : memref<4x1x32xf32, #tpu.memory_space<vmem>>, vector<1x1x32xf32>
    %7 = vector.shape_cast %6 : vector<1x1x32xf32> to vector<1x32xf32>
    %c1 = arith.constant 1 : index
    %c0_10 = arith.constant 0 : index
    %c0_11 = arith.constant 0 : index
    %8 = vector.load %arg4[%c1, %c0_10, %c0_11] : memref<4x1x32xf32, #tpu.memory_space<vmem>>, vector<1x1x32xf32>
    %9 = vector.shape_cast %8 : vector<1x1x32xf32> to vector<1x32xf32>
    %c2 = arith.constant 2 : index
    %c0_12 = arith.constant 0 : index
    %c0_13 = arith.constant 0 : index
    %10 = vector.load %arg4[%c2, %c0_12, %c0_13] : memref<4x1x32xf32, #tpu.memory_space<vmem>>, vector<1x1x32xf32>
    %11 = vector.shape_cast %10 : vector<1x1x32xf32> to vector<1x32xf32>
    %c3 = arith.constant 3 : index
    %c0_14 = arith.constant 0 : index
    %c0_15 = arith.constant 0 : index
    %12 = vector.load %arg4[%c3, %c0_14, %c0_15] : memref<4x1x32xf32, #tpu.memory_space<vmem>>, vector<1x1x32xf32>
    %13 = vector.shape_cast %12 : vector<1x1x32xf32> to vector<1x32xf32>
    %c0_16 = arith.constant 0 : index
    %c0_17 = arith.constant 0 : index
    %c0_18 = arith.constant 0 : index
    %14 = vector.load %arg6[%c0_16, %c0_17, %c0_18] : memref<2x1x32xf32, #tpu.memory_space<vmem>>, vector<1x1x32xf32>
    %15 = vector.shape_cast %14 : vector<1x1x32xf32> to vector<1x32xf32>
    %c0_19 = arith.constant 0 : index
    %c0_20 = arith.constant 0 : index
    %c0_21 = arith.constant 0 : index
    %16 = vector.load %arg7[%c0_19, %c0_20, %c0_21] : memref<2x1x32xf32, #tpu.memory_space<vmem>>, vector<1x1x32xf32>
    %17 = vector.shape_cast %16 : vector<1x1x32xf32> to vector<1x32xf32>
    %cst_22 = arith.constant dense<0.000000e+00> : vector<34xf32>
    %18 = vector.multi_reduction <add>, %4, %cst_22 [1] : vector<34x32xf32> to vector<34xf32>
    %19 = vector.shape_cast %18 : vector<34xf32> to vector<34x1xf32>
    %cst_23 = arith.constant 3.200000e+01 : f32
    %20 = vector.broadcast %cst_23 : f32 to vector<34x1xf32>
    %21 = arith.divf %19, %20 : vector<34x1xf32>
    %22 = vector.broadcast %21 : vector<34x1xf32> to vector<34x32xf32>
    %23 = arith.subf %4, %22 : vector<34x32xf32>
    %24 = arith.mulf %23, %23 : vector<34x32xf32>
    %cst_24 = arith.constant dense<0.000000e+00> : vector<34xf32>
    %25 = vector.multi_reduction <add>, %24, %cst_24 [1] : vector<34x32xf32> to vector<34xf32>
    %26 = vector.shape_cast %25 : vector<34xf32> to vector<34x1xf32>
    %cst_25 = arith.constant 3.200000e+01 : f32
    %27 = vector.broadcast %cst_25 : f32 to vector<34x1xf32>
    %28 = arith.divf %26, %27 : vector<34x1xf32>
    %cst_26 = arith.constant 9.99999997E-7 : f32
    %29 = vector.broadcast %cst_26 : f32 to vector<34x1xf32>
    %30 = arith.addf %28, %29 : vector<34x1xf32>
    %31 = math.rsqrt %30 : vector<34x1xf32>
    %32 = vector.broadcast %31 : vector<34x1xf32> to vector<34x32xf32>
    %33 = arith.mulf %23, %32 : vector<34x32xf32>
    %34 = vector.broadcast %15 : vector<1x32xf32> to vector<34x32xf32>
    %35 = arith.mulf %33, %34 : vector<34x32xf32>
    %36 = vector.broadcast %17 : vector<1x32xf32> to vector<34x32xf32>
    %37 = arith.addf %35, %36 : vector<34x32xf32>
    %c0_27 = arith.constant 0 : index
    %c0_28 = arith.constant 0 : index
    %c0_29 = arith.constant 0 : index
    %38 = vector.load %arg8[%c0_27, %c0_28, %c0_29] : memref<2x32x32xf32, #tpu.memory_space<vmem>>, vector<1x32x32xf32>
    %39 = vector.shape_cast %38 : vector<1x32x32xf32> to vector<32x32xf32>
    %cst_30 = arith.constant dense<0.000000e+00> : vector<34x32xf32>
    %40 = tpu.matmul %37, %39, %cst_30 {dimension_numbers = #tpu.dot_dimension_numbers<[1], [0], [0], [1], [0, 0, 1, 1], [], []>} : vector<34x32xf32>, vector<32x32xf32>, vector<34x32xf32> -> vector<34x32xf32>
    %c0_31 = arith.constant 0 : index
    %c0_32 = arith.constant 0 : index
    %c0_33 = arith.constant 0 : index
    %41 = vector.load %arg9[%c0_31, %c0_32, %c0_33] : memref<2x1x32xf32, #tpu.memory_space<vmem>>, vector<1x1x32xf32>
    %42 = vector.shape_cast %41 : vector<1x1x32xf32> to vector<1x32xf32>
    %43 = vector.broadcast %42 : vector<1x32xf32> to vector<34x32xf32>
    %44 = arith.addf %40, %43 : vector<34x32xf32>
    %c0_34 = arith.constant 0 : index
    %c0_35 = arith.constant 0 : index
    %c0_36 = arith.constant 0 : index
    %45 = vector.load %arg10[%c0_34, %c0_35, %c0_36] : memref<2x32x32xf32, #tpu.memory_space<vmem>>, vector<1x32x32xf32>
    %46 = vector.shape_cast %45 : vector<1x32x32xf32> to vector<32x32xf32>
    %cst_37 = arith.constant dense<0.000000e+00> : vector<34x32xf32>
    %47 = tpu.matmul %37, %46, %cst_37 {dimension_numbers = #tpu.dot_dimension_numbers<[1], [0], [0], [1], [0, 0, 1, 1], [], []>} : vector<34x32xf32>, vector<32x32xf32>, vector<34x32xf32> -> vector<34x32xf32>
    %c0_38 = arith.constant 0 : index
    %c0_39 = arith.constant 0 : index
    %c0_40 = arith.constant 0 : index
    %48 = vector.load %arg11[%c0_38, %c0_39, %c0_40] : memref<2x1x32xf32, #tpu.memory_space<vmem>>, vector<1x1x32xf32>
    %49 = vector.shape_cast %48 : vector<1x1x32xf32> to vector<1x32xf32>
    %50 = vector.broadcast %49 : vector<1x32xf32> to vector<34x32xf32>
    %51 = arith.addf %47, %50 : vector<34x32xf32>
    %c0_41 = arith.constant 0 : index
    %c0_42 = arith.constant 0 : index
    %c0_43 = arith.constant 0 : index
    %52 = vector.load %arg12[%c0_41, %c0_42, %c0_43] : memref<2x32x32xf32, #tpu.memory_space<vmem>>, vector<1x32x32xf32>
    %53 = vector.shape_cast %52 : vector<1x32x32xf32> to vector<32x32xf32>
    %cst_44 = arith.constant dense<0.000000e+00> : vector<34x32xf32>
    %54 = tpu.matmul %37, %53, %cst_44 {dimension_numbers = #tpu.dot_dimension_numbers<[1], [0], [0], [1], [0, 0, 1, 1], [], []>} : vector<34x32xf32>, vector<32x32xf32>, vector<34x32xf32> -> vector<34x32xf32>
    %c0_45 = arith.constant 0 : index
    %c0_46 = arith.constant 0 : index
    %c0_47 = arith.constant 0 : index
    %55 = vector.load %arg13[%c0_45, %c0_46, %c0_47] : memref<2x1x32xf32, #tpu.memory_space<vmem>>, vector<1x1x32xf32>
    %56 = vector.shape_cast %55 : vector<1x1x32xf32> to vector<1x32xf32>
    %57 = vector.broadcast %56 : vector<1x32xf32> to vector<34x32xf32>
    %58 = arith.addf %54, %57 : vector<34x32xf32>
    %cst_48 = arith.constant 0.000000e+00 : f32
    %59 = vector.broadcast %cst_48 : f32 to vector<34x32xf32>
    %60 = vector.broadcast %7 : vector<1x32xf32> to vector<34x32xf32>
    %61 = arith.mulf %44, %60 : vector<34x32xf32>
    %cst_49 = arith.constant dense<0.000000e+00> : vector<34x34xf32>
    %62 = tpu.matmul %61, %51, %cst_49 {dimension_numbers = #tpu.dot_dimension_numbers<[1], [1], [0], [0], [0, 0, 1, 0], [], []>} : vector<34x32xf32>, vector<34x32xf32>, vector<34x34xf32> -> vector<34x34xf32>
    %63 = arith.addf %62, %5 : vector<34x34xf32>
    %cst_50 = arith.constant dense<0xFF800000> : vector<34xf32>
    %64 = vector.multi_reduction <maximumf>, %63, %cst_50 [1] : vector<34x34xf32> to vector<34xf32>
    %65 = vector.shape_cast %64 : vector<34xf32> to vector<34x1xf32>
    %66 = vector.broadcast %65 : vector<34x1xf32> to vector<34x34xf32>
    %67 = arith.subf %63, %66 : vector<34x34xf32>
    %68 = math.exp %67 : vector<34x34xf32>
    %cst_51 = arith.constant dense<0.000000e+00> : vector<34xf32>
    %69 = vector.multi_reduction <add>, %68, %cst_51 [1] : vector<34x34xf32> to vector<34xf32>
    %70 = vector.shape_cast %69 : vector<34xf32> to vector<34x1xf32>
    %71 = vector.broadcast %70 : vector<34x1xf32> to vector<34x34xf32>
    %72 = arith.divf %68, %71 : vector<34x34xf32>
    %cst_52 = arith.constant dense<0.000000e+00> : vector<34x32xf32>
    %73 = tpu.matmul %72, %58, %cst_52 {dimension_numbers = #tpu.dot_dimension_numbers<[1], [0], [0], [1], [0, 0, 1, 1], [], []>} : vector<34x34xf32>, vector<34x32xf32>, vector<34x32xf32> -> vector<34x32xf32>
    %74 = vector.broadcast %7 : vector<1x32xf32> to vector<34x32xf32>
    %75 = arith.mulf %73, %74 : vector<34x32xf32>
    %76 = arith.addf %59, %75 : vector<34x32xf32>
    %77 = vector.broadcast %9 : vector<1x32xf32> to vector<34x32xf32>
    %78 = arith.mulf %44, %77 : vector<34x32xf32>
    %cst_53 = arith.constant dense<0.000000e+00> : vector<34x34xf32>
    %79 = tpu.matmul %78, %51, %cst_53 {dimension_numbers = #tpu.dot_dimension_numbers<[1], [1], [0], [0], [0, 0, 1, 0], [], []>} : vector<34x32xf32>, vector<34x32xf32>, vector<34x34xf32> -> vector<34x34xf32>
    %80 = arith.addf %79, %5 : vector<34x34xf32>
    %cst_54 = arith.constant dense<0xFF800000> : vector<34xf32>
    %81 = vector.multi_reduction <maximumf>, %80, %cst_54 [1] : vector<34x34xf32> to vector<34xf32>
    %82 = vector.shape_cast %81 : vector<34xf32> to vector<34x1xf32>
    %83 = vector.broadcast %82 : vector<34x1xf32> to vector<34x34xf32>
    %84 = arith.subf %80, %83 : vector<34x34xf32>
    %85 = math.exp %84 : vector<34x34xf32>
    %cst_55 = arith.constant dense<0.000000e+00> : vector<34xf32>
    %86 = vector.multi_reduction <add>, %85, %cst_55 [1] : vector<34x34xf32> to vector<34xf32>
    %87 = vector.shape_cast %86 : vector<34xf32> to vector<34x1xf32>
    %88 = vector.broadcast %87 : vector<34x1xf32> to vector<34x34xf32>
    %89 = arith.divf %85, %88 : vector<34x34xf32>
    %cst_56 = arith.constant dense<0.000000e+00> : vector<34x32xf32>
    %90 = tpu.matmul %89, %58, %cst_56 {dimension_numbers = #tpu.dot_dimension_numbers<[1], [0], [0], [1], [0, 0, 1, 1], [], []>} : vector<34x34xf32>, vector<34x32xf32>, vector<34x32xf32> -> vector<34x32xf32>
    %91 = vector.broadcast %9 : vector<1x32xf32> to vector<34x32xf32>
    %92 = arith.mulf %90, %91 : vector<34x32xf32>
    %93 = arith.addf %76, %92 : vector<34x32xf32>
    %94 = vector.broadcast %11 : vector<1x32xf32> to vector<34x32xf32>
    %95 = arith.mulf %44, %94 : vector<34x32xf32>
    %cst_57 = arith.constant dense<0.000000e+00> : vector<34x34xf32>
    %96 = tpu.matmul %95, %51, %cst_57 {dimension_numbers = #tpu.dot_dimension_numbers<[1], [1], [0], [0], [0, 0, 1, 0], [], []>} : vector<34x32xf32>, vector<34x32xf32>, vector<34x34xf32> -> vector<34x34xf32>
    %97 = arith.addf %96, %5 : vector<34x34xf32>
    %cst_58 = arith.constant dense<0xFF800000> : vector<34xf32>
    %98 = vector.multi_reduction <maximumf>, %97, %cst_58 [1] : vector<34x34xf32> to vector<34xf32>
    %99 = vector.shape_cast %98 : vector<34xf32> to vector<34x1xf32>
    %100 = vector.broadcast %99 : vector<34x1xf32> to vector<34x34xf32>
    %101 = arith.subf %97, %100 : vector<34x34xf32>
    %102 = math.exp %101 : vector<34x34xf32>
    %cst_59 = arith.constant dense<0.000000e+00> : vector<34xf32>
    %103 = vector.multi_reduction <add>, %102, %cst_59 [1] : vector<34x34xf32> to vector<34xf32>
    %104 = vector.shape_cast %103 : vector<34xf32> to vector<34x1xf32>
    %105 = vector.broadcast %104 : vector<34x1xf32> to vector<34x34xf32>
    %106 = arith.divf %102, %105 : vector<34x34xf32>
    %cst_60 = arith.constant dense<0.000000e+00> : vector<34x32xf32>
    %107 = tpu.matmul %106, %58, %cst_60 {dimension_numbers = #tpu.dot_dimension_numbers<[1], [0], [0], [1], [0, 0, 1, 1], [], []>} : vector<34x34xf32>, vector<34x32xf32>, vector<34x32xf32> -> vector<34x32xf32>
    %108 = vector.broadcast %11 : vector<1x32xf32> to vector<34x32xf32>
    %109 = arith.mulf %107, %108 : vector<34x32xf32>
    %110 = arith.addf %93, %109 : vector<34x32xf32>
    %111 = vector.broadcast %13 : vector<1x32xf32> to vector<34x32xf32>
    %112 = arith.mulf %44, %111 : vector<34x32xf32>
    %cst_61 = arith.constant dense<0.000000e+00> : vector<34x34xf32>
    %113 = tpu.matmul %112, %51, %cst_61 {dimension_numbers = #tpu.dot_dimension_numbers<[1], [1], [0], [0], [0, 0, 1, 0], [], []>} : vector<34x32xf32>, vector<34x32xf32>, vector<34x34xf32> -> vector<34x34xf32>
    %114 = arith.addf %113, %5 : vector<34x34xf32>
    %cst_62 = arith.constant dense<0xFF800000> : vector<34xf32>
    %115 = vector.multi_reduction <maximumf>, %114, %cst_62 [1] : vector<34x34xf32> to vector<34xf32>
    %116 = vector.shape_cast %115 : vector<34xf32> to vector<34x1xf32>
    %117 = vector.broadcast %116 : vector<34x1xf32> to vector<34x34xf32>
    %118 = arith.subf %114, %117 : vector<34x34xf32>
    %119 = math.exp %118 : vector<34x34xf32>
    %cst_63 = arith.constant dense<0.000000e+00> : vector<34xf32>
    %120 = vector.multi_reduction <add>, %119, %cst_63 [1] : vector<34x34xf32> to vector<34xf32>
    %121 = vector.shape_cast %120 : vector<34xf32> to vector<34x1xf32>
    %122 = vector.broadcast %121 : vector<34x1xf32> to vector<34x34xf32>
    %123 = arith.divf %119, %122 : vector<34x34xf32>
    %cst_64 = arith.constant dense<0.000000e+00> : vector<34x32xf32>
    %124 = tpu.matmul %123, %58, %cst_64 {dimension_numbers = #tpu.dot_dimension_numbers<[1], [0], [0], [1], [0, 0, 1, 1], [], []>} : vector<34x34xf32>, vector<34x32xf32>, vector<34x32xf32> -> vector<34x32xf32>
    %125 = vector.broadcast %13 : vector<1x32xf32> to vector<34x32xf32>
    %126 = arith.mulf %124, %125 : vector<34x32xf32>
    %127 = arith.addf %110, %126 : vector<34x32xf32>
    %c0_65 = arith.constant 0 : index
    %c0_66 = arith.constant 0 : index
    %c0_67 = arith.constant 0 : index
    %128 = vector.load %arg14[%c0_65, %c0_66, %c0_67] : memref<2x32x32xf32, #tpu.memory_space<vmem>>, vector<1x32x32xf32>
    %129 = vector.shape_cast %128 : vector<1x32x32xf32> to vector<32x32xf32>
    %cst_68 = arith.constant dense<0.000000e+00> : vector<34x32xf32>
    %130 = tpu.matmul %127, %129, %cst_68 {dimension_numbers = #tpu.dot_dimension_numbers<[1], [0], [0], [1], [0, 0, 1, 1], [], []>} : vector<34x32xf32>, vector<32x32xf32>, vector<34x32xf32> -> vector<34x32xf32>
    %131 = arith.addf %4, %130 : vector<34x32xf32>
    %c0_69 = arith.constant 0 : index
    %c0_70 = arith.constant 0 : index
    %c0_71 = arith.constant 0 : index
    %132 = vector.load %arg15[%c0_69, %c0_70, %c0_71] : memref<2x1x32xf32, #tpu.memory_space<vmem>>, vector<1x1x32xf32>
    %133 = vector.shape_cast %132 : vector<1x1x32xf32> to vector<1x32xf32>
    %134 = vector.broadcast %133 : vector<1x32xf32> to vector<34x32xf32>
    %135 = arith.addf %131, %134 : vector<34x32xf32>
    %c0_72 = arith.constant 0 : index
    %c0_73 = arith.constant 0 : index
    %c0_74 = arith.constant 0 : index
    %136 = vector.load %arg16[%c0_72, %c0_73, %c0_74] : memref<2x1x32xf32, #tpu.memory_space<vmem>>, vector<1x1x32xf32>
    %137 = vector.shape_cast %136 : vector<1x1x32xf32> to vector<1x32xf32>
    %c0_75 = arith.constant 0 : index
    %c0_76 = arith.constant 0 : index
    %c0_77 = arith.constant 0 : index
    %138 = vector.load %arg17[%c0_75, %c0_76, %c0_77] : memref<2x1x32xf32, #tpu.memory_space<vmem>>, vector<1x1x32xf32>
    %139 = vector.shape_cast %138 : vector<1x1x32xf32> to vector<1x32xf32>
    %cst_78 = arith.constant dense<0.000000e+00> : vector<34xf32>
    %140 = vector.multi_reduction <add>, %135, %cst_78 [1] : vector<34x32xf32> to vector<34xf32>
    %141 = vector.shape_cast %140 : vector<34xf32> to vector<34x1xf32>
    %cst_79 = arith.constant 3.200000e+01 : f32
    %142 = vector.broadcast %cst_79 : f32 to vector<34x1xf32>
    %143 = arith.divf %141, %142 : vector<34x1xf32>
    %144 = vector.broadcast %143 : vector<34x1xf32> to vector<34x32xf32>
    %145 = arith.subf %135, %144 : vector<34x32xf32>
    %146 = arith.mulf %145, %145 : vector<34x32xf32>
    %cst_80 = arith.constant dense<0.000000e+00> : vector<34xf32>
    %147 = vector.multi_reduction <add>, %146, %cst_80 [1] : vector<34x32xf32> to vector<34xf32>
    %148 = vector.shape_cast %147 : vector<34xf32> to vector<34x1xf32>
    %cst_81 = arith.constant 3.200000e+01 : f32
    %149 = vector.broadcast %cst_81 : f32 to vector<34x1xf32>
    %150 = arith.divf %148, %149 : vector<34x1xf32>
    %cst_82 = arith.constant 9.99999997E-7 : f32
    %151 = vector.broadcast %cst_82 : f32 to vector<34x1xf32>
    %152 = arith.addf %150, %151 : vector<34x1xf32>
    %153 = math.rsqrt %152 : vector<34x1xf32>
    %154 = vector.broadcast %153 : vector<34x1xf32> to vector<34x32xf32>
    %155 = arith.mulf %145, %154 : vector<34x32xf32>
    %156 = vector.broadcast %137 : vector<1x32xf32> to vector<34x32xf32>
    %157 = arith.mulf %155, %156 : vector<34x32xf32>
    %158 = vector.broadcast %139 : vector<1x32xf32> to vector<34x32xf32>
    %159 = arith.addf %157, %158 : vector<34x32xf32>
    %c0_83 = arith.constant 0 : index
    %c0_84 = arith.constant 0 : index
    %c0_85 = arith.constant 0 : index
    %160 = vector.load %arg18[%c0_83, %c0_84, %c0_85] : memref<2x32x128xf32, #tpu.memory_space<vmem>>, vector<1x32x128xf32>
    %161 = vector.shape_cast %160 : vector<1x32x128xf32> to vector<32x128xf32>
    %cst_86 = arith.constant dense<0.000000e+00> : vector<34x128xf32>
    %162 = tpu.matmul %159, %161, %cst_86 {dimension_numbers = #tpu.dot_dimension_numbers<[1], [0], [0], [1], [0, 0, 1, 1], [], []>} : vector<34x32xf32>, vector<32x128xf32>, vector<34x128xf32> -> vector<34x128xf32>
    %c0_87 = arith.constant 0 : index
    %c0_88 = arith.constant 0 : index
    %c0_89 = arith.constant 0 : index
    %163 = vector.load %arg19[%c0_87, %c0_88, %c0_89] : memref<2x1x128xf32, #tpu.memory_space<vmem>>, vector<1x1x128xf32>
    %164 = vector.shape_cast %163 : vector<1x1x128xf32> to vector<1x128xf32>
    %165 = vector.broadcast %164 : vector<1x128xf32> to vector<34x128xf32>
    %166 = arith.addf %162, %165 : vector<34x128xf32>
    %cst_90 = arith.constant 5.000000e-01 : f32
    %167 = vector.broadcast %cst_90 : f32 to vector<34x128xf32>
    %168 = arith.mulf %167, %166 : vector<34x128xf32>
    %cst_91 = arith.constant 0.707106769 : f32
    %169 = vector.broadcast %cst_91 : f32 to vector<34x128xf32>
    %170 = arith.mulf %166, %169 : vector<34x128xf32>
    %171 = math.absf %170 : vector<34x128xf32>
    %cst_92 = arith.constant 0.327591091 : f32
    %172 = vector.broadcast %cst_92 : f32 to vector<34x128xf32>
    %173 = arith.mulf %172, %171 : vector<34x128xf32>
    %cst_93 = arith.constant 1.000000e+00 : f32
    %174 = vector.broadcast %cst_93 : f32 to vector<34x128xf32>
    %175 = arith.addf %174, %173 : vector<34x128xf32>
    %cst_94 = arith.constant 1.000000e+00 : f32
    %176 = vector.broadcast %cst_94 : f32 to vector<34x128xf32>
    %177 = arith.divf %176, %175 : vector<34x128xf32>
    %cst_95 = arith.constant 1.06140542 : f32
    %178 = vector.broadcast %cst_95 : f32 to vector<34x128xf32>
    %179 = arith.mulf %177, %178 : vector<34x128xf32>
    %cst_96 = arith.constant -1.45315206 : f32
    %180 = vector.broadcast %cst_96 : f32 to vector<34x128xf32>
    %181 = arith.addf %180, %179 : vector<34x128xf32>
    %182 = arith.mulf %177, %181 : vector<34x128xf32>
    %cst_97 = arith.constant 1.42141378 : f32
    %183 = vector.broadcast %cst_97 : f32 to vector<34x128xf32>
    %184 = arith.addf %183, %182 : vector<34x128xf32>
    %185 = arith.mulf %177, %184 : vector<34x128xf32>
    %cst_98 = arith.constant -0.284496725 : f32
    %186 = vector.broadcast %cst_98 : f32 to vector<34x128xf32>
    %187 = arith.addf %186, %185 : vector<34x128xf32>
    %188 = arith.mulf %177, %187 : vector<34x128xf32>
    %cst_99 = arith.constant 0.254829586 : f32
    %189 = vector.broadcast %cst_99 : f32 to vector<34x128xf32>
    %190 = arith.addf %189, %188 : vector<34x128xf32>
    %191 = arith.mulf %177, %190 : vector<34x128xf32>
    %cst_100 = arith.constant 0.000000e+00 : f32
    %192 = vector.broadcast %cst_100 : f32 to vector<34x128xf32>
    %193 = arith.subf %192, %171 : vector<34x128xf32>
    %194 = arith.mulf %193, %171 : vector<34x128xf32>
    %195 = math.exp %194 : vector<34x128xf32>
    %196 = arith.mulf %191, %195 : vector<34x128xf32>
    %cst_101 = arith.constant 1.000000e+00 : f32
    %197 = vector.broadcast %cst_101 : f32 to vector<34x128xf32>
    %198 = arith.subf %197, %196 : vector<34x128xf32>
    %cst_102 = arith.constant 0.000000e+00 : f32
    %199 = vector.broadcast %cst_102 : f32 to vector<34x128xf32>
    %200 = arith.cmpf olt, %170, %199 : vector<34x128xf32>
    %cst_103 = arith.constant 0.000000e+00 : f32
    %201 = vector.broadcast %cst_103 : f32 to vector<34x128xf32>
    %202 = arith.subf %201, %198 : vector<34x128xf32>
    %203 = arith.select %200, %202, %198 : vector<34x128xi1>, vector<34x128xf32>
    %cst_104 = arith.constant 1.000000e+00 : f32
    %204 = vector.broadcast %cst_104 : f32 to vector<34x128xf32>
    %205 = arith.addf %204, %203 : vector<34x128xf32>
    %206 = arith.mulf %168, %205 : vector<34x128xf32>
    %c0_105 = arith.constant 0 : index
    %c0_106 = arith.constant 0 : index
    %c0_107 = arith.constant 0 : index
    %207 = vector.load %arg20[%c0_105, %c0_106, %c0_107] : memref<2x128x32xf32, #tpu.memory_space<vmem>>, vector<1x128x32xf32>
    %208 = vector.shape_cast %207 : vector<1x128x32xf32> to vector<128x32xf32>
    %cst_108 = arith.constant dense<0.000000e+00> : vector<34x32xf32>
    %209 = tpu.matmul %206, %208, %cst_108 {dimension_numbers = #tpu.dot_dimension_numbers<[1], [0], [0], [1], [0, 0, 1, 1], [], []>} : vector<34x128xf32>, vector<128x32xf32>, vector<34x32xf32> -> vector<34x32xf32>
    %c0_109 = arith.constant 0 : index
    %c0_110 = arith.constant 0 : index
    %c0_111 = arith.constant 0 : index
    %210 = vector.load %arg21[%c0_109, %c0_110, %c0_111] : memref<2x1x32xf32, #tpu.memory_space<vmem>>, vector<1x1x32xf32>
    %211 = vector.shape_cast %210 : vector<1x1x32xf32> to vector<1x32xf32>
    %212 = vector.broadcast %211 : vector<1x32xf32> to vector<34x32xf32>
    %213 = arith.addf %209, %212 : vector<34x32xf32>
    %214 = arith.addf %135, %213 : vector<34x32xf32>
    %c1_112 = arith.constant 1 : index
    %c0_113 = arith.constant 0 : index
    %c0_114 = arith.constant 0 : index
    %215 = vector.load %arg6[%c1_112, %c0_113, %c0_114] : memref<2x1x32xf32, #tpu.memory_space<vmem>>, vector<1x1x32xf32>
    %216 = vector.shape_cast %215 : vector<1x1x32xf32> to vector<1x32xf32>
    %c1_115 = arith.constant 1 : index
    %c0_116 = arith.constant 0 : index
    %c0_117 = arith.constant 0 : index
    %217 = vector.load %arg7[%c1_115, %c0_116, %c0_117] : memref<2x1x32xf32, #tpu.memory_space<vmem>>, vector<1x1x32xf32>
    %218 = vector.shape_cast %217 : vector<1x1x32xf32> to vector<1x32xf32>
    %cst_118 = arith.constant dense<0.000000e+00> : vector<34xf32>
    %219 = vector.multi_reduction <add>, %214, %cst_118 [1] : vector<34x32xf32> to vector<34xf32>
    %220 = vector.shape_cast %219 : vector<34xf32> to vector<34x1xf32>
    %cst_119 = arith.constant 3.200000e+01 : f32
    %221 = vector.broadcast %cst_119 : f32 to vector<34x1xf32>
    %222 = arith.divf %220, %221 : vector<34x1xf32>
    %223 = vector.broadcast %222 : vector<34x1xf32> to vector<34x32xf32>
    %224 = arith.subf %214, %223 : vector<34x32xf32>
    %225 = arith.mulf %224, %224 : vector<34x32xf32>
    %cst_120 = arith.constant dense<0.000000e+00> : vector<34xf32>
    %226 = vector.multi_reduction <add>, %225, %cst_120 [1] : vector<34x32xf32> to vector<34xf32>
    %227 = vector.shape_cast %226 : vector<34xf32> to vector<34x1xf32>
    %cst_121 = arith.constant 3.200000e+01 : f32
    %228 = vector.broadcast %cst_121 : f32 to vector<34x1xf32>
    %229 = arith.divf %227, %228 : vector<34x1xf32>
    %cst_122 = arith.constant 9.99999997E-7 : f32
    %230 = vector.broadcast %cst_122 : f32 to vector<34x1xf32>
    %231 = arith.addf %229, %230 : vector<34x1xf32>
    %232 = math.rsqrt %231 : vector<34x1xf32>
    %233 = vector.broadcast %232 : vector<34x1xf32> to vector<34x32xf32>
    %234 = arith.mulf %224, %233 : vector<34x32xf32>
    %235 = vector.broadcast %216 : vector<1x32xf32> to vector<34x32xf32>
    %236 = arith.mulf %234, %235 : vector<34x32xf32>
    %237 = vector.broadcast %218 : vector<1x32xf32> to vector<34x32xf32>
    %238 = arith.addf %236, %237 : vector<34x32xf32>
    %c1_123 = arith.constant 1 : index
    %c0_124 = arith.constant 0 : index
    %c0_125 = arith.constant 0 : index
    %239 = vector.load %arg8[%c1_123, %c0_124, %c0_125] : memref<2x32x32xf32, #tpu.memory_space<vmem>>, vector<1x32x32xf32>
    %240 = vector.shape_cast %239 : vector<1x32x32xf32> to vector<32x32xf32>
    %cst_126 = arith.constant dense<0.000000e+00> : vector<34x32xf32>
    %241 = tpu.matmul %238, %240, %cst_126 {dimension_numbers = #tpu.dot_dimension_numbers<[1], [0], [0], [1], [0, 0, 1, 1], [], []>} : vector<34x32xf32>, vector<32x32xf32>, vector<34x32xf32> -> vector<34x32xf32>
    %c1_127 = arith.constant 1 : index
    %c0_128 = arith.constant 0 : index
    %c0_129 = arith.constant 0 : index
    %242 = vector.load %arg9[%c1_127, %c0_128, %c0_129] : memref<2x1x32xf32, #tpu.memory_space<vmem>>, vector<1x1x32xf32>
    %243 = vector.shape_cast %242 : vector<1x1x32xf32> to vector<1x32xf32>
    %244 = vector.broadcast %243 : vector<1x32xf32> to vector<34x32xf32>
    %245 = arith.addf %241, %244 : vector<34x32xf32>
    %c1_130 = arith.constant 1 : index
    %c0_131 = arith.constant 0 : index
    %c0_132 = arith.constant 0 : index
    %246 = vector.load %arg10[%c1_130, %c0_131, %c0_132] : memref<2x32x32xf32, #tpu.memory_space<vmem>>, vector<1x32x32xf32>
    %247 = vector.shape_cast %246 : vector<1x32x32xf32> to vector<32x32xf32>
    %cst_133 = arith.constant dense<0.000000e+00> : vector<34x32xf32>
    %248 = tpu.matmul %238, %247, %cst_133 {dimension_numbers = #tpu.dot_dimension_numbers<[1], [0], [0], [1], [0, 0, 1, 1], [], []>} : vector<34x32xf32>, vector<32x32xf32>, vector<34x32xf32> -> vector<34x32xf32>
    %c1_134 = arith.constant 1 : index
    %c0_135 = arith.constant 0 : index
    %c0_136 = arith.constant 0 : index
    %249 = vector.load %arg11[%c1_134, %c0_135, %c0_136] : memref<2x1x32xf32, #tpu.memory_space<vmem>>, vector<1x1x32xf32>
    %250 = vector.shape_cast %249 : vector<1x1x32xf32> to vector<1x32xf32>
    %251 = vector.broadcast %250 : vector<1x32xf32> to vector<34x32xf32>
    %252 = arith.addf %248, %251 : vector<34x32xf32>
    %c1_137 = arith.constant 1 : index
    %c0_138 = arith.constant 0 : index
    %c0_139 = arith.constant 0 : index
    %253 = vector.load %arg12[%c1_137, %c0_138, %c0_139] : memref<2x32x32xf32, #tpu.memory_space<vmem>>, vector<1x32x32xf32>
    %254 = vector.shape_cast %253 : vector<1x32x32xf32> to vector<32x32xf32>
    %cst_140 = arith.constant dense<0.000000e+00> : vector<34x32xf32>
    %255 = tpu.matmul %238, %254, %cst_140 {dimension_numbers = #tpu.dot_dimension_numbers<[1], [0], [0], [1], [0, 0, 1, 1], [], []>} : vector<34x32xf32>, vector<32x32xf32>, vector<34x32xf32> -> vector<34x32xf32>
    %c1_141 = arith.constant 1 : index
    %c0_142 = arith.constant 0 : index
    %c0_143 = arith.constant 0 : index
    %256 = vector.load %arg13[%c1_141, %c0_142, %c0_143] : memref<2x1x32xf32, #tpu.memory_space<vmem>>, vector<1x1x32xf32>
    %257 = vector.shape_cast %256 : vector<1x1x32xf32> to vector<1x32xf32>
    %258 = vector.broadcast %257 : vector<1x32xf32> to vector<34x32xf32>
    %259 = arith.addf %255, %258 : vector<34x32xf32>
    %cst_144 = arith.constant 0.000000e+00 : f32
    %260 = vector.broadcast %cst_144 : f32 to vector<34x32xf32>
    %261 = vector.broadcast %7 : vector<1x32xf32> to vector<34x32xf32>
    %262 = arith.mulf %245, %261 : vector<34x32xf32>
    %cst_145 = arith.constant dense<0.000000e+00> : vector<34x34xf32>
    %263 = tpu.matmul %262, %252, %cst_145 {dimension_numbers = #tpu.dot_dimension_numbers<[1], [1], [0], [0], [0, 0, 1, 0], [], []>} : vector<34x32xf32>, vector<34x32xf32>, vector<34x34xf32> -> vector<34x34xf32>
    %264 = arith.addf %263, %5 : vector<34x34xf32>
    %cst_146 = arith.constant dense<0xFF800000> : vector<34xf32>
    %265 = vector.multi_reduction <maximumf>, %264, %cst_146 [1] : vector<34x34xf32> to vector<34xf32>
    %266 = vector.shape_cast %265 : vector<34xf32> to vector<34x1xf32>
    %267 = vector.broadcast %266 : vector<34x1xf32> to vector<34x34xf32>
    %268 = arith.subf %264, %267 : vector<34x34xf32>
    %269 = math.exp %268 : vector<34x34xf32>
    %cst_147 = arith.constant dense<0.000000e+00> : vector<34xf32>
    %270 = vector.multi_reduction <add>, %269, %cst_147 [1] : vector<34x34xf32> to vector<34xf32>
    %271 = vector.shape_cast %270 : vector<34xf32> to vector<34x1xf32>
    %272 = vector.broadcast %271 : vector<34x1xf32> to vector<34x34xf32>
    %273 = arith.divf %269, %272 : vector<34x34xf32>
    %cst_148 = arith.constant dense<0.000000e+00> : vector<34x32xf32>
    %274 = tpu.matmul %273, %259, %cst_148 {dimension_numbers = #tpu.dot_dimension_numbers<[1], [0], [0], [1], [0, 0, 1, 1], [], []>} : vector<34x34xf32>, vector<34x32xf32>, vector<34x32xf32> -> vector<34x32xf32>
    %275 = vector.broadcast %7 : vector<1x32xf32> to vector<34x32xf32>
    %276 = arith.mulf %274, %275 : vector<34x32xf32>
    %277 = arith.addf %260, %276 : vector<34x32xf32>
    %278 = vector.broadcast %9 : vector<1x32xf32> to vector<34x32xf32>
    %279 = arith.mulf %245, %278 : vector<34x32xf32>
    %cst_149 = arith.constant dense<0.000000e+00> : vector<34x34xf32>
    %280 = tpu.matmul %279, %252, %cst_149 {dimension_numbers = #tpu.dot_dimension_numbers<[1], [1], [0], [0], [0, 0, 1, 0], [], []>} : vector<34x32xf32>, vector<34x32xf32>, vector<34x34xf32> -> vector<34x34xf32>
    %281 = arith.addf %280, %5 : vector<34x34xf32>
    %cst_150 = arith.constant dense<0xFF800000> : vector<34xf32>
    %282 = vector.multi_reduction <maximumf>, %281, %cst_150 [1] : vector<34x34xf32> to vector<34xf32>
    %283 = vector.shape_cast %282 : vector<34xf32> to vector<34x1xf32>
    %284 = vector.broadcast %283 : vector<34x1xf32> to vector<34x34xf32>
    %285 = arith.subf %281, %284 : vector<34x34xf32>
    %286 = math.exp %285 : vector<34x34xf32>
    %cst_151 = arith.constant dense<0.000000e+00> : vector<34xf32>
    %287 = vector.multi_reduction <add>, %286, %cst_151 [1] : vector<34x34xf32> to vector<34xf32>
    %288 = vector.shape_cast %287 : vector<34xf32> to vector<34x1xf32>
    %289 = vector.broadcast %288 : vector<34x1xf32> to vector<34x34xf32>
    %290 = arith.divf %286, %289 : vector<34x34xf32>
    %cst_152 = arith.constant dense<0.000000e+00> : vector<34x32xf32>
    %291 = tpu.matmul %290, %259, %cst_152 {dimension_numbers = #tpu.dot_dimension_numbers<[1], [0], [0], [1], [0, 0, 1, 1], [], []>} : vector<34x34xf32>, vector<34x32xf32>, vector<34x32xf32> -> vector<34x32xf32>
    %292 = vector.broadcast %9 : vector<1x32xf32> to vector<34x32xf32>
    %293 = arith.mulf %291, %292 : vector<34x32xf32>
    %294 = arith.addf %277, %293 : vector<34x32xf32>
    %295 = vector.broadcast %11 : vector<1x32xf32> to vector<34x32xf32>
    %296 = arith.mulf %245, %295 : vector<34x32xf32>
    %cst_153 = arith.constant dense<0.000000e+00> : vector<34x34xf32>
    %297 = tpu.matmul %296, %252, %cst_153 {dimension_numbers = #tpu.dot_dimension_numbers<[1], [1], [0], [0], [0, 0, 1, 0], [], []>} : vector<34x32xf32>, vector<34x32xf32>, vector<34x34xf32> -> vector<34x34xf32>
    %298 = arith.addf %297, %5 : vector<34x34xf32>
    %cst_154 = arith.constant dense<0xFF800000> : vector<34xf32>
    %299 = vector.multi_reduction <maximumf>, %298, %cst_154 [1] : vector<34x34xf32> to vector<34xf32>
    %300 = vector.shape_cast %299 : vector<34xf32> to vector<34x1xf32>
    %301 = vector.broadcast %300 : vector<34x1xf32> to vector<34x34xf32>
    %302 = arith.subf %298, %301 : vector<34x34xf32>
    %303 = math.exp %302 : vector<34x34xf32>
    %cst_155 = arith.constant dense<0.000000e+00> : vector<34xf32>
    %304 = vector.multi_reduction <add>, %303, %cst_155 [1] : vector<34x34xf32> to vector<34xf32>
    %305 = vector.shape_cast %304 : vector<34xf32> to vector<34x1xf32>
    %306 = vector.broadcast %305 : vector<34x1xf32> to vector<34x34xf32>
    %307 = arith.divf %303, %306 : vector<34x34xf32>
    %cst_156 = arith.constant dense<0.000000e+00> : vector<34x32xf32>
    %308 = tpu.matmul %307, %259, %cst_156 {dimension_numbers = #tpu.dot_dimension_numbers<[1], [0], [0], [1], [0, 0, 1, 1], [], []>} : vector<34x34xf32>, vector<34x32xf32>, vector<34x32xf32> -> vector<34x32xf32>
    %309 = vector.broadcast %11 : vector<1x32xf32> to vector<34x32xf32>
    %310 = arith.mulf %308, %309 : vector<34x32xf32>
    %311 = arith.addf %294, %310 : vector<34x32xf32>
    %312 = vector.broadcast %13 : vector<1x32xf32> to vector<34x32xf32>
    %313 = arith.mulf %245, %312 : vector<34x32xf32>
    %cst_157 = arith.constant dense<0.000000e+00> : vector<34x34xf32>
    %314 = tpu.matmul %313, %252, %cst_157 {dimension_numbers = #tpu.dot_dimension_numbers<[1], [1], [0], [0], [0, 0, 1, 0], [], []>} : vector<34x32xf32>, vector<34x32xf32>, vector<34x34xf32> -> vector<34x34xf32>
    %315 = arith.addf %314, %5 : vector<34x34xf32>
    %cst_158 = arith.constant dense<0xFF800000> : vector<34xf32>
    %316 = vector.multi_reduction <maximumf>, %315, %cst_158 [1] : vector<34x34xf32> to vector<34xf32>
    %317 = vector.shape_cast %316 : vector<34xf32> to vector<34x1xf32>
    %318 = vector.broadcast %317 : vector<34x1xf32> to vector<34x34xf32>
    %319 = arith.subf %315, %318 : vector<34x34xf32>
    %320 = math.exp %319 : vector<34x34xf32>
    %cst_159 = arith.constant dense<0.000000e+00> : vector<34xf32>
    %321 = vector.multi_reduction <add>, %320, %cst_159 [1] : vector<34x34xf32> to vector<34xf32>
    %322 = vector.shape_cast %321 : vector<34xf32> to vector<34x1xf32>
    %323 = vector.broadcast %322 : vector<34x1xf32> to vector<34x34xf32>
    %324 = arith.divf %320, %323 : vector<34x34xf32>
    %cst_160 = arith.constant dense<0.000000e+00> : vector<34x32xf32>
    %325 = tpu.matmul %324, %259, %cst_160 {dimension_numbers = #tpu.dot_dimension_numbers<[1], [0], [0], [1], [0, 0, 1, 1], [], []>} : vector<34x34xf32>, vector<34x32xf32>, vector<34x32xf32> -> vector<34x32xf32>
    %326 = vector.broadcast %13 : vector<1x32xf32> to vector<34x32xf32>
    %327 = arith.mulf %325, %326 : vector<34x32xf32>
    %328 = arith.addf %311, %327 : vector<34x32xf32>
    %c1_161 = arith.constant 1 : index
    %c0_162 = arith.constant 0 : index
    %c0_163 = arith.constant 0 : index
    %329 = vector.load %arg14[%c1_161, %c0_162, %c0_163] : memref<2x32x32xf32, #tpu.memory_space<vmem>>, vector<1x32x32xf32>
    %330 = vector.shape_cast %329 : vector<1x32x32xf32> to vector<32x32xf32>
    %cst_164 = arith.constant dense<0.000000e+00> : vector<34x32xf32>
    %331 = tpu.matmul %328, %330, %cst_164 {dimension_numbers = #tpu.dot_dimension_numbers<[1], [0], [0], [1], [0, 0, 1, 1], [], []>} : vector<34x32xf32>, vector<32x32xf32>, vector<34x32xf32> -> vector<34x32xf32>
    %332 = arith.addf %214, %331 : vector<34x32xf32>
    %c1_165 = arith.constant 1 : index
    %c0_166 = arith.constant 0 : index
    %c0_167 = arith.constant 0 : index
    %333 = vector.load %arg15[%c1_165, %c0_166, %c0_167] : memref<2x1x32xf32, #tpu.memory_space<vmem>>, vector<1x1x32xf32>
    %334 = vector.shape_cast %333 : vector<1x1x32xf32> to vector<1x32xf32>
    %335 = vector.broadcast %334 : vector<1x32xf32> to vector<34x32xf32>
    %336 = arith.addf %332, %335 : vector<34x32xf32>
    %c1_168 = arith.constant 1 : index
    %c0_169 = arith.constant 0 : index
    %c0_170 = arith.constant 0 : index
    %337 = vector.load %arg16[%c1_168, %c0_169, %c0_170] : memref<2x1x32xf32, #tpu.memory_space<vmem>>, vector<1x1x32xf32>
    %338 = vector.shape_cast %337 : vector<1x1x32xf32> to vector<1x32xf32>
    %c1_171 = arith.constant 1 : index
    %c0_172 = arith.constant 0 : index
    %c0_173 = arith.constant 0 : index
    %339 = vector.load %arg17[%c1_171, %c0_172, %c0_173] : memref<2x1x32xf32, #tpu.memory_space<vmem>>, vector<1x1x32xf32>
    %340 = vector.shape_cast %339 : vector<1x1x32xf32> to vector<1x32xf32>
    %cst_174 = arith.constant dense<0.000000e+00> : vector<34xf32>
    %341 = vector.multi_reduction <add>, %336, %cst_174 [1] : vector<34x32xf32> to vector<34xf32>
    %342 = vector.shape_cast %341 : vector<34xf32> to vector<34x1xf32>
    %cst_175 = arith.constant 3.200000e+01 : f32
    %343 = vector.broadcast %cst_175 : f32 to vector<34x1xf32>
    %344 = arith.divf %342, %343 : vector<34x1xf32>
    %345 = vector.broadcast %344 : vector<34x1xf32> to vector<34x32xf32>
    %346 = arith.subf %336, %345 : vector<34x32xf32>
    %347 = arith.mulf %346, %346 : vector<34x32xf32>
    %cst_176 = arith.constant dense<0.000000e+00> : vector<34xf32>
    %348 = vector.multi_reduction <add>, %347, %cst_176 [1] : vector<34x32xf32> to vector<34xf32>
    %349 = vector.shape_cast %348 : vector<34xf32> to vector<34x1xf32>
    %cst_177 = arith.constant 3.200000e+01 : f32
    %350 = vector.broadcast %cst_177 : f32 to vector<34x1xf32>
    %351 = arith.divf %349, %350 : vector<34x1xf32>
    %cst_178 = arith.constant 9.99999997E-7 : f32
    %352 = vector.broadcast %cst_178 : f32 to vector<34x1xf32>
    %353 = arith.addf %351, %352 : vector<34x1xf32>
    %354 = math.rsqrt %353 : vector<34x1xf32>
    %355 = vector.broadcast %354 : vector<34x1xf32> to vector<34x32xf32>
    %356 = arith.mulf %346, %355 : vector<34x32xf32>
    %357 = vector.broadcast %338 : vector<1x32xf32> to vector<34x32xf32>
    %358 = arith.mulf %356, %357 : vector<34x32xf32>
    %359 = vector.broadcast %340 : vector<1x32xf32> to vector<34x32xf32>
    %360 = arith.addf %358, %359 : vector<34x32xf32>
    %c1_179 = arith.constant 1 : index
    %c0_180 = arith.constant 0 : index
    %c0_181 = arith.constant 0 : index
    %361 = vector.load %arg18[%c1_179, %c0_180, %c0_181] : memref<2x32x128xf32, #tpu.memory_space<vmem>>, vector<1x32x128xf32>
    %362 = vector.shape_cast %361 : vector<1x32x128xf32> to vector<32x128xf32>
    %cst_182 = arith.constant dense<0.000000e+00> : vector<34x128xf32>
    %363 = tpu.matmul %360, %362, %cst_182 {dimension_numbers = #tpu.dot_dimension_numbers<[1], [0], [0], [1], [0, 0, 1, 1], [], []>} : vector<34x32xf32>, vector<32x128xf32>, vector<34x128xf32> -> vector<34x128xf32>
    %c1_183 = arith.constant 1 : index
    %c0_184 = arith.constant 0 : index
    %c0_185 = arith.constant 0 : index
    %364 = vector.load %arg19[%c1_183, %c0_184, %c0_185] : memref<2x1x128xf32, #tpu.memory_space<vmem>>, vector<1x1x128xf32>
    %365 = vector.shape_cast %364 : vector<1x1x128xf32> to vector<1x128xf32>
    %366 = vector.broadcast %365 : vector<1x128xf32> to vector<34x128xf32>
    %367 = arith.addf %363, %366 : vector<34x128xf32>
    %cst_186 = arith.constant 5.000000e-01 : f32
    %368 = vector.broadcast %cst_186 : f32 to vector<34x128xf32>
    %369 = arith.mulf %368, %367 : vector<34x128xf32>
    %cst_187 = arith.constant 0.707106769 : f32
    %370 = vector.broadcast %cst_187 : f32 to vector<34x128xf32>
    %371 = arith.mulf %367, %370 : vector<34x128xf32>
    %372 = math.absf %371 : vector<34x128xf32>
    %cst_188 = arith.constant 0.327591091 : f32
    %373 = vector.broadcast %cst_188 : f32 to vector<34x128xf32>
    %374 = arith.mulf %373, %372 : vector<34x128xf32>
    %cst_189 = arith.constant 1.000000e+00 : f32
    %375 = vector.broadcast %cst_189 : f32 to vector<34x128xf32>
    %376 = arith.addf %375, %374 : vector<34x128xf32>
    %cst_190 = arith.constant 1.000000e+00 : f32
    %377 = vector.broadcast %cst_190 : f32 to vector<34x128xf32>
    %378 = arith.divf %377, %376 : vector<34x128xf32>
    %cst_191 = arith.constant 1.06140542 : f32
    %379 = vector.broadcast %cst_191 : f32 to vector<34x128xf32>
    %380 = arith.mulf %378, %379 : vector<34x128xf32>
    %cst_192 = arith.constant -1.45315206 : f32
    %381 = vector.broadcast %cst_192 : f32 to vector<34x128xf32>
    %382 = arith.addf %381, %380 : vector<34x128xf32>
    %383 = arith.mulf %378, %382 : vector<34x128xf32>
    %cst_193 = arith.constant 1.42141378 : f32
    %384 = vector.broadcast %cst_193 : f32 to vector<34x128xf32>
    %385 = arith.addf %384, %383 : vector<34x128xf32>
    %386 = arith.mulf %378, %385 : vector<34x128xf32>
    %cst_194 = arith.constant -0.284496725 : f32
    %387 = vector.broadcast %cst_194 : f32 to vector<34x128xf32>
    %388 = arith.addf %387, %386 : vector<34x128xf32>
    %389 = arith.mulf %378, %388 : vector<34x128xf32>
    %cst_195 = arith.constant 0.254829586 : f32
    %390 = vector.broadcast %cst_195 : f32 to vector<34x128xf32>
    %391 = arith.addf %390, %389 : vector<34x128xf32>
    %392 = arith.mulf %378, %391 : vector<34x128xf32>
    %cst_196 = arith.constant 0.000000e+00 : f32
    %393 = vector.broadcast %cst_196 : f32 to vector<34x128xf32>
    %394 = arith.subf %393, %372 : vector<34x128xf32>
    %395 = arith.mulf %394, %372 : vector<34x128xf32>
    %396 = math.exp %395 : vector<34x128xf32>
    %397 = arith.mulf %392, %396 : vector<34x128xf32>
    %cst_197 = arith.constant 1.000000e+00 : f32
    %398 = vector.broadcast %cst_197 : f32 to vector<34x128xf32>
    %399 = arith.subf %398, %397 : vector<34x128xf32>
    %cst_198 = arith.constant 0.000000e+00 : f32
    %400 = vector.broadcast %cst_198 : f32 to vector<34x128xf32>
    %401 = arith.cmpf olt, %371, %400 : vector<34x128xf32>
    %cst_199 = arith.constant 0.000000e+00 : f32
    %402 = vector.broadcast %cst_199 : f32 to vector<34x128xf32>
    %403 = arith.subf %402, %399 : vector<34x128xf32>
    %404 = arith.select %401, %403, %399 : vector<34x128xi1>, vector<34x128xf32>
    %cst_200 = arith.constant 1.000000e+00 : f32
    %405 = vector.broadcast %cst_200 : f32 to vector<34x128xf32>
    %406 = arith.addf %405, %404 : vector<34x128xf32>
    %407 = arith.mulf %369, %406 : vector<34x128xf32>
    %c1_201 = arith.constant 1 : index
    %c0_202 = arith.constant 0 : index
    %c0_203 = arith.constant 0 : index
    %408 = vector.load %arg20[%c1_201, %c0_202, %c0_203] : memref<2x128x32xf32, #tpu.memory_space<vmem>>, vector<1x128x32xf32>
    %409 = vector.shape_cast %408 : vector<1x128x32xf32> to vector<128x32xf32>
    %cst_204 = arith.constant dense<0.000000e+00> : vector<34x32xf32>
    %410 = tpu.matmul %407, %409, %cst_204 {dimension_numbers = #tpu.dot_dimension_numbers<[1], [0], [0], [1], [0, 0, 1, 1], [], []>} : vector<34x128xf32>, vector<128x32xf32>, vector<34x32xf32> -> vector<34x32xf32>
    %c1_205 = arith.constant 1 : index
    %c0_206 = arith.constant 0 : index
    %c0_207 = arith.constant 0 : index
    %411 = vector.load %arg21[%c1_205, %c0_206, %c0_207] : memref<2x1x32xf32, #tpu.memory_space<vmem>>, vector<1x1x32xf32>
    %412 = vector.shape_cast %411 : vector<1x1x32xf32> to vector<1x32xf32>
    %413 = vector.broadcast %412 : vector<1x32xf32> to vector<34x32xf32>
    %414 = arith.addf %410, %413 : vector<34x32xf32>
    %415 = arith.addf %336, %414 : vector<34x32xf32>
    %c0_208 = arith.constant 0 : index
    %c0_209 = arith.constant 0 : index
    %416 = vector.load %arg5[%c0_208, %c0_209] : memref<2x34xf32, #tpu.memory_space<vmem>>, vector<2x34xf32>
    %cst_210 = arith.constant dense<0.000000e+00> : vector<2x32xf32>
    %417 = tpu.matmul %416, %415, %cst_210 {dimension_numbers = #tpu.dot_dimension_numbers<[1], [0], [0], [1], [0, 0, 1, 1], [], []>} : vector<2x34xf32>, vector<34x32xf32>, vector<2x32xf32> -> vector<2x32xf32>
    %c0_211 = arith.constant 0 : index
    %c0_212 = arith.constant 0 : index
    %418 = vector.load %arg22[%c0_211, %c0_212] : memref<1x32xf32, #tpu.memory_space<vmem>>, vector<1x32xf32>
    %c0_213 = arith.constant 0 : index
    %c0_214 = arith.constant 0 : index
    %419 = vector.load %arg23[%c0_213, %c0_214] : memref<1x32xf32, #tpu.memory_space<vmem>>, vector<1x32xf32>
    %cst_215 = arith.constant dense<0.000000e+00> : vector<2xf32>
    %420 = vector.multi_reduction <add>, %417, %cst_215 [1] : vector<2x32xf32> to vector<2xf32>
    %421 = vector.shape_cast %420 : vector<2xf32> to vector<2x1xf32>
    %cst_216 = arith.constant 3.200000e+01 : f32
    %422 = vector.broadcast %cst_216 : f32 to vector<2x1xf32>
    %423 = arith.divf %421, %422 : vector<2x1xf32>
    %424 = vector.broadcast %423 : vector<2x1xf32> to vector<2x32xf32>
    %425 = arith.subf %417, %424 : vector<2x32xf32>
    %426 = arith.mulf %425, %425 : vector<2x32xf32>
    %cst_217 = arith.constant dense<0.000000e+00> : vector<2xf32>
    %427 = vector.multi_reduction <add>, %426, %cst_217 [1] : vector<2x32xf32> to vector<2xf32>
    %428 = vector.shape_cast %427 : vector<2xf32> to vector<2x1xf32>
    %cst_218 = arith.constant 3.200000e+01 : f32
    %429 = vector.broadcast %cst_218 : f32 to vector<2x1xf32>
    %430 = arith.divf %428, %429 : vector<2x1xf32>
    %cst_219 = arith.constant 9.99999997E-7 : f32
    %431 = vector.broadcast %cst_219 : f32 to vector<2x1xf32>
    %432 = arith.addf %430, %431 : vector<2x1xf32>
    %433 = math.rsqrt %432 : vector<2x1xf32>
    %434 = vector.broadcast %433 : vector<2x1xf32> to vector<2x32xf32>
    %435 = arith.mulf %425, %434 : vector<2x32xf32>
    %436 = vector.broadcast %418 : vector<1x32xf32> to vector<2x32xf32>
    %437 = arith.mulf %435, %436 : vector<2x32xf32>
    %438 = vector.broadcast %419 : vector<1x32xf32> to vector<2x32xf32>
    %439 = arith.addf %437, %438 : vector<2x32xf32>
    %c0_220 = arith.constant 0 : index
    %c0_221 = arith.constant 0 : index
    %440 = vector.load %arg24[%c0_220, %c0_221] : memref<32x10xf32, #tpu.memory_space<vmem>>, vector<32x10xf32>
    %cst_222 = arith.constant dense<0.000000e+00> : vector<2x10xf32>
    %441 = tpu.matmul %439, %440, %cst_222 {dimension_numbers = #tpu.dot_dimension_numbers<[1], [0], [0], [1], [0, 0, 1, 1], [], []>} : vector<2x32xf32>, vector<32x10xf32>, vector<2x10xf32> -> vector<2x10xf32>
    %c0_223 = arith.constant 0 : index
    %c0_224 = arith.constant 0 : index
    %442 = vector.load %arg25[%c0_223, %c0_224] : memref<1x10xf32, #tpu.memory_space<vmem>>, vector<1x10xf32>
    %443 = vector.broadcast %442 : vector<1x10xf32> to vector<2x10xf32>
    %444 = arith.addf %441, %443 : vector<2x10xf32>
    %c0_225 = arith.constant 0 : index
    %c0_226 = arith.constant 0 : index
    %445 = vector.load %arg26[%c0_225, %c0_226] : memref<2x10xf32, #tpu.memory_space<vmem>>, vector<2x10xf32>
    tpu.vector_store %arg26[%c0_225, %c0_226], %444 {strides = array<i32>} : memref<2x10xf32, #tpu.memory_space<vmem>>, vector<2x10xf32>,
    return
  }
}

</mosaic_0001>

<bundles_post_ra>
// kernel: tile.9
= control target key start
LH: loop header
LB: loop body
LE: loop exit
PB: predicated region body
PF: predicated region fallthrough
CT: control target
= control target key end

     0   :  { %vm3_vm0 = vcmask 261120   ;;  %s11_s6 = smov 3  ;;  %s74_s0 = inlined_call_operand.vmem [shape: f32[2,17,32], index: 0, kind: input, shape index: {}]   ;;  %s75_s1 = inlined_call_operand.vmem [shape: f32[34,32], index: 1, kind: output, shape index: {}]  }
   0x1   :  { %v2_v0 = vld [vmem:[%s74_s0] sm:$0xff]   ;;  %v26_v1 = vld [vmem:[%s74_s0 + $0x8] sm:$0xff]  }
   0x2   :  { %v28_v2 = vld [vmem:[%s74_s0 + $0x10] ss:$8 sm:%s11_s6]   ;;  %4 = vst.msk [vmem:[%s75_s1] sm:$0xff] %vm3_vm0, %v2_v0  }
   0x3   :  { %v30_v3 = vld [vmem:[%s74_s0 + $0x19] sm:$0xff]   ;;  %27 = vst.msk [vmem:[%s75_s1 + $0x8] sm:$0xff] %vm3_vm0, %v26_v1   ;;  %v32_v4 = vld [vmem:[%s74_s0 + $0x21] sm:$0xff]  }
   0x4   :  { %29 = vst.msk [vmem:[%s75_s1 + $0x10] sm:$0x3] %vm3_vm0, %v28_v2  }
   0x5   :  { %31 = vst.msk [vmem:[%s75_s1 + $0x12] sm:$0xff] %vm3_vm0, %v30_v3  }
   0x6   :  { %33 = vst.msk [vmem:[%s75_s1 + $0x1a] sm:$0xff] %vm3_vm0, %v32_v4  }

// kernel: vit_forward_pallas.1
= control target key start
LH: loop header
LB: loop body
LE: loop exit
PB: predicated region body
PF: predicated region fallthrough
CT: control target
= control target key end

     0   :  { %s6373_s0 = inlined_call_operand.vmem [shape: f32[34,49], index: 0, kind: input, shape index: {}]   ;;  %s6374_s1 = inlined_call_operand.vmem [shape: f32[49,32], index: 1, kind: input, shape index: {}]   ;;  %s6375_s2 = inlined_call_operand.vmem [shape: f32[34,32], index: 2, kind: input, shape index: {}]   ;;  %s6376_s3 = inlined_call_operand.vmem [shape: f32[34,34], index: 3, kind: input, shape index: {}]   ;;  %s6377_s4 = inlined_call_operand.vmem [shape: f32[4,1,32], index: 4, kind: input, shape index: {}]   ;;  %s6378_s5 = inlined_call_operand.vmem [shape: f32[2,34], index: 5, kind: input, shape index: {}]   ;;  %s6379_s6 = inlined_call_operand.vmem [shape: f32[2,1,32], index: 6, kind: input, shape index: {}]   ;;  %s6380_s7 = inlined_call_operand.vmem [shape: f32[2,1,32], index: 7, kind: input, shape index: {}]   ;;  %s6381_s8 = inlined_call_operand.vmem [shape: f32[2,32,32], index: 8, kind: input, shape index: {}]   ;;  %s6382_s9 = inlined_call_operand.vmem [shape: f32[2,1,32], index: 9, kind: input, shape index: {}]   ;;  %s6383_s10 = inlined_call_operand.vmem [shape: f32[2,32,32], index: 10, kind: input, shape index: {}]   ;;  %s6384_s11 = inlined_call_operand.vmem [shape: f32[2,1,32], index: 11, kind: input, shape index: {}]   ;;  %s6385_s12 = inlined_call_operand.vmem [shape: f32[2,32,32], index: 12, kind: input, shape index: {}]   ;;  %s6386_s13 = inlined_call_operand.vmem [shape: f32[2,1,32], index: 13, kind: input, shape index: {}]   ;;  %s6387_s14 = inlined_call_operand.vmem [shape: f32[2,32,32], index: 14, kind: input, shape index: {}]   ;;  %s6388_s15 = inlined_call_operand.vmem [shape: f32[2,1,32], index: 15, kind: input, shape index: {}]   ;;  %s6389_s16 = inlined_call_operand.vmem [shape: f32[2,1,32], index: 16, kind: input, shape index: {}]   ;;  %s6390_s17 = inlined_call_operand.vmem [shape: f32[2,1,32], index: 17, kind: input, shape index: {}]   ;;  %s6391_s18 = inlined_call_operand.vmem [shape: f32[2,32,128], index: 18, kind: input, shape index: {}]   ;;  %s6392_s19 = inlined_call_operand.vmem [shape: f32[2,1,128], index: 19, kind: input, shape index: {}]   ;;  %s6393_s20 = inlined_call_operand.vmem [shape: f32[2,128,32], index: 20, kind: input, shape index: {}]   ;;  %s6394_s21 = inlined_call_operand.vmem [shape: f32[2,1,32], index: 21, kind: input, shape index: {}]   ;;  %s6395_s22 = inlined_call_operand.vmem [shape: f32[1,32], index: 22, kind: input, shape index: {}]   ;;  %s6396_s23 = inlined_call_operand.vmem [shape: f32[1,32], index: 23, kind: input, shape index: {}]   ;;  %s6397_s24 = inlined_call_operand.vmem [shape: f32[32,10], index: 24, kind: input, shape index: {}]   ;;  %s6398_s25 = inlined_call_operand.vmem [shape: f32[1,10], index: 25, kind: input, shape index: {}]   ;;  %s6399_s26 = inlined_call_operand.hbm [shape: f32[2,10], index: 26, kind: output, shape index: {}]  }
   0x1   :  { %6410 = sst [smem:[#allocation5_spill]] %s6373_s0 }
   0x2   :  { %6411 = sst [smem:[#allocation6_spill]] %s6374_s1 }
   0x3   :  { %6412 = sst [smem:[#allocation7_spill]] %s6375_s2 }
   0x4   :  { %6413 = sst [smem:[#allocation8_spill]] %s6376_s3 }
   0x5   :  { %6414 = sst [smem:[#allocation9_spill]] %s6377_s4 }
   0x6   :  { %6415 = sst [smem:[#allocation10_spill]] %s6378_s5 }
   0x7   :  { %6416 = sst [smem:[#allocation11_spill]] %s6379_s6 }
   0x8   :  { %6417 = sst [smem:[#allocation12_spill]] %s6380_s7 }
   0x9   :  { %6418 = sst [smem:[#allocation13_spill]] %s6381_s8 }
   0xa   :  { %6419 = sst [smem:[#allocation14_spill]] %s6382_s9 }
   0xb   :  { %6420 = sst [smem:[#allocation15_spill]] %s6383_s10 }
   0xc   :  { %s6421_s7 = sld [smem:[#allocation6_spill]]  ;;  %vm117_vm0 = vcmask 1040384   ;;  %vm101_vm1 = vcmask 400384  }
   0xd   :  { %s6422_s28 = sld [smem:[#allocation5_spill]] }
  0x12   :  { %v95_v0 = vld [vmem:[%s6421_s7 + $0x30] sm:$0x1]  ;;  %v94_v1 = vld [vmem:[%s6421_s7 + $0x28] sm:$0xff]  ;;  %v93_v2 = vld [vmem:[%s6421_s7 + $0x20] sm:$0xff] }
  0x13   :  { %3717 = vmatpush.msk.msra.mxu0 %vm117_vm0, %v95_v0  ;;  %v92_v3 = vld [vmem:[%s6421_s7 + $0x18] sm:$0xff]  ;;  %v91_v4 = vld [vmem:[%s6421_s7 + $0x10] sm:$0xff]  ;;  %v90_v5 = vld [vmem:[%s6421_s7 + $0x8] sm:$0xff] }
  0x14   :  { %v89_v6 = vld [vmem:[%s6421_s7] sm:$0xff] }
  0x15   :  { %131 = vmatpush.msra.mxu0 %v94_v1  ;;  %v84_v7 = vld [vmem:[%s6422_s28] sm:$0xff] }
  0x17   :  { %132 = vmatpush.msra.mxu0 %v93_v2 }
  0x19   :  { %133 = vmatpush.msra.mxu0 %v92_v3 }
  0x1b   :  { %134 = vmatpush.msra.mxu0 %v91_v4 }
  0x1d   :  { %135 = vmatpush.msra.mxu0 %v90_v5 }
  0x1f   :  { %136 = vmatpush.msra.mxu0 %v89_v6 }
  0x20   :  { %31 = vsyncpa [#allocation3], 0  ;;  %3718 = vmatmul.msk.f32.vlgmr.msra.gmra.mxu0 %vm101_vm1, %v84_v7  ;;  %v85_v8 = vld [vmem:[%s6422_s28 + $0x8] sm:$0xff]  ;;  %v86_v9 = vld [vmem:[%s6422_s28 + $0x10] sm:$0xff]  ;;  %s6423_s6 = sld [smem:[#allocation7_spill]]  ;;  %vm167_vm2 = vcmask 261120  }
  0x21   :  { %v87_v10 = vld [vmem:[%s6422_s28 + $0x18] sm:$0xff]  ;;  %v88_v11 = vld [vmem:[%s6422_s28 + $0x20] sm:$0x3]  ;;  %vm180_vm3 = vcmask 254976   ;;  %v4277_v32 = vmov 32.0   ;;  %s6424_s30 = sld [smem:[#allocation13_spill]] }
  0x22   :  { %3990 = vrcp.f32 %v4277_v32  ;;  %s6425_s10 = sld [smem:[#allocation15_spill]]  ;;  %v400_v2 = vld [vmem:[%s6385_s12 + $0x18] sm:$0xff]  ;;  %v399_v5 = vld [vmem:[%s6385_s12 + $0x10] sm:$0xff] }
  0x23   :  { %417 = vmatpush.msra.mxu3 %v400_v2  ;;  %s6426_s7 = sld [smem:[#allocation11_spill]] }
  0x24   :  { %s6427_s5 = sld [smem:[#allocation12_spill]] }
  0x25   :  { %418 = vmatpush.msra.mxu3 %v399_v5  ;;  %s6428_s4 = sld [smem:[#allocation14_spill]] }
  0x26   :  { %v96_v12 = vld [vmem:[%s6423_s6] sm:$0xff]  ;;  %v97_v16 = vld [vmem:[%s6423_s6 + $0x8] sm:$0xff]  ;;  %v98_v20 = vld [vmem:[%s6423_s6 + $0x10] sm:$0xff]  ;;  %s6429_s9 = sld [smem:[#allocation9_spill]] }
  0x27   :  { %v99_v24 = vld [vmem:[%s6423_s6 + $0x18] sm:$0xff]  ;;  %v100_v28 = vld [vmem:[%s6423_s6 + $0x20] sm:$0x3]  ;;  %v304_v3 = vld [vmem:[%s6424_s30 + $0x10] sm:$0xff]  ;;  %s6430_s0 = sld [smem:[#allocation8_spill]] }
  0x28   :  { %3719 = vmatmul.msk.f32.gmra.mxu0 %vm101_vm1, %v85_v8  ;;  %v3991_v33 = vpop.eup %3990  ;;  %v305_v0 = vld [vmem:[%s6424_s30 + $0x18] sm:$0xff]  ;;  %v359_v4 = vld [vmem:[%s6425_s10 + $0x10] sm:$0xff]  ;;  %v303_v6 = vld [vmem:[%s6424_s30 + $0x8] sm:$0xff] }
  0x29   :  { %v185_v34 = vmul.f32 32.0, %v3991_v33  ;;  %vm189_vm4 = vweird.f32 %v3991_v33  ;;  %v360_v1 = vld [vmem:[%s6425_s10 + $0x18] sm:$0xff]  ;;  %337 = vmatpush.msrb.mxu0 %v305_v0  ;;  %3953 = vmatpush.msra.mxu1 %v305_v0  ;;  %v358_v7 = vld [vmem:[%s6425_s10 + $0x8] sm:$0xff] }
  0x2a   :  { %377 = vmatpush.msra.mxu2 %v360_v1  ;;  %v398_v8 = vld [vmem:[%s6385_s12 + $0x8] sm:$0xff] }
  0x2b   :  { %v186_v35 = vsub.f32 1.0, %v185_v34  ;;  %338 = vmatpush.msrb.mxu0 %v304_v3  ;;  %3954 = vmatpush.msra.mxu1 %v304_v3  ;;  %v4569_v34 = vld [vmem:[%s6426_s7] ss:$0 sm:$0xff] }
  0x2c   :  { %378 = vmatpush.msra.mxu2 %v359_v4  ;;  %419 = vmatpush.msra.mxu3 %v398_v8 }
  0x2d   :  { %v187_v36 = vmul.f32 %v3991_v33, %v186_v35  ;;  %339 = vmatpush.msrb.mxu0 %v303_v6  ;;  %3955 = vmatpush.msra.mxu1 %v303_v6 }
  0x2e   :  { %379 = vmatpush.msra.mxu2 %v358_v7 }
  0x2f   :  { %v188_v37 = vadd.f32 %v3991_v33, %v187_v36 }
  0x30   :  { %3720 = vmatmul.msk.f32.gmra.mxu0 %vm101_vm1, %v86_v9  ;;  %v302_v9 = vld [vmem:[%s6424_s30] sm:$0xff] }
  0x31   :  { %v4490_v38 = vsel %vm189_vm4, %v3991_v33, %v188_v37  ;;  %340 = vmatpush.msrb.mxu0 %v302_v9  ;;  %3956 = vmatpush.msra.mxu1 %v302_v9 }
  0x38   :  { %3721 = vmatmul.msk.f32.gmra.mxu0 %vm101_vm1, %v87_v10  ;;  %v357_v10 = vld [vmem:[%s6425_s10] sm:$0xff] }
  0x39   :  { %380 = vmatpush.msra.mxu2 %v357_v10 }
  0x40   :  { %3722 = vmatmul.msk.f32.gmra.mxu0 %vm101_vm1, %v88_v11  ;;  %v397_v11 = vld [vmem:[%s6385_s12] sm:$0xff] }
  0x41   :  { %420 = vmatpush.msra.mxu3 %v397_v11 }
  0x9d   :  { %v138_v13 = vpop.f32.mrf.mxu0 }
  0x9e   :  { %v4458_v14 = vadd.f32 %v138_v13, %v96_v12 }
  0xa0   :  { %v168_v15 = vsel %vm167_vm2, %v4458_v14, 0.0 }
  0xa1   :  { %169 = vadd.xlane.f32.xlu0 %v168_v15 }
  0xa5   :  { %v141_v17 = vpop.f32.mrf.mxu0 }
  0xa6   :  { %v4465_v18 = vadd.f32 %v141_v17, %v97_v16 }
  0xa8   :  { %v171_v19 = vsel %vm167_vm2, %v4465_v18, 0.0 }
  0xa9   :  { %172 = vadd.xlane.f32.xlu0 %v171_v19 }
  0xad   :  { %v144_v21 = vpop.f32.mrf.mxu0 }
  0xae   :  { %v4472_v22 = vadd.f32 %v144_v21, %v98_v20 }
  0xb0   :  { %v174_v23 = vsel %vm167_vm2, %v4472_v22, 0.0 }
  0xb1   :  { %175 = vadd.xlane.f32.xlu1 %v174_v23 }
  0xb5   :  { %v147_v25 = vpop.f32.mrf.mxu0 }
  0xb6   :  { %v4479_v26 = vadd.f32 %v147_v25, %v99_v24 }
  0xb8   :  { %v177_v27 = vsel %vm167_vm2, %v4479_v26, 0.0 }
  0xb9   :  { %178 = vadd.xlane.f32.xlu1 %v177_v27 }
  0xbd   :  { %v150_v29 = vpop.f32.mrf.mxu0 }
  0xbe   :  { %v4486_v30 = vadd.f32 %v150_v29, %v100_v28 }
  0xc0   :  { %v181_v31 = vsel %vm180_vm3, %v4486_v30, 0.0 }
  0xc1   :  { %182 = vadd.xlane.f32.xlu2 %v181_v31 }
 0x114   :  { %v170_v39 = vpop.xlane.xlu0 %169 }
 0x115   :  { %v191_v40 = vmul.f32 %v4490_v38, %v170_v39  ;;  %v4575_v39 = vld [vmem:[%s6427_s5] ss:$0 sm:$0xff] }
 0x117   :  { %v4494_v41 = vsub.f32 %v4458_v14, %v191_v40 }
 0x119   :  { %v201_v42 = vmul.f32 %v4494_v41, %v4494_v41 }
 0x11b   :  { %v206_v43 = vsel %vm167_vm2, %v201_v42, 0.0 }
 0x11c   :  { %207 = vadd.xlane.f32.xlu2 %v206_v43  ;;  %v173_v44 = vpop.xlane.xlu0 %172 }
 0x11d   :  { %v192_v45 = vmul.f32 %v4490_v38, %v173_v44 }
 0x11f   :  { %v4501_v46 = vsub.f32 %v4465_v18, %v192_v45 }
 0x121   :  { %v202_v47 = vmul.f32 %v4501_v46, %v4501_v46 }
 0x123   :  { %v209_v48 = vsel %vm167_vm2, %v202_v47, 0.0 }
 0x124   :  { %v176_v49 = vpop.xlane.xlu1 %175  ;;  %210 = vadd.xlane.f32.xlu0 %v209_v48 }
 0x125   :  { %v193_v50 = vmul.f32 %v4490_v38, %v176_v49 }
 0x127   :  { %v4508_v51 = vsub.f32 %v4472_v22, %v193_v50 }
 0x129   :  { %v203_v52 = vmul.f32 %v4508_v51, %v4508_v51 }
 0x12b   :  { %v212_v53 = vsel %vm167_vm2, %v203_v52, 0.0 }
 0x12c   :  { %213 = vadd.xlane.f32.xlu1 %v212_v53  ;;  %v179_v54 = vpop.xlane.xlu1 %178 }
 0x12d   :  { %v194_v55 = vmul.f32 %v4490_v38, %v179_v54 }
 0x12f   :  { %v4515_v56 = vsub.f32 %v4479_v26, %v194_v55 }
 0x131   :  { %v204_v57 = vmul.f32 %v4515_v56, %v4515_v56 }
 0x133   :  { %v215_v58 = vsel %vm167_vm2, %v204_v57, 0.0 }
 0x134   :  { %v183_v59 = vpop.xlane.xlu2 %182  ;;  %216 = vadd.xlane.f32.xlu2 %v215_v58 }
 0x135   :  { %v195_v60 = vmul.f32 %v4490_v38, %v183_v59 }
 0x137   :  { %v4522_v61 = vsub.f32 %v4486_v30, %v195_v60 }
 0x139   :  { %v205_v62 = vmul.f32 %v4522_v61, %v4522_v61 }
 0x13b   :  { %v218_v63 = vsel %vm180_vm3, %v205_v62, 0.0 }
 0x13c   :  { %219 = vadd.xlane.f32.xlu0 %v218_v63 }
 0x18f   :  { %v208_v12 = vpop.xlane.xlu2 %207 }
 0x190   :  { %v221_v13 = vmul.f32 %v208_v12, %v4490_v38 }
 0x192   :  { %v226_v15 = vadd.f32 1e-06, %v221_v13 }
 0x194   :  { %3992 = vrsqrt.f32 %v226_v15  ;;  %vm237_vm6 = vweird.f32 %v226_v15 }
 0x197   :  { %v211_v16 = vpop.xlane.xlu0 %210 }
 0x198   :  { %v222_v17 = vmul.f32 %v211_v16, %v4490_v38 }
 0x19a   :  { %v3993_v19 = vpop.eup %3992  ;;  %v227_v20 = vadd.f32 1e-06, %v222_v17 }
 0x19b   :  { %v232_v21 = vmul.f32 %v3993_v19, %v226_v15  ;;  %vm238_vm5 = vweird.f32 %v3993_v19 }
 0x19c   :  { %3994 = vrsqrt.f32 %v227_v20  ;;  %vm239_vm7 = vmor %vm237_vm6, %vm238_vm5  ;;  %vm247_vm9 = vweird.f32 %v227_v20  ;;  %vm644_vm6 = vcmask 1041408  }
 0x19d   :  { %v233_v23 = vmul.f32 %v3993_v19, %v232_v21 }
 0x19f   :  { %v234_v24 = vmul.f32 0.5, %v233_v23  ;;  %v214_v25 = vpop.xlane.xlu1 %213 }
 0x1a0   :  { %v223_v27 = vmul.f32 %v214_v25, %v4490_v38 }
 0x1a1   :  { %v235_v28 = vsub.f32 1.5, %v234_v24 }
 0x1a2   :  { %v3995_v29 = vpop.eup %3994  ;;  %v228_v31 = vadd.f32 1e-06, %v223_v27 }
 0x1a3   :  { %v236_v32 = vmul.f32 %v3993_v19, %v235_v28  ;;  %v242_v33 = vmul.f32 %v3995_v29, %v227_v20  ;;  %vm248_vm8 = vweird.f32 %v3995_v29 }
 0x1a4   :  { %3996 = vrsqrt.f32 %v228_v31  ;;  %vm249_vm10 = vmor %vm247_vm9, %vm248_vm8  ;;  %vm257_vm12 = vweird.f32 %v228_v31  ;;  %vm520_vm8 = vcmask 271360  }
 0x1a5   :  { %v240_v35 = vsel %vm239_vm7, %v3993_v19, %v236_v32  ;;  %v243_v36 = vmul.f32 %v3995_v29, %v242_v33  ;;  %vm507_vm7 = vcmask 277504  }
 0x1a6   :  { %v281_v37 = vmul.f32 %v240_v35, %v4494_v41 }
 0x1a7   :  { %v244_v40 = vmul.f32 0.5, %v243_v36  ;;  %v217_v42 = vpop.xlane.xlu2 %216 }
 0x1a8   :  { %v224_v43 = vmul.f32 %v217_v42, %v4490_v38  ;;  %v289_v44 = vmul.f32 %v4569_v34, %v281_v37 }
 0x1a9   :  { %v245_v45 = vsub.f32 1.5, %v244_v40 }
 0x1aa   :  { %v3997_v47 = vpop.eup %3996  ;;  %v229_v48 = vadd.f32 1e-06, %v224_v43  ;;  %v297_v49 = vadd.f32 %v4575_v39, %v289_v44 }
 0x1ab   :  { %v246_v50 = vmul.f32 %v3995_v29, %v245_v45  ;;  %v252_v41 = vmul.f32 %v3997_v47, %v228_v31  ;;  %vm258_vm11 = vweird.f32 %v3997_v47 }
 0x1ac   :  { %3998 = vrsqrt.f32 %v229_v48  ;;  %3726 = vmatmul.msk.f32.vlgmr.msrb.gmra.mxu0 %vm167_vm2, %v297_v49  ;;  %3731 = vmatmul.msk.f32.vlgmr.msra.gmra.mxu2 %vm167_vm2, %v297_v49  ;;  %vm259_vm13 = vmor %vm257_vm12, %vm258_vm11  ;;  %vm267_vm15 = vweird.f32 %v229_v48 }
 0x1ad   :  { %v250_v52 = vsel %vm249_vm10, %v3995_v29, %v246_v50  ;;  %v253_v53 = vmul.f32 %v3997_v47, %v252_v41  ;;  %3736 = vmatmul.msk.f32.vlgmr.msra.gmra.mxu3 %vm167_vm2, %v297_v49  ;;  %v3965_v50 = vld [vmem:[%s6428_s4] ss:$0 sm:$0xff] }
 0x1ae   :  { %v282_v54 = vmul.f32 %v250_v52, %v4501_v46 }
 0x1af   :  { %v254_v55 = vmul.f32 0.5, %v253_v53  ;;  %v220_v57 = vpop.xlane.xlu0 %219  ;;  %v3970_v53 = vld [vmem:[%s6429_s9] ss:$0 sm:$0xff] }
 0x1b0   :  { %v225_v58 = vmul.f32 %v220_v57, %v4490_v38  ;;  %v290_v59 = vmul.f32 %v4569_v34, %v282_v54  ;;  %v3971_v54 = vld [vmem:[%s6429_s9 + $0x1] ss:$0 sm:$0xff] }
 0x1b1   :  { %v255_v60 = vsub.f32 1.5, %v254_v55 }
 0x1b2   :  { %v3999_v62 = vpop.eup %3998  ;;  %v230_v63 = vadd.f32 1e-06, %v225_v58  ;;  %v298_v0 = vadd.f32 %v4575_v39, %v290_v59 }
 0x1b3   :  { %v256_v1 = vmul.f32 %v3997_v47, %v255_v60  ;;  %v262_v2 = vmul.f32 %v3999_v62, %v229_v48  ;;  %vm268_vm14 = vweird.f32 %v3999_v62 }
 0x1b4   :  { %4000 = vrsqrt.f32 %v230_v63  ;;  %3727 = vmatmul.msk.f32.gmra.mxu0 %vm167_vm2, %v298_v0  ;;  %3732 = vmatmul.msk.f32.gmra.mxu2 %vm167_vm2, %v298_v0  ;;  %vm269_vm0 = vmor %vm267_vm15, %vm268_vm14  ;;  %vm277_vm4 = vweird.f32 %v230_v63 }
 0x1b5   :  { %v260_v46 = vsel %vm259_vm13, %v3997_v47, %v256_v1  ;;  %v263_v3 = vmul.f32 %v3999_v62, %v262_v2  ;;  %3737 = vmatmul.msk.f32.gmra.mxu3 %vm167_vm2, %v298_v0 }
 0x1b6   :  { %v283_v4 = vmul.f32 %v260_v46, %v4508_v51 }
 0x1b7   :  { %v264_v5 = vmul.f32 0.5, %v263_v3 }
 0x1b8   :  { %v291_v6 = vmul.f32 %v4569_v34, %v283_v4 }
 0x1b9   :  { %v265_v7 = vsub.f32 1.5, %v264_v5 }
 0x1ba   :  { %v4001_v8 = vpop.eup %4000  ;;  %v299_v9 = vadd.f32 %v4575_v39, %v291_v6 }
 0x1bb   :  { %v266_v10 = vmul.f32 %v3999_v62, %v265_v7  ;;  %v272_v11 = vmul.f32 %v4001_v8, %v230_v63  ;;  %vm278_vm1 = vweird.f32 %v4001_v8 }
 0x1bc   :  { %3728 = vmatmul.msk.f32.vlgmr.msra.gmra.mxu1 %vm167_vm2, %v299_v9  ;;  %3733 = vmatmul.msk.f32.gmra.mxu2 %vm167_vm2, %v299_v9  ;;  %vm279_vm5 = vmor %vm277_vm4, %vm278_vm1 }
 0x1bd   :  { %v270_v12 = vsel %vm269_vm0, %v3999_v62, %v266_v10  ;;  %v273_v13 = vmul.f32 %v4001_v8, %v272_v11  ;;  %3738 = vmatmul.msk.f32.gmra.mxu3 %vm167_vm2, %v299_v9  ;;  %v3966_v11 = vld [vmem:[%s6429_s9 + $0x2] ss:$0 sm:$0xff] }
 0x1be   :  { %v284_v51 = vmul.f32 %v270_v12, %v4515_v56  ;;  %v3967_v12 = vld [vmem:[%s6429_s9 + $0x3] ss:$0 sm:$0xff] }
 0x1bf   :  { %v274_v15 = vmul.f32 0.5, %v273_v13 }
 0x1c0   :  { %v292_v16 = vmul.f32 %v4569_v34, %v284_v51 }
 0x1c1   :  { %v275_v17 = vsub.f32 1.5, %v274_v15 }
 0x1c2   :  { %v300_v19 = vadd.f32 %v4575_v39, %v292_v16 }
 0x1c3   :  { %v276_v20 = vmul.f32 %v4001_v8, %v275_v17 }
 0x1c4   :  { %3729 = vmatmul.msk.f32.gmra.mxu1 %vm167_vm2, %v300_v19  ;;  %3734 = vmatmul.msk.f32.gmra.mxu2 %vm167_vm2, %v300_v19 }
 0x1c5   :  { %v280_v21 = vsel %vm279_vm5, %v4001_v8, %v276_v20  ;;  %3739 = vmatmul.msk.f32.gmra.mxu3 %vm167_vm2, %v300_v19 }
 0x1c6   :  { %v285_v23 = vmul.f32 %v280_v21, %v4522_v61  ;;  %v3968_v61 = vld [vmem:[%s6384_s11] ss:$0 sm:$0xff] }
 0x1c8   :  { %v293_v56 = vmul.f32 %v4569_v34, %v285_v23  ;;  %v3969_v34 = vld [vmem:[%s6386_s13] ss:$0 sm:$0xff] }
 0x1ca   :  { %v301_v24 = vadd.f32 %v4575_v39, %v293_v56 }
 0x1cc   :  { %3730 = vmatmul.msk.f32.gmra.mxu1 %vm167_vm2, %v301_v24  ;;  %3735 = vmatmul.msk.f32.gmra.mxu2 %vm167_vm2, %v301_v24 }
 0x1cd   :  { %3740 = vmatmul.msk.f32.gmra.mxu3 %vm167_vm2, %v301_v24  ;;  %v153_v24 = vld [vmem:[%s6430_s0] sm:$0xff] }
 0x229   :  { %v342_v49 = vpop.f32.mrf.mxu0 }
 0x22a   :  { %v343_v52 = vadd.f32 %v3965_v50, %v342_v49 }
 0x22c   :  { %v440_v57 = vmul.f32 %v3970_v53, %v343_v52  ;;  %v693_v58 = vmul.f32 %v3971_v54, %v343_v52  ;;  %v925_v13 = vmul.f32 %v3966_v11, %v343_v52  ;;  %v1157_v51 = vmul.f32 %v3967_v12, %v343_v52 }
 0x22f   :  { %v382_v25 = vpop.f32.mrf.mxu2 }
 0x230   :  { %v422_v27 = vpop.f32.mrf.mxu3  ;;  %v383_v55 = vadd.f32 %v3968_v61, %v382_v25 }
 0x231   :  { %v423_v48 = vadd.f32 %v3969_v34, %v422_v27  ;;  %v345_v59 = vpop.f32.mrf.mxu0 }
 0x232   :  { %v346_v60 = vadd.f32 %v3965_v50, %v345_v59 }
 0x234   :  { %v441_v63 = vmul.f32 %v3970_v53, %v346_v60  ;;  %v694_v0 = vmul.f32 %v3971_v54, %v346_v60  ;;  %v926_v15 = vmul.f32 %v3966_v11, %v346_v60  ;;  %v1158_v16 = vmul.f32 %v3967_v12, %v346_v60 }
 0x237   :  { %v385_v28 = vpop.f32.mrf.mxu2 }
 0x238   :  { %v425_v29 = vpop.f32.mrf.mxu3  ;;  %v386_v41 = vadd.f32 %v3968_v61, %v385_v28 }
 0x239   :  { %v426_v45 = vadd.f32 %v3969_v34, %v425_v29  ;;  %v348_v62 = vpop.f32.mrf.mxu1 }
 0x23a   :  { %v349_v1 = vadd.f32 %v3965_v50, %v348_v62 }
 0x23c   :  { %v442_v46 = vmul.f32 %v3970_v53, %v349_v1  ;;  %v695_v3 = vmul.f32 %v3971_v54, %v349_v1  ;;  %v927_v17 = vmul.f32 %v3966_v11, %v349_v1  ;;  %v1159_v19 = vmul.f32 %v3967_v12, %v349_v1 }
 0x23f   :  { %v388_v31 = vpop.f32.mrf.mxu2 }
 0x240   :  { %v428_v32 = vpop.f32.mrf.mxu3  ;;  %v389_v47 = vadd.f32 %v3968_v61, %v388_v31  ;;  %v154_v31 = vld [vmem:[%s6430_s0 + $0x8] sm:$0xff] }
 0x241   :  { %v429_v44 = vadd.f32 %v3969_v34, %v428_v32  ;;  %v351_v2 = vpop.f32.mrf.mxu1 }
 0x242   :  { %v352_v4 = vadd.f32 %v3965_v50, %v351_v2 }
 0x244   :  { %v443_v5 = vmul.f32 %v3970_v53, %v352_v4  ;;  %v696_v6 = vmul.f32 %v3971_v54, %v352_v4  ;;  %v928_v20 = vmul.f32 %v3966_v11, %v352_v4  ;;  %v1160_v21 = vmul.f32 %v3967_v12, %v352_v4 }
 0x247   :  { %v391_v33 = vpop.f32.mrf.mxu2 }
 0x248   :  { %v431_v35 = vpop.f32.mrf.mxu3  ;;  %v392_v43 = vadd.f32 %v3968_v61, %v391_v33 }
 0x249   :  { %v432_v42 = vadd.f32 %v3969_v34, %v431_v35  ;;  %v354_v7 = vpop.f32.mrf.mxu1 }
 0x24a   :  { %v355_v8 = vadd.f32 %v3965_v50, %v354_v7 }
 0x24c   :  { %v444_v9 = vmul.f32 %v3970_v53, %v355_v8  ;;  %v697_v10 = vmul.f32 %v3971_v54, %v355_v8  ;;  %v929_v23 = vmul.f32 %v3966_v11, %v355_v8  ;;  %v1161_v56 = vmul.f32 %v3967_v12, %v355_v8  ;;  %v4719_v54 = vld [vmem:[%s6430_s0 + $0x20] sm:$0x3] }
 0x24f   :  { %v394_v36 = vpop.f32.mrf.mxu2 }
 0x250   :  { %v395_v37 = vadd.f32 %v3968_v61, %v394_v36  ;;  %v434_v39 = vpop.f32.mrf.mxu3 }
 0x251   :  { %v435_v40 = vadd.f32 %v3969_v34, %v434_v39 }
 0x252   :  { %3741 = vmatpush.xpose.msk.msrb.mxu1 %vm167_vm2, %v395_v37  ;;  %3757 = vmatpush.xpose.msk.msrb.mxu3 %vm167_vm2, %v395_v37 }
 0x253   :  { %3751 = vmatpush.msk.msrb.mxu2 %vm644_vm6, %v435_v40  ;;  %3767 = vmatpush.msk.msra.mxu0 %vm644_vm6, %v435_v40 }
 0x255   :  { %660 = vmatpush.msrb.mxu2 %v432_v42  ;;  %892 = vmatpush.msra.mxu0 %v432_v42 }
 0x256   :  { %3742 = vmatpush.xpose.msk.msrb.mxu1 %vm167_vm2, %v392_v43  ;;  %3758 = vmatpush.xpose.msk.msrb.mxu3 %vm167_vm2, %v392_v43 }
 0x257   :  { %661 = vmatpush.msrb.mxu2 %v429_v44  ;;  %893 = vmatpush.msra.mxu0 %v429_v44 }
 0x259   :  { %662 = vmatpush.msrb.mxu2 %v426_v45  ;;  %894 = vmatpush.msra.mxu0 %v426_v45 }
 0x25a   :  { %3743 = vmatpush.xpose.msk.msrb.mxu1 %vm167_vm2, %v389_v47  ;;  %3759 = vmatpush.xpose.msk.msrb.mxu3 %vm167_vm2, %v389_v47 }
 0x25b   :  { %663 = vmatpush.msrb.mxu2 %v423_v48  ;;  %895 = vmatpush.msra.mxu0 %v423_v48 }
 0x25d   :  { %3783 = vmatpush.msk.msra.mxu2 %vm644_vm6, %v435_v40  ;;  %3799 = vmatpush.msk.msrb.mxu0 %vm644_vm6, %v435_v40 }
 0x25e   :  { %3744 = vmatpush.xpose.msk.msrb.mxu1 %vm167_vm2, %v386_v41  ;;  %3760 = vmatpush.xpose.msk.msrb.mxu3 %vm167_vm2, %v386_v41 }
 0x25f   :  { %1124 = vmatpush.msra.mxu2 %v432_v42  ;;  %1356 = vmatpush.msrb.mxu0 %v432_v42 }
 0x261   :  { %1125 = vmatpush.msra.mxu2 %v429_v44  ;;  %1357 = vmatpush.msrb.mxu0 %v429_v44 }
 0x262   :  { %3745 = vmatpush.xpose.msk.msrb.mxu1 %vm167_vm2, %v383_v55  ;;  %3761 = vmatpush.xpose.msk.msrb.mxu3 %vm167_vm2, %v383_v55 }
 0x263   :  { %1126 = vmatpush.msra.mxu2 %v426_v45  ;;  %1358 = vmatpush.msrb.mxu0 %v426_v45 }
 0x265   :  { %1127 = vmatpush.msra.mxu2 %v423_v48  ;;  %1359 = vmatpush.msrb.mxu0 %v423_v48 }
 0x266   :  { %3773 = vmatpush.xpose.msk.msra.mxu1 %vm167_vm2, %v395_v37  ;;  %3789 = vmatpush.xpose.msk.msra.mxu3 %vm167_vm2, %v395_v37  ;;  %v155_v37 = vld [vmem:[%s6430_s0 + $0x10] sm:$0xff] }
 0x267   :  { %3746 = vmatmul.msk.f32.vlgmr.msrb.gmra.mxu1 %vm167_vm2, %v440_v57  ;;  %3762 = vmatmul.msk.f32.vlgmr.msrb.gmra.mxu3 %vm167_vm2, %v693_v58 }
 0x26a   :  { %3774 = vmatpush.xpose.msk.msra.mxu1 %vm167_vm2, %v392_v43  ;;  %3790 = vmatpush.xpose.msk.msra.mxu3 %vm167_vm2, %v392_v43 }
 0x26e   :  { %3775 = vmatpush.xpose.msk.msra.mxu1 %vm167_vm2, %v389_v47  ;;  %3791 = vmatpush.xpose.msk.msra.mxu3 %vm167_vm2, %v389_v47  ;;  %v4705_v47 = vld [vmem:[%s6430_s0 + $0x18] sm:$0xff] }
 0x26f   :  { %3747 = vmatmul.msk.f32.gmra.mxu1 %vm167_vm2, %v441_v63  ;;  %3763 = vmatmul.msk.f32.gmra.mxu3 %vm167_vm2, %v694_v0 }
 0x272   :  { %3776 = vmatpush.xpose.msk.msra.mxu1 %vm167_vm2, %v386_v41  ;;  %3792 = vmatpush.xpose.msk.msra.mxu3 %vm167_vm2, %v386_v41 }
 0x276   :  { %3777 = vmatpush.xpose.msk.msra.mxu1 %vm167_vm2, %v383_v55  ;;  %3793 = vmatpush.xpose.msk.msra.mxu3 %vm167_vm2, %v383_v55 }
 0x277   :  { %3748 = vmatmul.msk.f32.gmra.mxu1 %vm167_vm2, %v442_v46  ;;  %3764 = vmatmul.msk.f32.gmra.mxu3 %vm167_vm2, %v695_v3 }
 0x27f   :  { %3749 = vmatmul.msk.f32.gmra.mxu1 %vm167_vm2, %v443_v5  ;;  %3765 = vmatmul.msk.f32.gmra.mxu3 %vm167_vm2, %v696_v6 }
 0x287   :  { %3750 = vmatmul.msk.f32.gmra.mxu1 %vm167_vm2, %v444_v9  ;;  %3766 = vmatmul.msk.f32.gmra.mxu3 %vm167_vm2, %v697_v10 }
 0x28f   :  { %3778 = vmatmul.msk.f32.vlgmr.msra.gmra.mxu1 %vm167_vm2, %v925_v13  ;;  %3794 = vmatmul.msk.f32.vlgmr.msra.gmra.mxu3 %vm167_vm2, %v1157_v51 }
 0x297   :  { %3779 = vmatmul.msk.f32.gmra.mxu1 %vm167_vm2, %v926_v15  ;;  %3795 = vmatmul.msk.f32.gmra.mxu3 %vm167_vm2, %v1158_v16 }
 0x29f   :  { %3780 = vmatmul.msk.f32.gmra.mxu1 %vm167_vm2, %v927_v17  ;;  %3796 = vmatmul.msk.f32.gmra.mxu3 %vm167_vm2, %v1159_v19 }
 0x2a7   :  { %3781 = vmatmul.msk.f32.gmra.mxu1 %vm167_vm2, %v928_v20  ;;  %3797 = vmatmul.msk.f32.gmra.mxu3 %vm167_vm2, %v1160_v21 }
 0x2af   :  { %3782 = vmatmul.msk.f32.gmra.mxu1 %vm167_vm2, %v929_v23  ;;  %3798 = vmatmul.msk.f32.gmra.mxu3 %vm167_vm2, %v1161_v56 }
 0x2e4   :  { %v492_v25 = vpop.f32.mrf.mxu1 }
 0x2e5   :  { %v4676_v27 = vadd.f32 %v492_v25, %v153_v24 }
 0x2e7   :  { %v508_v28 = vsel %vm507_vm7, %v4676_v27, -inf }
 0x2e8   :  { %509 = vmax.xlane.f32.xlu1 %v508_v28 }
 0x2ea   :  { %v730_v29 = vpop.f32.mrf.mxu3 }
 0x2eb   :  { %v4683_v32 = vadd.f32 %v730_v29, %v153_v24 }
 0x2ec   :  { %v495_v33 = vpop.f32.mrf.mxu1 }
 0x2ed   :  { %v4685_v35 = vadd.f32 %v495_v33, %v154_v31  ;;  %v745_v61 = vsel %vm507_vm7, %v4683_v32, -inf }
 0x2ee   :  { %746 = vmax.xlane.f32.xlu0 %v745_v61 }
 0x2ef   :  { %v511_v34 = vsel %vm507_vm7, %v4685_v35, -inf }
 0x2f0   :  { %512 = vmax.xlane.f32.xlu2 %v511_v34 }
 0x2f2   :  { %v733_v36 = vpop.f32.mrf.mxu3 }
 0x2f3   :  { %v4694_v39 = vadd.f32 %v733_v36, %v154_v31 }
 0x2f4   :  { %v498_v40 = vpop.f32.mrf.mxu1 }
 0x2f5   :  { %v4696_v42 = vadd.f32 %v498_v40, %v155_v37  ;;  %v748_v43 = vsel %vm507_vm7, %v4694_v39, -inf }
 0x2f7   :  { %v514_v44 = vsel %vm507_vm7, %v4696_v42, -inf }
 0x2f8   :  { %749 = vmax.xlane.f32.xlu2 %v748_v43  ;;  %515 = vmax.xlane.f32.xlu1 %v514_v44 }
 0x2fa   :  { %v736_v45 = vpop.f32.mrf.mxu3 }
 0x2fb   :  { %v4707_v48 = vadd.f32 %v736_v45, %v155_v37 }
 0x2fc   :  { %v501_v49 = vpop.f32.mrf.mxu1 }
 0x2fd   :  { %v4710_v50 = vadd.f32 %v501_v49, %v4705_v47  ;;  %v751_v52 = vsel %vm507_vm7, %v4707_v48, -inf }
 0x2ff   :  { %v517_v41 = vsel %vm507_vm7, %v4710_v50, -inf }
 0x300   :  { %518 = vmax.xlane.f32.xlu0 %v517_v41  ;;  %752 = vmax.xlane.f32.xlu1 %v751_v52 }
 0x302   :  { %v739_v53 = vpop.f32.mrf.mxu3 }
 0x303   :  { %v4722_v55 = vadd.f32 %v739_v53, %v4705_v47 }
 0x304   :  { %v504_v57 = vpop.f32.mrf.mxu1 }
 0x305   :  { %v4725_v58 = vadd.f32 %v504_v57, %v4719_v54  ;;  %v754_v59 = vsel %vm507_vm7, %v4722_v55, -inf }
 0x307   :  { %v521_v60 = vsel %vm520_vm8, %v4725_v58, -inf }
 0x308   :  { %755 = vmax.xlane.f32.xlu0 %v754_v59  ;;  %522 = vmax.xlane.f32.xlu2 %v521_v60 }
 0x30a   :  { %v742_v62 = vpop.f32.mrf.mxu3 }
 0x30b   :  { %v4732_v63 = vadd.f32 %v742_v62, %v4719_v54 }
 0x30c   :  { %v962_v0 = vpop.f32.mrf.mxu1 }
 0x30d   :  { %v4734_v1 = vadd.f32 %v962_v0, %v153_v24  ;;  %v757_v2 = vsel %vm520_vm8, %v4732_v63, -inf }
 0x30e   :  { %758 = vmax.xlane.f32.xlu1 %v757_v2 }
 0x30f   :  { %v977_v46 = vsel %vm507_vm7, %v4734_v1, -inf }
 0x310   :  { %978 = vmax.xlane.f32.xlu2 %v977_v46 }
 0x312   :  { %v1194_v3 = vpop.f32.mrf.mxu3 }
 0x313   :  { %v4740_v4 = vadd.f32 %v1194_v3, %v153_v24 }
 0x314   :  { %v965_v5 = vpop.f32.mrf.mxu1 }
 0x315   :  { %v4742_v6 = vadd.f32 %v965_v5, %v154_v31  ;;  %v1209_v7 = vsel %vm507_vm7, %v4740_v4, -inf }
 0x316   :  { %1210 = vmax.xlane.f32.xlu1 %v1209_v7 }
 0x317   :  { %v980_v8 = vsel %vm507_vm7, %v4742_v6, -inf }
 0x318   :  { %981 = vmax.xlane.f32.xlu0 %v980_v8 }
 0x31a   :  { %v1197_v9 = vpop.f32.mrf.mxu3 }
 0x31b   :  { %v4748_v10 = vadd.f32 %v1197_v9, %v154_v31 }
 0x31c   :  { %v968_v11 = vpop.f32.mrf.mxu1 }
 0x31d   :  { %v4750_v12 = vadd.f32 %v968_v11, %v155_v37  ;;  %v1212_v13 = vsel %vm507_vm7, %v4748_v10, -inf }
 0x31e   :  { %1213 = vmax.xlane.f32.xlu1 %v1212_v13 }
 0x31f   :  { %v983_v51 = vsel %vm507_vm7, %v4750_v12, -inf }
 0x320   :  { %984 = vmax.xlane.f32.xlu0 %v983_v51 }
 0x322   :  { %v1200_v15 = vpop.f32.mrf.mxu3 }
 0x323   :  { %v4756_v16 = vadd.f32 %v1200_v15, %v155_v37 }
 0x324   :  { %v971_v17 = vpop.f32.mrf.mxu1 }
 0x325   :  { %v4759_v19 = vadd.f32 %v971_v17, %v4705_v47  ;;  %v1215_v20 = vsel %vm507_vm7, %v4756_v16, -inf }
 0x326   :  { %1216 = vmax.xlane.f32.xlu2 %v1215_v20 }
 0x327   :  { %v986_v21 = vsel %vm507_vm7, %v4759_v19, -inf }
 0x328   :  { %987 = vmax.xlane.f32.xlu1 %v986_v21 }
 0x32a   :  { %v1203_v46 = vpop.f32.mrf.mxu3 }
 0x32b   :  { %v4798_v8 = vadd.f32 %v1203_v46, %v4705_v47 }
 0x32c   :  { %v974_v52 = vpop.f32.mrf.mxu1 }
 0x32d   :  { %v4783_v53 = vadd.f32 %v974_v52, %v4719_v54  ;;  %v1218_v21 = vsel %vm507_vm7, %v4798_v8, -inf }
 0x32f   :  { %v989_v5 = vsel %vm520_vm8, %v4783_v53, -inf }
 0x35b   :  { %v510_v23 = vpop.xlane.xlu1 %509 }
 0x35c   :  { %v524_v56 = vsub.f32 %v4676_v27, %v510_v23 }
 0x35e   :  { %v529_v24 = vmul.f32 1.442695, %v524_v56 }
 0x360   :  { %4002 = vpow2.f32 %v529_v24 }
 0x361   :  { %v747_v25 = vpop.xlane.xlu0 %746 }
 0x362   :  { %v760_v28 = vsub.f32 %v4683_v32, %v747_v25 }
 0x363   :  { %v513_v29 = vpop.xlane.xlu2 %512 }
 0x364   :  { %v765_v31 = vmul.f32 1.442695, %v760_v28  ;;  %v525_v33 = vsub.f32 %v4685_v35, %v513_v29 }
 0x366   :  { %v4768_v61 = vpop.eup %4002  ;;  %4004 = vpow2.f32 %v765_v31  ;;  %v531_v34 = vmul.f32 1.442695, %v525_v33 }
 0x367   :  { %v539_v36 = vsel %vm507_vm7, %v4768_v61, 0.0 }
 0x368   :  { %4006 = vpow2.f32 %v531_v34  ;;  %540 = vadd.xlane.f32.xlu2 %v539_v36 }
 0x36b   :  { %v750_v37 = vpop.xlane.xlu2 %749  ;;  %v516_v27 = vpop.xlane.xlu1 %515 }
 0x36c   :  { %v4772_v40 = vpop.eup %4004  ;;  %v761_v43 = vsub.f32 %v4694_v39, %v750_v37  ;;  %v526_v32 = vsub.f32 %v4696_v42, %v516_v27 }
 0x36d   :  { %v775_v35 = vsel %vm507_vm7, %v4772_v40, 0.0 }
 0x36e   :  { %v4778_v44 = vpop.eup %4006  ;;  %v767_v45 = vmul.f32 1.442695, %v761_v43  ;;  %v533_v49 = vmul.f32 1.442695, %v526_v32  ;;  %776 = vadd.xlane.f32.xlu0 %v775_v35 }
 0x36f   :  { %v542_v41 = vsel %vm507_vm7, %v4778_v44, 0.0 }
 0x370   :  { %4008 = vpow2.f32 %v767_v45  ;;  %543 = vadd.xlane.f32.xlu2 %v542_v41 }
 0x371   :  { %4010 = vpow2.f32 %v533_v49 }
 0x373   :  { %v519_v39 = vpop.xlane.xlu0 %518  ;;  %v753_v42 = vpop.xlane.xlu1 %752 }
 0x374   :  { %v527_v57 = vsub.f32 %v4710_v50, %v519_v39  ;;  %v762_v59 = vsub.f32 %v4707_v48, %v753_v42 }
 0x376   :  { %v4787_v60 = vpop.eup %4008  ;;  %v535_v62 = vmul.f32 1.442695, %v527_v57  ;;  %v769_v0 = vmul.f32 1.442695, %v762_v59 }
 0x377   :  { %v4789_v2 = vpop.eup %4010  ;;  %v778_v3 = vsel %vm507_vm7, %v4787_v60, 0.0 }
 0x378   :  { %4012 = vpow2.f32 %v535_v62  ;;  %779 = vadd.xlane.f32.xlu1 %v778_v3  ;;  %v545_v50 = vsel %vm507_vm7, %v4789_v2, 0.0  ;;  %990 = vmax.xlane.f32.xlu2 %v989_v5 }
 0x379   :  { %4014 = vpow2.f32 %v769_v0  ;;  %546 = vadd.xlane.f32.xlu0 %v545_v50 }
 0x37b   :  { %v756_v48 = vpop.xlane.xlu0 %755  ;;  %v523_v7 = vpop.xlane.xlu2 %522 }
 0x37c   :  { %v763_v9 = vsub.f32 %v4722_v55, %v756_v48  ;;  %v528_v11 = vsub.f32 %v4725_v58, %v523_v7  ;;  %v1206_v55 = vpop.f32.mrf.mxu3 }
 0x37d   :  { %v4814_v24 = vadd.f32 %v1206_v55, %v4719_v54 }
 0x37e   :  { %v4802_v13 = vpop.eup %4012  ;;  %v771_v51 = vmul.f32 1.442695, %v763_v9  ;;  %v537_v15 = vmul.f32 1.442695, %v528_v11 }
 0x37f   :  { %v4804_v17 = vpop.eup %4014  ;;  %v548_v20 = vsel %vm507_vm7, %v4802_v13, 0.0 }
 0x380   :  { %4016 = vpow2.f32 %v771_v51  ;;  %549 = vadd.xlane.f32.xlu1 %v548_v20  ;;  %v781_v47 = vsel %vm507_vm7, %v4804_v17, 0.0 }
 0x381   :  { %4018 = vpow2.f32 %v537_v15  ;;  %1219 = vmax.xlane.f32.xlu0 %v1218_v21  ;;  %782 = vadd.xlane.f32.xlu2 %v781_v47  ;;  %v759_v58 = vpop.xlane.xlu1 %758 }
 0x382   :  { %v764_v23 = vsub.f32 %v4732_v63, %v759_v58  ;;  %v1221_v63 = vsel %vm520_vm8, %v4814_v24, -inf }
 0x383   :  { %v979_v56 = vpop.xlane.xlu2 %978 }
 0x384   :  { %v773_v25 = vmul.f32 1.442695, %v764_v23  ;;  %v992_v28 = vsub.f32 %v4734_v1, %v979_v56 }
 0x386   :  { %v4817_v29 = vpop.eup %4016  ;;  %v997_v31 = vmul.f32 1.442695, %v992_v28  ;;  %4020 = vpow2.f32 %v773_v25 }
 0x387   :  { %v4819_v33 = vpop.eup %4018  ;;  %v784_v34 = vsel %vm507_vm7, %v4817_v29, 0.0 }
 0x388   :  { %4022 = vpow2.f32 %v997_v31  ;;  %v551_v54 = vsel %vm520_vm8, %v4819_v33, 0.0 }
 0x389   :  { %1222 = vmax.xlane.f32.xlu0 %v1221_v63  ;;  %785 = vadd.xlane.f32.xlu2 %v784_v34  ;;  %v1211_v36 = vpop.xlane.xlu1 %1210 }
 0x38a   :  { %552 = vadd.xlane.f32.xlu1 %v551_v54  ;;  %v1224_v1 = vsub.f32 %v4740_v4, %v1211_v36 }
 0x38b   :  { %v982_v37 = vpop.xlane.xlu0 %981 }
 0x38c   :  { %v1229_v27 = vmul.f32 1.442695, %v1224_v1  ;;  %v993_v43 = vsub.f32 %v4742_v6, %v982_v37  ;;  %v4829_v32 = vpop.eup %4020 }
 0x38d   :  { %v787_v41 = vsel %vm520_vm8, %v4829_v32, 0.0 }
 0x38e   :  { %v4831_v35 = vpop.eup %4022  ;;  %v999_v45 = vmul.f32 1.442695, %v993_v43  ;;  %4024 = vpow2.f32 %v1229_v27 }
 0x38f   :  { %v1007_v49 = vsel %vm507_vm7, %v4831_v35, 0.0 }
 0x390   :  { %4026 = vpow2.f32 %v999_v45 }
 0x391   :  { %788 = vadd.xlane.f32.xlu0 %v787_v41  ;;  %v1214_v52 = vpop.xlane.xlu1 %1213 }
 0x392   :  { %1008 = vadd.xlane.f32.xlu1 %v1007_v49  ;;  %v1225_v4 = vsub.f32 %v4748_v10, %v1214_v52 }
 0x393   :  { %v985_v39 = vpop.xlane.xlu0 %984 }
 0x394   :  { %v1231_v6 = vmul.f32 1.442695, %v1225_v4  ;;  %v994_v42 = vsub.f32 %v4750_v12, %v985_v39  ;;  %v4839_v57 = vpop.eup %4024 }
 0x395   :  { %v1239_v46 = vsel %vm507_vm7, %v4839_v57, 0.0 }
 0x396   :  { %v4841_v59 = vpop.eup %4026  ;;  %4028 = vpow2.f32 %v1231_v6  ;;  %v1001_v62 = vmul.f32 1.442695, %v994_v42 }
 0x397   :  { %v1010_v0 = vsel %vm507_vm7, %v4841_v59, 0.0 }
 0x398   :  { %4030 = vpow2.f32 %v1001_v62  ;;  %1011 = vadd.xlane.f32.xlu2 %v1010_v0 }
 0x399   :  { %1240 = vadd.xlane.f32.xlu0 %v1239_v46  ;;  %v1217_v10 = vpop.xlane.xlu2 %1216 }
 0x39a   :  { %v1226_v3 = vsub.f32 %v4756_v16, %v1217_v10 }
 0x39b   :  { %v988_v5 = vpop.xlane.xlu1 %987 }
 0x39c   :  { %v4848_v12 = vpop.eup %4028  ;;  %v1233_v50 = vmul.f32 1.442695, %v1226_v3  ;;  %v995_v48 = vsub.f32 %v4759_v19, %v988_v5 }
 0x39d   :  { %v1242_v11 = vsel %vm507_vm7, %v4848_v12, 0.0 }
 0x39e   :  { %v4851_v7 = vpop.eup %4030  ;;  %4032 = vpow2.f32 %v1233_v50  ;;  %v1003_v9 = vmul.f32 1.442695, %v995_v48 }
 0x39f   :  { %v1013_v51 = vsel %vm507_vm7, %v4851_v7, 0.0 }
 0x3a0   :  { %4034 = vpow2.f32 %v1003_v9  ;;  %1243 = vadd.xlane.f32.xlu2 %v1242_v11  ;;  %1014 = vadd.xlane.f32.xlu1 %v1013_v51 }
 0x3a4   :  { %v4857_v16 = vpop.eup %4032 }
 0x3a5   :  { %v1245_v20 = vsel %vm507_vm7, %v4857_v16, 0.0 }
 0x3a6   :  { %v4859_v15 = vpop.eup %4034 }
 0x3a7   :  { %v1016_v19 = vsel %vm507_vm7, %v4859_v15, 0.0 }
 0x3a8   :  { %1017 = vadd.xlane.f32.xlu0 %v1016_v19  ;;  %1246 = vadd.xlane.f32.xlu1 %v1245_v20 }
 0x3db   :  { %v541_v21 = vpop.xlane.xlu2 %540 }
 0x3dc   :  { %4036 = vrcp.f32 %v541_v21  ;;  %v563_v25 = vand.u32 2147483647, %v541_v21  ;;  %v565_v31 = vand.u32 2147483648, %v541_v21  ;;  %vm559_vm10 = vweird.f32 %v541_v21 }
 0x3de   :  { %vm4869_vm12 = vcmp.eq.f32.partialorder %v563_v25, 8.507059e+37  ;;  %v566_v27 = vor.u32 1.1754944e-38, %v565_v31 }
 0x3e1   :  { %v777_v47 = vpop.xlane.xlu0 %776 }
 0x3e2   :  { %v4037_v55 = vpop.eup %4036  ;;  %4038 = vrcp.f32 %v777_v47  ;;  %v799_v4 = vand.u32 2147483647, %v777_v47  ;;  %v801_v39 = vand.u32 2147483648, %v777_v47  ;;  %vm795_vm14 = vweird.f32 %v777_v47 }
 0x3e3   :  { %v555_v58 = vmul.f32 %v4037_v55, %v541_v21  ;;  %v544_v23 = vpop.xlane.xlu2 %543  ;;  %vm560_vm9 = vweird.f32 %v4037_v55 }
 0x3e4   :  { %4040 = vrcp.f32 %v544_v23  ;;  %vm4865_vm11 = vmor %vm559_vm10, %vm560_vm9  ;;  %v802_v48 = vor.u32 1.1754944e-38, %v801_v39  ;;  %v580_v9 = vand.u32 2147483648, %v544_v23  ;;  %vm800_vm1 = vcmp.eq.f32.partialorder %v799_v4, 8.507059e+37 }
 0x3e5   :  { %v556_v56 = vsub.f32 1.0, %v555_v58  ;;  %vm574_vm4 = vweird.f32 %v544_v23 }
 0x3e7   :  { %v557_v28 = vmul.f32 %v4037_v55, %v556_v56  ;;  %v581_v56 = vor.u32 1.1754944e-38, %v580_v9 }
 0x3e8   :  { %v4039_v34 = vpop.eup %4038 }
 0x3e9   :  { %v558_v63 = vadd.f32 %v4037_v55, %v557_v28  ;;  %v791_v54 = vmul.f32 %v4039_v34, %v777_v47  ;;  %vm796_vm13 = vweird.f32 %v4039_v34 }
 0x3ea   :  { %v4041_v36 = vpop.eup %4040  ;;  %vm797_vm0 = vmor %vm795_vm14, %vm796_vm13 }
 0x3eb   :  { %v792_v43 = vsub.f32 1.0, %v791_v54  ;;  %v570_v45 = vmul.f32 %v4041_v36, %v544_v23  ;;  %v4873_v49 = vpop.xlane.xlu1 %779  ;;  %v991_v41 = vpop.xlane.xlu2 %990  ;;  %v562_v52 = vsel %vm4865_vm11, %v4037_v55, %v558_v63  ;;  %vm575_vm15 = vweird.f32 %v4041_v36 }
 0x3ec   :  { %4042 = vrcp.f32 %v4873_v49  ;;  %v4878_v6 = vpop.xlane.xlu0 %546  ;;  %v996_v42 = vsub.f32 %v4783_v53, %v991_v41  ;;  %v567_v10 = vsel %vm4869_vm12, %v566_v27, %v562_v52  ;;  %v578_v53 = vand.u32 2147483647, %v544_v23  ;;  %vm4886_vm5 = vmor %vm574_vm4, %vm575_vm15 }
 0x3ed   :  { %v793_v62 = vmul.f32 %v4039_v34, %v792_v43  ;;  %v571_v0 = vsub.f32 1.0, %v570_v45  ;;  %4044 = vrcp.f32 %v4878_v6  ;;  %v568_v50 = vmul.f32 %v4768_v61, %v567_v10 }
 0x3ee   :  { %v1005_v46 = vmul.f32 1.442695, %v996_v42  ;;  %vm579_vm9 = vcmp.eq.f32.partialorder %v578_v53, 8.507059e+37  ;;  %v816_v63 = vand.u32 2147483648, %v4873_v49  ;;  %v595_v1 = vand.u32 2147483648, %v4878_v6 }
 0x3ef   :  { %v794_v3 = vadd.f32 %v4039_v34, %v793_v62  ;;  %v572_v5 = vmul.f32 %v4041_v36, %v571_v0  ;;  %3752 = vmatmul.msk.f32.vlgmr.msrb.gmra.mxu2 %vm507_vm7, %v568_v50  ;;  %v593_v52 = vand.u32 2147483647, %v4878_v6  ;;  %v814_v4 = vand.u32 2147483647, %v4873_v49 }
 0x3f0   :  { %4046 = vpow2.f32 %v1005_v46  ;;  %vm810_vm12 = vweird.f32 %v4873_v49  ;;  %vm589_vm13 = vweird.f32 %v4878_v6  ;;  %v817_v46 = vor.u32 1.1754944e-38, %v816_v63 }
 0x3f1   :  { %v798_v11 = vsel %vm797_vm0, %v4039_v34, %v794_v3  ;;  %v573_v51 = vadd.f32 %v4041_v36, %v572_v5  ;;  %v596_v10 = vor.u32 1.1754944e-38, %v595_v1  ;;  %vm594_vm0 = vcmp.eq.f32.partialorder %v593_v52, 8.507059e+37 }
 0x3f2   :  { %v4043_v19 = vpop.eup %4042  ;;  %v803_v20 = vsel %vm800_vm1, %v802_v48, %v798_v11  ;;  %vm815_vm1 = vcmp.eq.f32.partialorder %v814_v4, 8.507059e+37 }
 0x3f3   :  { %v4890_v47 = vpop.eup %4044  ;;  %v806_v61 = vmul.f32 %v4043_v19, %v4873_v49  ;;  %v4893_v55 = vpop.xlane.xlu1 %549  ;;  %v804_v58 = vmul.f32 %v4772_v40, %v803_v20  ;;  %v577_v23 = vsel %vm4886_vm5, %v4041_v36, %v573_v51  ;;  %vm811_vm10 = vweird.f32 %v4043_v19 }
 0x3f4   :  { %v585_v25 = vmul.f32 %v4890_v47, %v4878_v6  ;;  %4048 = vrcp.f32 %v4893_v55  ;;  %v1220_v28 = vpop.xlane.xlu0 %1219  ;;  %v4901_v31 = vpop.xlane.xlu2 %782  ;;  %v582_v37 = vsel %vm579_vm9, %v581_v56, %v577_v23  ;;  %vm590_vm11 = vweird.f32 %v4890_v47  ;;  %vm4922_vm14 = vmor %vm810_vm12, %vm811_vm10 }
 0x3f5   :  { %v807_v34 = vsub.f32 1.0, %v806_v61  ;;  %v1227_v54 = vsub.f32 %v4798_v8, %v1220_v28  ;;  %4050 = vrcp.f32 %v4901_v31  ;;  %3768 = vmatmul.msk.f32.vlgmr.msra.gmra.mxu0 %vm507_vm7, %v804_v58  ;;  %v583_v45 = vmul.f32 %v4778_v44, %v582_v37  ;;  %vm4931_vm15 = vmor %vm589_vm13, %vm590_vm11 }
 0x3f6   :  { %v4907_v40 = vpop.eup %4046  ;;  %v586_v36 = vsub.f32 1.0, %v585_v25  ;;  %v610_v20 = vand.u32 2147483648, %v4893_v55  ;;  %v608_v61 = vand.u32 2147483647, %v4893_v55  ;;  %vm604_vm5 = vweird.f32 %v4893_v55 }
 0x3f7   :  { %v808_v27 = vmul.f32 %v4043_v19, %v807_v34  ;;  %v1235_v43 = vmul.f32 1.442695, %v1227_v54  ;;  %v1019_v41 = vsel %vm520_vm8, %v4907_v40, 0.0  ;;  %3753 = vmatmul.msk.f32.gmra.mxu2 %vm507_vm7, %v583_v45  ;;  %vm825_vm11 = vweird.f32 %v4901_v31 }
 0x3f8   :  { %v587_v8 = vmul.f32 %v4890_v47, %v586_v36  ;;  %1020 = vadd.xlane.f32.xlu2 %v1019_v41  ;;  %v611_v54 = vor.u32 1.1754944e-38, %v610_v20  ;;  %v831_v36 = vand.u32 2147483648, %v4901_v31  ;;  %vm609_vm12 = vcmp.eq.f32.partialorder %v608_v61, 8.507059e+37 }
 0x3f9   :  { %4052 = vpow2.f32 %v1235_v43  ;;  %v809_v39 = vadd.f32 %v4043_v19, %v808_v27  ;;  %v829_v1 = vand.u32 2147483647, %v4901_v31 }
 0x3fa   :  { %v4049_v42 = vpop.eup %4048  ;;  %v588_v44 = vadd.f32 %v4890_v47, %v587_v8  ;;  %v832_v4 = vor.u32 1.1754944e-38, %v831_v36 }
 0x3fb   :  { %v4926_v0 = vpop.eup %4050  ;;  %v600_v49 = vmul.f32 %v4049_v42, %v4893_v55  ;;  %v813_v6 = vsel %vm4922_vm14, %v4043_v19, %v809_v39  ;;  %vm605_vm4 = vweird.f32 %v4049_v42  ;;  %vm830_vm14 = vcmp.eq.f32.partialorder %v829_v1, 8.507059e+37 }
 0x3fc   :  { %v821_v5 = vmul.f32 %v4926_v0, %v4901_v31  ;;  %v1223_v50 = vpop.xlane.xlu0 %1222  ;;  %v4939_v48 = vpop.xlane.xlu2 %785  ;;  %v592_v9 = vsel %vm4931_vm15, %v4890_v47, %v588_v44  ;;  %v818_v19 = vsel %vm815_vm1, %v817_v46, %v813_v6  ;;  %vm826_vm9 = vweird.f32 %v4926_v0  ;;  %vm606_vm10 = vmor %vm604_vm5, %vm605_vm4 }
 0x3fd   :  { %v601_v53 = vsub.f32 1.0, %v600_v49  ;;  %v1228_v11 = vsub.f32 %v4814_v24, %v1223_v50  ;;  %v4945_v51 = vpop.xlane.xlu1 %552  ;;  %4054 = vrcp.f32 %v4939_v48  ;;  %v597_v56 = vsel %vm594_vm0, %v596_v10, %v592_v9  ;;  %vm827_vm13 = vmor %vm825_vm11, %vm826_vm9 }
 0x3fe   :  { %v822_v21 = vsub.f32 1.0, %v821_v5  ;;  %4056 = vrcp.f32 %v4945_v51  ;;  %v598_v25 = vmul.f32 %v4789_v2, %v597_v56  ;;  %v819_v28 = vmul.f32 %v4787_v60, %v818_v19 }
 0x3ff   :  { %v4951_v58 = vpop.eup %4052  ;;  %v602_v47 = vmul.f32 %v4049_v42, %v601_v53  ;;  %v1237_v23 = vmul.f32 1.442695, %v1228_v11  ;;  %v625_v3 = vand.u32 2147483648, %v4945_v51  ;;  %vm840_vm0 = vweird.f32 %v4939_v48 }
 0x400   :  { %v823_v24 = vmul.f32 %v4926_v0, %v822_v21  ;;  %v1248_v34 = vsel %vm507_vm7, %v4951_v58, 0.0  ;;  %3754 = vmatmul.msk.f32.gmra.mxu2 %vm507_vm7, %v598_v25  ;;  %3769 = vmatmul.msk.f32.gmra.mxu0 %vm507_vm7, %v819_v28  ;;  %vm619_vm4 = vweird.f32 %v4945_v51  ;;  %v844_v20 = vand.u32 2147483647, %v4939_v48 }
 0x401   :  { %4058 = vpow2.f32 %v1237_v23  ;;  %v603_v63 = vadd.f32 %v4049_v42, %v602_v47  ;;  %1249 = vadd.xlane.f32.xlu0 %v1248_v34  ;;  %v626_v21 = vor.u32 1.1754944e-38, %v625_v3 }
 0x402   :  { %v824_v55 = vadd.f32 %v4926_v0, %v823_v24 }
 0x403   :  { %v4964_v2 = vpop.eup %4054  ;;  %v607_v60 = vsel %vm606_vm10, %v4049_v42, %v603_v63 }
 0x404   :  { %v4057_v37 = vpop.eup %4056  ;;  %v836_v27 = vmul.f32 %v4964_v2, %v4939_v48  ;;  %v4970_v43 = vpop.xlane.xlu0 %788  ;;  %v612_v45 = vsel %vm609_vm12, %v611_v54, %v607_v60  ;;  %v828_v52 = vsel %vm827_vm13, %v4926_v0, %v824_v55  ;;  %v846_v0 = vand.u32 2147483648, %v4939_v48 }
 0x405   :  { %v615_v41 = vmul.f32 %v4057_v37, %v4945_v51  ;;  %4060 = vrcp.f32 %v4970_v43  ;;  %v4976_v8 = vpop.xlane.xlu1 %1008  ;;  %v613_v44 = vmul.f32 %v4802_v13, %v612_v45  ;;  %v833_v46 = vsel %vm830_vm14, %v832_v4, %v828_v52 }
 0x406   :  { %v837_v31 = vsub.f32 1.0, %v836_v27  ;;  %4062 = vrcp.f32 %v4976_v8  ;;  %v834_v6 = vmul.f32 %v4804_v17, %v833_v46  ;;  %vm620_vm15 = vweird.f32 %v4057_v37 }
 0x407   :  { %v4980_v39 = vpop.eup %4058  ;;  %v616_v42 = vsub.f32 1.0, %v615_v41  ;;  %v623_v13 = vand.u32 2147483647, %v4945_v51  ;;  %vm841_vm1 = vweird.f32 %v4964_v2  ;;  %v847_v61 = vor.u32 1.1754944e-38, %v846_v0  ;;  %vm621_vm5 = vmor %vm619_vm4, %vm620_vm15 }
 0x408   :  { %v838_v62 = vmul.f32 %v4964_v2, %v837_v31  ;;  %v1251_v10 = vsel %vm520_vm8, %v4980_v39, 0.0  ;;  %3755 = vmatmul.msk.f32.gmra.mxu2 %vm507_vm7, %v613_v44  ;;  %3770 = vmatmul.msk.f32.gmra.mxu0 %vm507_vm7, %v834_v6  ;;  %vm855_vm9 = vweird.f32 %v4970_v43  ;;  %v861_v51 = vand.u32 2147483648, %v4970_v43  ;;  %vm842_vm11 = vmor %vm840_vm0, %vm841_vm1 }
 0x409   :  { %v617_v49 = vmul.f32 %v4057_v37, %v616_v42  ;;  %1252 = vadd.xlane.f32.xlu1 %v1251_v10  ;;  %vm624_vm10 = vcmp.eq.f32.partialorder %v623_v13, 8.507059e+37  ;;  %v1031_v24 = vand.u32 2147483647, %v4976_v8  ;;  %v1033_v63 = vand.u32 2147483648, %v4976_v8 }
 0x40a   :  { %v839_v53 = vadd.f32 %v4964_v2, %v838_v62  ;;  %vm845_vm12 = vcmp.eq.f32.partialorder %v844_v20, 8.507059e+37  ;;  %v862_v48 = vor.u32 1.1754944e-38, %v861_v51  ;;  %vm1027_vm14 = vweird.f32 %v4976_v8 }
 0x40b   :  { %v4991_v5 = vpop.eup %4060  ;;  %v4995_v50 = vpop.xlane.xlu2 %1011  ;;  %v618_v9 = vadd.f32 %v4057_v37, %v617_v49  ;;  %vm1032_vm1 = vcmp.eq.f32.partialorder %v1031_v24, 8.507059e+37 }
 0x40c   :  { %v4063_v17 = vpop.eup %4062  ;;  %v851_v11 = vmul.f32 %v4991_v5, %v4970_v43  ;;  %v5002_v19 = vpop.xlane.xlu0 %1240  ;;  %4064 = vrcp.f32 %v4995_v50  ;;  %v843_v28 = vsel %vm842_vm11, %v4964_v2, %v839_v53  ;;  %v859_v2 = vand.u32 2147483647, %v4970_v43 }
 0x40d   :  { %v1023_v47 = vmul.f32 %v4063_v17, %v4976_v8  ;;  %4066 = vrcp.f32 %v5002_v19  ;;  %v622_v25 = vsel %vm621_vm5, %v4057_v37, %v618_v9  ;;  %vm1028_vm13 = vweird.f32 %v4063_v17 }
 0x40e   :  { %v852_v23 = vsub.f32 1.0, %v851_v11  ;;  %v627_v54 = vsel %vm624_vm10, %v626_v21, %v622_v25  ;;  %v848_v60 = vsel %vm845_vm12, %v847_v61, %v843_v28  ;;  %vm856_vm15 = vweird.f32 %v4991_v5  ;;  %vm1029_vm0 = vmor %vm1027_vm14, %vm1028_vm13 }
 0x40f   :  { %v1024_v56 = vsub.f32 1.0, %v1023_v47  ;;  %v628_v55 = vmul.f32 %v4819_v33, %v627_v54  ;;  %v849_v37 = vmul.f32 %v4817_v29, %v848_v60  ;;  %v1034_v29 = vor.u32 1.1754944e-38, %v1033_v63  ;;  %vm857_vm4 = vmor %vm855_vm9, %vm856_vm15 }
 0x410   :  { %v853_v34 = vmul.f32 %v4991_v5, %v852_v23  ;;  %v1048_v44 = vand.u32 2147483648, %v4995_v50  ;;  %v1265_v10 = vand.u32 2147483648, %v5002_v19  ;;  %vm860_vm5 = vcmp.eq.f32.partialorder %v859_v2, 8.507059e+37 }
 0x411   :  { %v1025_v36 = vmul.f32 %v4063_v17, %v1024_v56  ;;  %3756 = vmatmul.msk.f32.gmra.mxu2 %vm507_vm7, %v628_v55  ;;  %3771 = vmatmul.msk.f32.gmra.mxu0 %vm507_vm7, %v849_v37  ;;  %v1263_v13 = vand.u32 2147483647, %v5002_v19  ;;  %vm1042_vm12 = vweird.f32 %v4995_v50  ;;  %vm1259_vm9 = vweird.f32 %v5002_v19 }
 0x412   :  { %v5020_v1 = vpop.eup %4064  ;;  %v854_v4 = vadd.f32 %v4991_v5, %v853_v34  ;;  %v1266_v21 = vor.u32 1.1754944e-38, %v1265_v10  ;;  %v1049_v61 = vor.u32 1.1754944e-38, %v1048_v44 }
 0x413   :  { %v4067_v27 = vpop.eup %4066  ;;  %v1026_v45 = vadd.f32 %v4063_v17, %v1025_v36  ;;  %v1038_v41 = vmul.f32 %v5020_v1, %v4995_v50  ;;  %v5028_v52 = vpop.xlane.xlu1 %1014  ;;  %vm1043_vm10 = vweird.f32 %v5020_v1  ;;  %vm1264_vm15 = vcmp.eq.f32.partialorder %v1263_v13, 8.507059e+37 }
 0x414   :  { %v5030_v33 = vpop.xlane.xlu2 %1243  ;;  %v1255_v8 = vmul.f32 %v4067_v27, %v5002_v19  ;;  %4068 = vrcp.f32 %v5028_v52  ;;  %v858_v3 = vsel %vm857_vm4, %v4991_v5, %v854_v4  ;;  %vm1260_vm11 = vweird.f32 %v4067_v27  ;;  %vm5053_vm13 = vmor %vm1042_vm12, %vm1043_vm10 }
 0x415   :  { %v1030_v31 = vsel %vm1029_vm0, %v4063_v17, %v1026_v45  ;;  %v1039_v42 = vsub.f32 1.0, %v1038_v41  ;;  %4070 = vrcp.f32 %v5030_v33  ;;  %v863_v9 = vsel %vm860_vm5, %v862_v48, %v858_v3  ;;  %vm1261_vm14 = vmor %vm1259_vm9, %vm1260_vm11 }
 0x416   :  { %v1035_v62 = vsel %vm1032_vm1, %v1034_v29, %v1030_v31  ;;  %v1256_v46 = vsub.f32 1.0, %v1255_v8  ;;  %v864_v53 = vmul.f32 %v4829_v32, %v863_v9  ;;  %v1046_v17 = vand.u32 2147483647, %v4995_v50 }
 0x417   :  { %v1040_v49 = vmul.f32 %v5020_v1, %v1039_v42  ;;  %v1036_v0 = vmul.f32 %v4831_v35, %v1035_v62  ;;  %v1063_v25 = vand.u32 2147483648, %v5028_v52  ;;  %v1280_v34 = vand.u32 2147483648, %v5030_v33 }
 0x418   :  { %v1257_v6 = vmul.f32 %v4067_v27, %v1256_v46  ;;  %vm1047_vm0 = vcmp.eq.f32.partialorder %v1046_v17, 8.507059e+37  ;;  %v1061_v55 = vand.u32 2147483647, %v5028_v52  ;;  %v1278_v48 = vand.u32 2147483647, %v5030_v33 }
 0x419   :  { %v1041_v43 = vadd.f32 %v5020_v1, %v1040_v49  ;;  %3784 = vmatmul.msk.f32.vlgmr.msra.gmra.mxu2 %vm507_vm7, %v1036_v0  ;;  %3772 = vmatmul.msk.f32.gmra.mxu0 %vm507_vm7, %v864_v53  ;;  %vm1057_vm5 = vweird.f32 %v5028_v52  ;;  %vm1274_vm10 = vweird.f32 %v5030_v33 }
 0x41a   :  { %v4069_v11 = vpop.eup %4068  ;;  %v1258_v20 = vadd.f32 %v4067_v27, %v1257_v6  ;;  %vm1062_vm12 = vcmp.eq.f32.partialorder %v1061_v55, 8.507059e+37 }
 0x41b   :  { %v4071_v5 = vpop.eup %4070  ;;  %v1053_v47 = vmul.f32 %v4069_v11, %v5028_v52  ;;  %v5059_v32 = vpop.xlane.xlu0 %1017  ;;  %v1045_v50 = vsel %vm5053_vm13, %v5020_v1, %v1041_v43  ;;  %vm1058_vm1 = vweird.f32 %v4069_v11  ;;  %vm1279_vm13 = vcmp.eq.f32.partialorder %v1278_v48, 8.507059e+37  ;;  %v1389_v48 = vld [vmem:[%s6387_s14 + $0x18] sm:$0xff] }
 0x41c   :  { %v5061_v23 = vpop.xlane.xlu1 %1246  ;;  %v1262_v19 = vsel %vm1261_vm14, %v4067_v27, %v1258_v20  ;;  %v1270_v51 = vmul.f32 %v4071_v5, %v5030_v33  ;;  %4072 = vrcp.f32 %v5059_v32  ;;  %v1050_v63 = vsel %vm1047_vm0, %v1049_v61, %v1045_v50  ;;  %vm1059_vm11 = vmor %vm1057_vm5, %vm1058_vm1  ;;  %1417 = vmatpush.msrb.mxu1 %v1389_v48  ;;  %3957 = vmatpush.msrb.mxu2 %v1389_v48 }
 0x41d   :  { %v1267_v56 = vsel %vm1264_vm15, %v1266_v21, %v1262_v19  ;;  %v1054_v24 = vsub.f32 1.0, %v1053_v47  ;;  %4074 = vrcp.f32 %v5061_v23  ;;  %v1051_v36 = vmul.f32 %v4841_v59, %v1050_v63 }
 0x41e   :  { %v1271_v28 = vsub.f32 1.0, %v1270_v51  ;;  %v1268_v1 = vmul.f32 %v4839_v57, %v1267_v56  ;;  %vm1275_vm4 = vweird.f32 %v4071_v5  ;;  %v1064_v27 = vor.u32 1.1754944e-38, %v1063_v25 }
 0x41f   :  { %v1055_v54 = vmul.f32 %v4069_v11, %v1054_v24  ;;  %v1281_v59 = vor.u32 1.1754944e-38, %v1280_v34  ;;  %vm1276_vm9 = vmor %vm1274_vm10, %vm1275_vm4  ;;  %v1078_v42 = vand.u32 2147483648, %v5059_v32  ;;  %v1295_v62 = vand.u32 2147483648, %v5061_v23 }
 0x420   :  { %v1272_v60 = vmul.f32 %v4071_v5, %v1271_v28  ;;  %v1076_v49 = vand.u32 2147483647, %v5059_v32  ;;  %v1293_v6 = vand.u32 2147483647, %v5061_v23  ;;  %vm1072_vm0 = vweird.f32 %v5059_v32 }
 0x421   :  { %v1056_v37 = vadd.f32 %v4069_v11, %v1055_v54  ;;  %3785 = vmatmul.msk.f32.gmra.mxu2 %vm507_vm7, %v1051_v36  ;;  %3800 = vmatmul.msk.f32.vlgmr.msrb.gmra.mxu0 %vm507_vm7, %v1268_v1  ;;  %v1079_v9 = vor.u32 1.1754944e-38, %v1078_v42  ;;  %vm1289_vm1 = vweird.f32 %v5061_v23  ;;  %v1296_v43 = vor.u32 1.1754944e-38, %v1295_v62 }
 0x422   :  { %v4073_v2 = vpop.eup %4072  ;;  %v1273_v45 = vadd.f32 %v4071_v5, %v1272_v60  ;;  %vm1077_vm5 = vcmp.eq.f32.partialorder %v1076_v49, 8.507059e+37 }
 0x423   :  { %v4075_v41 = vpop.eup %4074  ;;  %v1068_v4 = vmul.f32 %v4073_v2, %v5059_v32  ;;  %v1060_v29 = vsel %vm1059_vm11, %v4069_v11, %v1056_v37  ;;  %vm1073_vm14 = vweird.f32 %v4073_v2  ;;  %vm1294_vm11 = vcmp.eq.f32.partialorder %v1293_v6, 8.507059e+37 }
 0x424   :  { %v1285_v57 = vmul.f32 %v4075_v41, %v5061_v23  ;;  %v1065_v52 = vsel %vm1062_vm12, %v1064_v27, %v1060_v29  ;;  %v1277_v8 = vsel %vm1276_vm9, %v4071_v5, %v1273_v45  ;;  %vm1290_vm15 = vweird.f32 %v4075_v41  ;;  %vm1074_vm4 = vmor %vm1072_vm0, %vm1073_vm14 }
 0x425   :  { %v1069_v33 = vsub.f32 1.0, %v1068_v4  ;;  %v1282_v31 = vsel %vm1279_vm13, %v1281_v59, %v1277_v8  ;;  %v1066_v10 = vmul.f32 %v4851_v7, %v1065_v52  ;;  %vm1291_vm10 = vmor %vm1289_vm1, %vm1290_vm15  ;;  %v1387_v59 = vld [vmem:[%s6387_s14 + $0x8] sm:$0xff]  ;;  %v1386_v8 = vld [vmem:[%s6387_s14] sm:$0xff] }
 0x426   :  { %v1286_v44 = vsub.f32 1.0, %v1285_v57  ;;  %v1283_v0 = vmul.f32 %v4848_v12, %v1282_v31 }
 0x427   :  { %v1070_v46 = vmul.f32 %v4073_v2, %v1069_v33 }
 0x428   :  { %v1287_v3 = vmul.f32 %v4075_v41, %v1286_v44 }
 0x429   :  { %v1071_v13 = vadd.f32 %v4073_v2, %v1070_v46  ;;  %3786 = vmatmul.msk.f32.gmra.mxu2 %vm507_vm7, %v1066_v10  ;;  %3801 = vmatmul.msk.f32.gmra.mxu0 %vm507_vm7, %v1283_v0 }
 0x42a   :  { %v1288_v53 = vadd.f32 %v4075_v41, %v1287_v3 }
 0x42b   :  { %v1075_v7 = vsel %vm1074_vm4, %v4073_v2, %v1071_v13 }
 0x42c   :  { %v1080_v12 = vsel %vm1077_vm5, %v1079_v9, %v1075_v7  ;;  %v1292_v17 = vsel %vm1291_vm10, %v4075_v41, %v1288_v53 }
 0x42d   :  { %v1297_v11 = vsel %vm1294_vm11, %v1296_v43, %v1292_v17  ;;  %v1081_v20 = vmul.f32 %v4859_v15, %v1080_v12  ;;  %v4234_v43 = vld [vmem:[%s6429_s9] ss:$0 sm:$0xff]  ;;  %v4235_v12 = vld [vmem:[%s6429_s9 + $0x1] ss:$0 sm:$0xff] }
 0x42e   :  { %v1298_v35 = vmul.f32 %v4857_v16, %v1297_v11 }
 0x431   :  { %3787 = vmatmul.msk.f32.gmra.mxu2 %vm507_vm7, %v1081_v20  ;;  %3802 = vmatmul.msk.f32.gmra.mxu0 %vm507_vm7, %v1298_v35 }
 0x46b   :  { %v1021_v5 = vpop.xlane.xlu2 %1020 }
 0x46c   :  { %4076 = vrcp.f32 %v1021_v5  ;;  %v1093_v23 = vand.u32 2147483648, %v1021_v5  ;;  %v1091_v15 = vand.u32 2147483647, %v1021_v5  ;;  %vm1087_vm9 = vweird.f32 %v1021_v5 }
 0x46e   :  { %v1094_v56 = vor.u32 1.1754944e-38, %v1093_v23  ;;  %vm1092_vm14 = vcmp.eq.f32.partialorder %v1091_v15, 8.507059e+37 }
 0x472   :  { %v4077_v21 = vpop.eup %4076  ;;  %v5097_v47 = vpop.f32.mrf.mxu2 }
 0x473   :  { %v1083_v61 = vmul.f32 %v4077_v21, %v1021_v5  ;;  %v5099_v51 = vpop.f32.mrf.mxu0  ;;  %vm1088_vm12 = vweird.f32 %v4077_v21  ;;  %v680_v7 = vmul.f32 %v4234_v43, %v5097_v47 }
 0x474   :  { %v1250_v50 = vpop.xlane.xlu0 %1249  ;;  %vm1089_vm13 = vmor %vm1087_vm9, %vm1088_vm12  ;;  %v912_v17 = vmul.f32 %v4235_v12, %v5099_v51 }
 0x475   :  { %v1084_v32 = vsub.f32 1.0, %v1083_v61  ;;  %4078 = vrcp.f32 %v1250_v50  ;;  %v1310_v1 = vand.u32 2147483648, %v1250_v50  ;;  %v1308_v2 = vand.u32 2147483647, %v1250_v50  ;;  %v4237_v61 = vld [vmem:[%s6429_s9 + $0x3] ss:$0 sm:$0xff] }
 0x476   :  { %vm1304_vm0 = vweird.f32 %v1250_v50  ;;  %v917_v20 = vadd.f32 %v912_v17, %v680_v7 }
 0x477   :  { %v1085_v19 = vmul.f32 %v4077_v21, %v1084_v32  ;;  %v1311_v4 = vor.u32 1.1754944e-38, %v1310_v1  ;;  %vm1309_vm4 = vcmp.eq.f32.partialorder %v1308_v2, 8.507059e+37 }
 0x479   :  { %v1086_v16 = vadd.f32 %v4077_v21, %v1085_v19 }
 0x47a   :  { %v5101_v25 = vpop.f32.mrf.mxu2 }
 0x47b   :  { %v1090_v24 = vsel %vm1089_vm13, %v4077_v21, %v1086_v16  ;;  %v4079_v63 = vpop.eup %4078 }
 0x47c   :  { %v1253_v28 = vpop.xlane.xlu1 %1252  ;;  %v1095_v34 = vsel %vm1092_vm14, %v1094_v56, %v1090_v24  ;;  %v1300_v54 = vmul.f32 %v4079_v63, %v1250_v50  ;;  %vm1305_vm15 = vweird.f32 %v4079_v63  ;;  %v681_v50 = vmul.f32 %v4234_v43, %v5101_v25 }
 0x47d   :  { %4080 = vrcp.f32 %v1253_v28  ;;  %v1096_v36 = vmul.f32 %v4907_v40, %v1095_v34  ;;  %v900_v55 = vpop.f32.mrf.mxu0  ;;  %v1388_v40 = vld [vmem:[%s6387_s14 + $0x10] sm:$0xff]  ;;  %vm1306_vm1 = vmor %vm1304_vm0, %vm1305_vm15  ;;  %v1325_v33 = vand.u32 2147483648, %v1253_v28  ;;  %v1323_v46 = vand.u32 2147483647, %v1253_v28 }
 0x47e   :  { %v1301_v60 = vsub.f32 1.0, %v1300_v54  ;;  %1418 = vmatpush.msrb.mxu1 %v1388_v40  ;;  %3958 = vmatpush.msrb.mxu2 %v1388_v40  ;;  %vm1319_vm10 = vweird.f32 %v1253_v28  ;;  %v913_v32 = vmul.f32 %v4235_v12, %v900_v55 }
 0x47f   :  { %3788 = vmatmul.msk.f32.gmra.mxu2 %vm507_vm7, %v1096_v36  ;;  %v1326_v49 = vor.u32 1.1754944e-38, %v1325_v33  ;;  %vm1324_vm12 = vcmp.eq.f32.partialorder %v1323_v46, 8.507059e+37 }
 0x480   :  { %v1302_v37 = vmul.f32 %v4079_v63, %v1301_v60  ;;  %1419 = vmatpush.msrb.mxu1 %v1387_v59  ;;  %3959 = vmatpush.msrb.mxu2 %v1387_v59  ;;  %v918_v51 = vadd.f32 %v913_v32, %v681_v50 }
 0x482   :  { %v1303_v41 = vadd.f32 %v4079_v63, %v1302_v37  ;;  %1420 = vmatpush.msrb.mxu1 %v1386_v8  ;;  %3960 = vmatpush.msrb.mxu2 %v1386_v8 }
 0x483   :  { %v4081_v27 = vpop.eup %4080  ;;  %v671_v29 = vpop.f32.mrf.mxu2 }
 0x484   :  { %v1315_v45 = vmul.f32 %v4081_v27, %v1253_v28  ;;  %v1307_v52 = vsel %vm1306_vm1, %v4079_v63, %v1303_v41  ;;  %vm1320_vm5 = vweird.f32 %v4081_v27  ;;  %v682_v63 = vmul.f32 %v4234_v43, %v671_v29 }
 0x485   :  { %v1312_v31 = vsel %vm1309_vm4, %v1311_v4, %v1307_v52  ;;  %v903_v44 = vpop.f32.mrf.mxu0  ;;  %vm1321_vm11 = vmor %vm1319_vm10, %vm1320_vm5 }
 0x486   :  { %v1316_v57 = vsub.f32 1.0, %v1315_v45  ;;  %v1313_v62 = vmul.f32 %v4951_v58, %v1312_v31  ;;  %v914_v28 = vmul.f32 %v4235_v12, %v903_v44 }
 0x488   :  { %v1317_v42 = vmul.f32 %v4081_v27, %v1316_v57  ;;  %3803 = vmatmul.msk.f32.gmra.mxu0 %vm507_vm7, %v1313_v62  ;;  %v919_v36 = vadd.f32 %v914_v28, %v682_v63 }
 0x48a   :  { %v1318_v10 = vadd.f32 %v4081_v27, %v1317_v42 }
 0x48b   :  { %v674_v0 = vpop.f32.mrf.mxu2 }
 0x48c   :  { %v1322_v3 = vsel %vm1321_vm11, %v4081_v27, %v1318_v10  ;;  %v683_v27 = vmul.f32 %v4234_v43, %v674_v0  ;;  %v3972_v10 = vld [vmem:[%s6388_s15] ss:$0 sm:$0xff] }
 0x48d   :  { %v1327_v6 = vsel %vm1324_vm12, %v1326_v49, %v1322_v3 }
 0x48e   :  { %v1328_v13 = vmul.f32 %v4980_v39, %v1327_v6  ;;  %v906_v9 = vpop.f32.mrf.mxu0  ;;  %v4236_v39 = vld [vmem:[%s6429_s9 + $0x2] ss:$0 sm:$0xff] }
 0x48f   :  { %v915_v2 = vmul.f32 %v4235_v12, %v906_v9 }
 0x490   :  { %3804 = vmatmul.msk.f32.gmra.mxu0 %vm507_vm7, %v1328_v13 }
 0x491   :  { %v920_v41 = vadd.f32 %v915_v2, %v683_v27  ;;  %v1581_v2 = vld [vmem:[%s6391_s18 + $0x10] sm:$0xff] }
 0x494   :  { %v677_v58 = vpop.f32.mrf.mxu2 }
 0x495   :  { %v684_v8 = vmul.f32 %v4234_v43, %v677_v58 }
 0x496   :  { %v909_v53 = vpop.f32.mrf.mxu0 }
 0x497   :  { %v916_v57 = vmul.f32 %v4235_v12, %v909_v53 }
 0x499   :  { %v921_v31 = vadd.f32 %v916_v57, %v684_v8 }
 0x49c   :  { %v1129_v11 = vpop.f32.mrf.mxu2 }
 0x49d   :  { %v1144_v35 = vmul.f32 %v4236_v39, %v1129_v11 }
 0x49e   :  { %v1361_v21 = vpop.f32.mrf.mxu0 }
 0x49f   :  { %v1149_v5 = vadd.f32 %v1144_v35, %v917_v20  ;;  %v1376_v47 = vmul.f32 %v4237_v61, %v1361_v21 }
 0x4a1   :  { %v1381_v23 = vadd.f32 %v1376_v47, %v1149_v5 }
 0x4a3   :  { %3805 = vmatmul.msk.f32.vlgmr.msrb.gmra.mxu1 %vm167_vm2, %v1381_v23 }
 0x4a4   :  { %v1132_v19 = vpop.f32.mrf.mxu2 }
 0x4a5   :  { %v1145_v15 = vmul.f32 %v4236_v39, %v1132_v19 }
 0x4a6   :  { %v1364_v56 = vpop.f32.mrf.mxu0 }
 0x4a7   :  { %v1150_v16 = vadd.f32 %v1145_v15, %v918_v51  ;;  %v1377_v24 = vmul.f32 %v4237_v61, %v1364_v56 }
 0x4a9   :  { %v1382_v34 = vadd.f32 %v1377_v24, %v1150_v16 }
 0x4ab   :  { %3806 = vmatmul.msk.f32.gmra.mxu1 %vm167_vm2, %v1382_v34 }
 0x4ac   :  { %v1135_v54 = vpop.f32.mrf.mxu2 }
 0x4ad   :  { %v1146_v60 = vmul.f32 %v4236_v39, %v1135_v54 }
 0x4ae   :  { %v1367_v1 = vpop.f32.mrf.mxu0 }
 0x4af   :  { %v1151_v55 = vadd.f32 %v1146_v60, %v919_v36  ;;  %v1378_v48 = vmul.f32 %v4237_v61, %v1367_v1 }
 0x4b1   :  { %v1383_v25 = vadd.f32 %v1378_v48, %v1151_v55 }
 0x4b3   :  { %3807 = vmatmul.msk.f32.gmra.mxu1 %vm167_vm2, %v1383_v25  ;;  %v1582_v25 = vld [vmem:[%s6391_s18 + $0x18] sm:$0xff] }
 0x4b4   :  { %v1138_v37 = vpop.f32.mrf.mxu2  ;;  %1614 = vmatpush.msra.mxu2 %v1582_v25 }
 0x4b5   :  { %v1147_v45 = vmul.f32 %v4236_v39, %v1138_v37 }
 0x4b6   :  { %1615 = vmatpush.msra.mxu2 %v1581_v2 }
 0x4b7   :  { %v1152_v59 = vadd.f32 %v1147_v45, %v920_v41  ;;  %v1580_v41 = vld [vmem:[%s6391_s18 + $0x8] sm:$0xff] }
 0x4b8   :  { %1616 = vmatpush.msra.mxu2 %v1580_v41 }
 0x502   :  { %v1141_v29 = vpop.f32.mrf.mxu2 }
 0x503   :  { %v1148_v33 = vmul.f32 %v4236_v39, %v1141_v29 }
 0x505   :  { %v1370_v40 = vpop.f32.mrf.mxu0  ;;  %v1153_v44 = vadd.f32 %v1148_v33, %v921_v31 }
 0x506   :  { %v1379_v4 = vmul.f32 %v4237_v61, %v1370_v40 }
 0x508   :  { %v1384_v52 = vadd.f32 %v1379_v4, %v1152_v59  ;;  %v1579_v59 = vld [vmem:[%s6391_s18] sm:$0xff] }
 0x509   :  { %1617 = vmatpush.msra.mxu2 %v1579_v59 }
 0x50a   :  { %3808 = vmatmul.msk.f32.gmra.mxu1 %vm167_vm2, %v1384_v52 }
 0x50d   :  { %v1373_v42 = vpop.f32.mrf.mxu0 }
 0x50e   :  { %v1380_v62 = vmul.f32 %v4237_v61, %v1373_v42 }
 0x510   :  { %v1385_v46 = vadd.f32 %v1380_v62, %v1153_v44 }
 0x512   :  { %3809 = vmatmul.msk.f32.vlgmr.msrb.gmra.mxu2 %vm167_vm2, %v1385_v46 }
 0x520   :  { %v1422_v49 = vpop.f32.mrf.mxu1 }
 0x521   :  { %v1437_v3 = vadd.f32 %v1422_v49, %v4458_v14 }
 0x523   :  { %v5145_v0 = vadd.f32 %v3972_v10, %v1437_v3 }
 0x525   :  { %v1453_v6 = vsel %vm167_vm2, %v5145_v0, 0.0 }
 0x526   :  { %1454 = vadd.xlane.f32.xlu2 %v1453_v6 }
 0x528   :  { %v1425_v13 = vpop.f32.mrf.mxu1 }
 0x529   :  { %v1438_v9 = vadd.f32 %v1425_v13, %v4465_v18  ;;  %v5218_v13 = vld [vmem:[%s6389_s16] ss:$0 sm:$0xff] }
 0x52b   :  { %v5150_v58 = vadd.f32 %v3972_v10, %v1438_v9 }
 0x52d   :  { %v1456_v53 = vsel %vm167_vm2, %v5150_v58, 0.0 }
 0x52e   :  { %1457 = vadd.xlane.f32.xlu0 %v1456_v53 }
 0x530   :  { %v1428_v43 = vpop.f32.mrf.mxu1 }
 0x531   :  { %v1439_v7 = vadd.f32 %v1428_v43, %v4472_v22 }
 0x533   :  { %v5155_v12 = vadd.f32 %v3972_v10, %v1439_v7  ;;  %v5223_v7 = vld [vmem:[%s6390_s17] ss:$0 sm:$0xff] }
 0x535   :  { %v1459_v14 = vsel %vm167_vm2, %v5155_v12, 0.0 }
 0x536   :  { %1460 = vadd.xlane.f32.xlu1 %v1459_v14 }
 0x587   :  { %v1431_v17 = vpop.f32.mrf.mxu1 }
 0x588   :  { %v1440_v11 = vadd.f32 %v1431_v17, %v4479_v26 }
 0x58a   :  { %v5160_v20 = vadd.f32 %v3972_v10, %v1440_v11 }
 0x58c   :  { %v1462_v18 = vsel %vm167_vm2, %v5160_v20, 0.0 }
 0x58d   :  { %1463 = vadd.xlane.f32.xlu2 %v1462_v18 }
 0x595   :  { %v1434_v39 = vpop.f32.mrf.mxu2 }
 0x596   :  { %v1441_v35 = vadd.f32 %v1434_v39, %v4486_v30 }
 0x598   :  { %v5165_v5 = vadd.f32 %v3972_v10, %v1441_v35 }
 0x599   :  { %v1455_v22 = vpop.xlane.xlu2 %1454 }
 0x59a   :  { %v1465_v21 = vsel %vm180_vm3, %v5165_v5, 0.0  ;;  %v1468_v61 = vmul.f32 %v1455_v22, %v4490_v38 }
 0x59b   :  { %1466 = vadd.xlane.f32.xlu0 %v1465_v21 }
 0x59c   :  { %v1473_v26 = vsub.f32 %v5145_v0, %v1468_v61 }
 0x59e   :  { %v1478_v47 = vmul.f32 %v1473_v26, %v1473_v26 }
 0x5a0   :  { %v1483_v32 = vsel %vm167_vm2, %v1478_v47, 0.0 }
 0x5a1   :  { %v1458_v23 = vpop.xlane.xlu0 %1457  ;;  %1484 = vadd.xlane.f32.xlu1 %v1483_v32 }
 0x5a2   :  { %v1469_v50 = vmul.f32 %v1458_v23, %v4490_v38 }
 0x5a4   :  { %v5174_v30 = vsub.f32 %v5150_v58, %v1469_v50 }
 0x5a6   :  { %v1479_v19 = vmul.f32 %v5174_v30, %v5174_v30 }
 0x5a8   :  { %v1486_v51 = vsel %vm167_vm2, %v1479_v19, 0.0 }
 0x5a9   :  { %v1461_v15 = vpop.xlane.xlu1 %1460  ;;  %1487 = vadd.xlane.f32.xlu2 %v1486_v51 }
 0x5aa   :  { %v1470_v16 = vmul.f32 %v1461_v15, %v4490_v38 }
 0x5ac   :  { %v5181_v56 = vsub.f32 %v5155_v12, %v1470_v16 }
 0x5ae   :  { %v1480_v24 = vmul.f32 %v5181_v56, %v5181_v56 }
 0x5b0   :  { %v1489_v28 = vsel %vm167_vm2, %v1480_v24, 0.0 }
 0x5b1   :  { %1490 = vadd.xlane.f32.xlu0 %v1489_v28 }
 0x600   :  { %v1464_v34 = vpop.xlane.xlu2 %1463 }
 0x601   :  { %v1471_v63 = vmul.f32 %v1464_v34, %v4490_v38 }
 0x603   :  { %v5188_v54 = vsub.f32 %v5160_v20, %v1471_v63 }
 0x605   :  { %v1481_v36 = vmul.f32 %v5188_v54, %v5188_v54 }
 0x607   :  { %v1492_v60 = vsel %vm167_vm2, %v1481_v36, 0.0 }
 0x608   :  { %1493 = vadd.xlane.f32.xlu1 %v1492_v60 }
 0x60e   :  { %v1467_v55 = vpop.xlane.xlu0 %1466 }
 0x60f   :  { %v1472_v1 = vmul.f32 %v1467_v55, %v4490_v38 }
 0x611   :  { %v5195_v48 = vsub.f32 %v5165_v5, %v1472_v1 }
 0x613   :  { %v1482_v37 = vmul.f32 %v5195_v48, %v5195_v48 }
 0x614   :  { %v1485_v27 = vpop.xlane.xlu1 %1484 }
 0x615   :  { %v1495_v45 = vsel %vm180_vm3, %v1482_v37, 0.0  ;;  %v1498_v40 = vmul.f32 %v1485_v27, %v4490_v38 }
 0x616   :  { %1496 = vadd.xlane.f32.xlu2 %v1495_v45 }
 0x617   :  { %v1503_v4 = vadd.f32 1e-06, %v1498_v40 }
 0x619   :  { %4082 = vrsqrt.f32 %v1503_v4  ;;  %vm1514_vm13 = vweird.f32 %v1503_v4 }
 0x61c   :  { %v1488_v29 = vpop.xlane.xlu2 %1487 }
 0x61d   :  { %v1499_v57 = vmul.f32 %v1488_v29, %v4490_v38 }
 0x61f   :  { %v4083_v52 = vpop.eup %4082  ;;  %v1504_v8 = vadd.f32 1e-06, %v1499_v57 }
 0x620   :  { %v1509_v33 = vmul.f32 %v4083_v52, %v1503_v4  ;;  %vm1515_vm9 = vweird.f32 %v4083_v52 }
 0x621   :  { %4084 = vrsqrt.f32 %v1504_v8  ;;  %vm1516_vm14 = vmor %vm1514_vm13, %vm1515_vm9  ;;  %vm1524_vm0 = vweird.f32 %v1504_v8 }
 0x622   :  { %v1510_v31 = vmul.f32 %v4083_v52, %v1509_v33 }
 0x624   :  { %v1511_v42 = vmul.f32 0.5, %v1510_v31  ;;  %v1491_v44 = vpop.xlane.xlu0 %1490 }
 0x625   :  { %v1500_v62 = vmul.f32 %v1491_v44, %v4490_v38  ;;  %v5249_v44 = vld [vmem:[%s6392_s19] ss:$0 sm:$0xff] }
 0x626   :  { %v1512_v46 = vsub.f32 1.5, %v1511_v42 }
 0x627   :  { %v4085_v10 = vpop.eup %4084  ;;  %v1505_v49 = vadd.f32 1e-06, %v1500_v62 }
 0x628   :  { %v1513_v3 = vmul.f32 %v4083_v52, %v1512_v46  ;;  %v1519_v6 = vmul.f32 %v4085_v10, %v1504_v8  ;;  %vm1525_vm15 = vweird.f32 %v4085_v10  ;;  %v1849_v46 = vld [vmem:[%s6393_s20 + $0x78] sm:$0xff] }
 0x629   :  { %4086 = vrsqrt.f32 %v1505_v49  ;;  %vm1526_vm1 = vmor %vm1524_vm0, %vm1525_vm15  ;;  %vm1534_vm5 = vweird.f32 %v1505_v49  ;;  %1854 = vmatpush.msrb.mxu3 %v1849_v46 }
 0x62a   :  { %v1517_v9 = vsel %vm1516_vm14, %v4083_v52, %v1513_v3  ;;  %v1520_v53 = vmul.f32 %v4085_v10, %v1519_v6  ;;  %v1847_v3 = vld [vmem:[%s6393_s20 + $0x68] sm:$0xff] }
 0x62b   :  { %v1558_v43 = vmul.f32 %v1517_v9, %v1473_v26 }
 0x62c   :  { %v1521_v14 = vmul.f32 0.5, %v1520_v53 }
 0x62d   :  { %v1566_v17 = vmul.f32 %v5218_v13, %v1558_v43  ;;  %v1845_v43 = vld [vmem:[%s6393_s20 + $0x58] sm:$0xff] }
 0x62e   :  { %v1522_v11 = vsub.f32 1.5, %v1521_v14 }
 0x62f   :  { %v4087_v18 = vpop.eup %4086  ;;  %v1574_v39 = vadd.f32 %v5223_v7, %v1566_v17  ;;  %v1844_v17 = vld [vmem:[%s6393_s20 + $0x50] sm:$0xff] }
 0x630   :  { %v1523_v35 = vmul.f32 %v4085_v10, %v1522_v11  ;;  %v1529_v22 = vmul.f32 %v4087_v18, %v1505_v49  ;;  %vm1535_vm4 = vweird.f32 %v4087_v18 }
 0x631   :  { %3810 = vmatmul.msk.f32.vlgmr.msra.gmra.mxu2 %vm167_vm2, %v1574_v39  ;;  %vm1536_vm10 = vmor %vm1534_vm5, %vm1535_vm4 }
 0x632   :  { %v1527_v21 = vsel %vm1526_vm1, %v4085_v10, %v1523_v35  ;;  %v1530_v61 = vmul.f32 %v4087_v18, %v1529_v22  ;;  %v1842_v35 = vld [vmem:[%s6393_s20 + $0x40] sm:$0xff] }
 0x633   :  { %v1559_v26 = vmul.f32 %v1527_v21, %v5174_v30 }
 0x634   :  { %v1531_v47 = vmul.f32 0.5, %v1530_v61  ;;  %v1841_v61 = vld [vmem:[%s6393_s20 + $0x38] sm:$0xff] }
 0x635   :  { %v1567_v32 = vmul.f32 %v5218_v13, %v1559_v26 }
 0x636   :  { %v1532_v23 = vsub.f32 1.5, %v1531_v47 }
 0x637   :  { %v1575_v50 = vadd.f32 %v5223_v7, %v1567_v32 }
 0x638   :  { %v1533_v19 = vmul.f32 %v4087_v18, %v1532_v23 }
 0x639   :  { %3811 = vmatmul.msk.f32.gmra.mxu2 %vm167_vm2, %v1575_v50  ;;  %v1840_v50 = vld [vmem:[%s6393_s20 + $0x30] sm:$0xff] }
 0x63a   :  { %v1537_v51 = vsel %vm1536_vm10, %v4087_v18, %v1533_v19  ;;  %v1843_v18 = vld [vmem:[%s6393_s20 + $0x48] sm:$0xff] }
 0x63b   :  { %v1560_v15 = vmul.f32 %v1537_v51, %v5181_v56 }
 0x63d   :  { %v1568_v16 = vmul.f32 %v5218_v13, %v1560_v15  ;;  %v1839_v15 = vld [vmem:[%s6393_s20 + $0x28] sm:$0xff] }
 0x63f   :  { %v1576_v24 = vadd.f32 %v5223_v7, %v1568_v16 }
 0x641   :  { %3812 = vmatmul.msk.f32.gmra.mxu2 %vm167_vm2, %v1576_v24 }
 0x67b   :  { %v1494_v30 = vpop.xlane.xlu1 %1493 }
 0x67c   :  { %v1501_v28 = vmul.f32 %v1494_v30, %v4490_v38 }
 0x67e   :  { %v1506_v34 = vadd.f32 1e-06, %v1501_v28 }
 0x680   :  { %4088 = vrsqrt.f32 %v1506_v34  ;;  %vm1544_vm12 = vweird.f32 %v1506_v34 }
 0x686   :  { %v4089_v63 = vpop.eup %4088 }
 0x687   :  { %v1539_v36 = vmul.f32 %v4089_v63, %v1506_v34  ;;  %vm1545_vm11 = vweird.f32 %v4089_v63  ;;  %v1838_v34 = vld [vmem:[%s6393_s20 + $0x20] sm:$0xff] }
 0x688   :  { %vm1546_vm9 = vmor %vm1544_vm12, %vm1545_vm11 }
 0x689   :  { %v1540_v60 = vmul.f32 %v4089_v63, %v1539_v36  ;;  %v1497_v55 = vpop.xlane.xlu2 %1496  ;;  %v1837_v36 = vld [vmem:[%s6393_s20 + $0x18] sm:$0xff] }
 0x68a   :  { %v1502_v1 = vmul.f32 %v1497_v55, %v4490_v38  ;;  %v1836_v55 = vld [vmem:[%s6393_s20 + $0x10] sm:$0xff] }
 0x68b   :  { %v1541_v25 = vmul.f32 0.5, %v1540_v60 }
 0x68c   :  { %v1507_v37 = vadd.f32 1e-06, %v1502_v1 }
 0x68d   :  { %v1542_v56 = vsub.f32 1.5, %v1541_v25 }
 0x68e   :  { %4090 = vrsqrt.f32 %v1507_v37  ;;  %vm1554_vm14 = vweird.f32 %v1507_v37 }
 0x68f   :  { %v1543_v2 = vmul.f32 %v4089_v63, %v1542_v56 }
 0x691   :  { %v1547_v27 = vsel %vm1546_vm9, %v4089_v63, %v1543_v2  ;;  %v1835_v2 = vld [vmem:[%s6393_s20 + $0x8] sm:$0xff] }
 0x692   :  { %v1561_v45 = vmul.f32 %v1547_v27, %v5188_v54 }
 0x694   :  { %v4091_v41 = vpop.eup %4090  ;;  %v1569_v40 = vmul.f32 %v5218_v13, %v1561_v45 }
 0x695   :  { %v1549_v59 = vmul.f32 %v4091_v41, %v1507_v37  ;;  %vm1555_vm13 = vweird.f32 %v4091_v41 }
 0x696   :  { %v1577_v4 = vadd.f32 %v5223_v7, %v1569_v40  ;;  %vm1556_vm15 = vmor %vm1554_vm14, %vm1555_vm13 }
 0x697   :  { %v1550_v29 = vmul.f32 %v4091_v41, %v1549_v59  ;;  %v1834_v59 = vld [vmem:[%s6393_s20] sm:$0xff] }
 0x698   :  { %3813 = vmatmul.msk.f32.gmra.mxu2 %vm167_vm2, %v1577_v4 }
 0x699   :  { %v1551_v57 = vmul.f32 0.5, %v1550_v29 }
 0x69b   :  { %v1552_v52 = vsub.f32 1.5, %v1551_v57 }
 0x69d   :  { %v1553_v8 = vmul.f32 %v4091_v41, %v1552_v52 }
 0x69f   :  { %v1557_v33 = vsel %vm1556_vm15, %v4091_v41, %v1553_v8 }
 0x6a0   :  { %v1562_v31 = vmul.f32 %v1557_v33, %v5195_v48  ;;  %v1848_v48 = vld [vmem:[%s6393_s20 + $0x70] sm:$0xff] }
 0x6a1   :  { %1855 = vmatpush.msrb.mxu3 %v1848_v48 }
 0x6a2   :  { %v1570_v54 = vmul.f32 %v5218_v13, %v1562_v31  ;;  %v1846_v13 = vld [vmem:[%s6393_s20 + $0x60] sm:$0xff] }
 0x6a3   :  { %1856 = vmatpush.msrb.mxu3 %v1847_v3 }
 0x6a4   :  { %v1578_v42 = vadd.f32 %v5223_v7, %v1570_v54 }
 0x6a5   :  { %1857 = vmatpush.msrb.mxu3 %v1846_v13 }
 0x6a6   :  { %3814 = vmatmul.msk.f32.gmra.mxu2 %vm167_vm2, %v1578_v42 }
 0x6a7   :  { %1858 = vmatpush.msrb.mxu3 %v1845_v43 }
 0x6a9   :  { %1859 = vmatpush.msrb.mxu3 %v1844_v17 }
 0x6ab   :  { %1860 = vmatpush.msrb.mxu3 %v1843_v18 }
 0x6ad   :  { %1861 = vmatpush.msrb.mxu3 %v1842_v35 }
 0x6af   :  { %1862 = vmatpush.msrb.mxu3 %v1841_v61 }
 0x6b1   :  { %1863 = vmatpush.msrb.mxu3 %v1840_v50 }
 0x6b3   :  { %1864 = vmatpush.msrb.mxu3 %v1839_v15 }
 0x6b4   :  { %v1619_v62 = vpop.f32.mrf.mxu2 }
 0x6b5   :  { %v5255_v10 = vadd.f32 %v5249_v44, %v1619_v62  ;;  %1865 = vmatpush.msrb.mxu3 %v1838_v34 }
 0x6b7   :  { %v5261_v49 = vmul.f32 0.70710677, %v5255_v10  ;;  %1866 = vmatpush.msrb.mxu3 %v1837_v36 }
 0x6b9   :  { %v5267_v6 = vand.u32 2147483647, %v5261_v49  ;;  %1867 = vmatpush.msrb.mxu3 %v1836_v55 }
 0x6bb   :  { %v1649_v9 = vmul.f32 0.3275911, %v5267_v6  ;;  %v1779_v45 = vsub.f32 0.0, %v5267_v6  ;;  %1868 = vmatpush.msrb.mxu3 %v1835_v2 }
 0x6bc   :  { %v1622_v53 = vpop.f32.mrf.mxu2 }
 0x6bd   :  { %v1654_v7 = vadd.f32 1.0, %v1649_v9  ;;  %v5277_v14 = vadd.f32 %v5249_v44, %v1622_v53  ;;  %v1784_v52 = vmul.f32 %v1779_v45, %v5267_v6  ;;  %1869 = vmatpush.msrb.mxu3 %v1834_v59 }
 0x6bf   :  { %4092 = vrcp.f32 %v1654_v7  ;;  %v5283_v11 = vmul.f32 0.70710677, %v5277_v14  ;;  %v1670_v16 = vand.u32 2147483648, %v1654_v7  ;;  %v1668_v28 = vand.u32 2147483647, %v1654_v7 }
 0x6c0   :  { %vm1664_vm1 = vweird.f32 %v1654_v7  ;;  %v1789_v3 = vmul.f32 1.442695, %v1784_v52 }
 0x6c1   :  { %v5289_v39 = vand.u32 2147483647, %v5283_v11  ;;  %v1671_v1 = vor.u32 1.1754944e-38, %v1670_v16  ;;  %vm1669_vm5 = vcmp.eq.f32.partialorder %v1668_v28, 8.507059e+37 }
 0x6c3   :  { %v1650_v22 = vmul.f32 0.3275911, %v5289_v39  ;;  %v1780_v53 = vsub.f32 0.0, %v5289_v39 }
 0x6c4   :  { %v1625_v21 = vpop.f32.mrf.mxu2 }
 0x6c5   :  { %v4093_v26 = vpop.eup %4092  ;;  %v5299_v47 = vadd.f32 %v5249_v44, %v1625_v21  ;;  %v1655_v23 = vadd.f32 1.0, %v1650_v22 }
 0x6c6   :  { %v1660_v32 = vmul.f32 %v4093_v26, %v1654_v7  ;;  %vm1665_vm0 = vweird.f32 %v4093_v26 }
 0x6c7   :  { %v5305_v19 = vmul.f32 0.70710677, %v5299_v47  ;;  %4094 = vrcp.f32 %v1655_v23  ;;  %vm1666_vm4 = vmor %vm1664_vm1, %vm1665_vm0  ;;  %v1685_v57 = vand.u32 2147483648, %v1655_v23  ;;  %v1683_v33 = vand.u32 2147483647, %v1655_v23 }
 0x6c8   :  { %v1661_v51 = vsub.f32 1.0, %v1660_v32  ;;  %vm1679_vm11 = vweird.f32 %v1655_v23  ;;  %vm1809_vm1 = vcmp.lt.f32.partialorder %v5261_v49, 0.0 }
 0x6c9   :  { %v5311_v24 = vand.u32 2147483647, %v5305_v19  ;;  %v1686_v48 = vor.u32 1.1754944e-38, %v1685_v57  ;;  %vm1684_vm9 = vcmp.eq.f32.partialorder %v1683_v33, 8.507059e+37  ;;  %v1634_v57 = vmul.f32 0.5, %v5255_v10 }
 0x6ca   :  { %v1662_v30 = vmul.f32 %v4093_v26, %v1661_v51 }
 0x6cb   :  { %v1651_v63 = vmul.f32 0.3275911, %v5311_v24  ;;  %v1781_v16 = vsub.f32 0.0, %v5311_v24 }
 0x6cc   :  { %v1663_v60 = vadd.f32 %v4093_v26, %v1662_v30 }
 0x6cd   :  { %v1656_v25 = vadd.f32 1.0, %v1651_v63  ;;  %v4095_v37 = vpop.eup %4094 }
 0x6ce   :  { %v1667_v56 = vsel %vm1666_vm4, %v4093_v26, %v1663_v60  ;;  %v1675_v41 = vmul.f32 %v4095_v37, %v1655_v23  ;;  %vm1680_vm10 = vweird.f32 %v4095_v37  ;;  %v1785_v26 = vmul.f32 %v1780_v53, %v5289_v39 }
 0x6cf   :  { %v1672_v27 = vsel %vm1669_vm5, %v1671_v1, %v1667_v56  ;;  %4096 = vrcp.f32 %v1656_v25  ;;  %vm1681_vm12 = vmor %vm1679_vm11, %vm1680_vm10  ;;  %v1700_v17 = vand.u32 2147483648, %v1656_v25  ;;  %v1698_v22 = vand.u32 2147483647, %v1656_v25 }
 0x6d0   :  { %v1734_v40 = vmul.f32 1.0614054, %v1672_v27  ;;  %v1676_v4 = vsub.f32 1.0, %v1675_v41  ;;  %4098 = vpow2.f32 %v1789_v3  ;;  %vm1694_vm14 = vweird.f32 %v1656_v25 }
 0x6d1   :  { %v1701_v50 = vor.u32 1.1754944e-38, %v1700_v17  ;;  %vm1699_vm0 = vcmp.eq.f32.partialorder %v1698_v22, 8.507059e+37  ;;  %v1791_v63 = vmul.f32 1.442695, %v1785_v26  ;;  %v1786_v39 = vmul.f32 %v1781_v16, %v5311_v24 }
 0x6d2   :  { %v1739_v29 = vadd.f32 -1.4531521, %v1734_v40  ;;  %v1677_v8 = vmul.f32 %v4095_v37, %v1676_v4  ;;  %vm1810_vm4 = vcmp.lt.f32.partialorder %v5283_v11, 0.0  ;;  %vm1811_vm5 = vcmp.lt.f32.partialorder %v5305_v19, 0.0 }
 0x6d3   :  { %4100 = vpow2.f32 %v1791_v63  ;;  %v1793_v59 = vmul.f32 1.442695, %v1786_v39 }
 0x6d4   :  { %v1744_v31 = vmul.f32 %v1739_v29, %v1672_v27  ;;  %v1678_v42 = vadd.f32 %v4095_v37, %v1677_v8 }
 0x6d5   :  { %v4097_v54 = vpop.eup %4096  ;;  %4102 = vpow2.f32 %v1793_v59 }
 0x6d6   :  { %v1749_v62 = vadd.f32 1.4214138, %v1744_v31  ;;  %v1690_v46 = vmul.f32 %v4097_v54, %v1656_v25  ;;  %v1682_v13 = vsel %vm1681_vm12, %v4095_v37, %v1678_v42  ;;  %vm1695_vm13 = vweird.f32 %v4097_v54  ;;  %v4099_v60 = vpop.eup %4098 }
 0x6d7   :  { %v1687_v6 = vsel %vm1684_vm9, %v1686_v48, %v1682_v13  ;;  %vm1696_vm15 = vmor %vm1694_vm14, %vm1695_vm13 }
 0x6d8   :  { %v1754_v9 = vmul.f32 %v1749_v62, %v1672_v27  ;;  %v1691_v43 = vsub.f32 1.0, %v1690_v46  ;;  %v1735_v7 = vmul.f32 1.0614054, %v1687_v6 }
 0x6d9   :  { %v4101_v33 = vpop.eup %4100 }
 0x6da   :  { %v1759_v18 = vadd.f32 -0.28449672, %v1754_v9  ;;  %v1692_v35 = vmul.f32 %v4097_v54, %v1691_v43  ;;  %v1740_v21 = vadd.f32 -1.4531521, %v1735_v7  ;;  %v1635_v9 = vmul.f32 0.5, %v5277_v14 }
 0x6db   :  { %v4103_v3 = vpop.eup %4102 }
 0x6dc   :  { %v1764_v61 = vmul.f32 %v1759_v18, %v1672_v27  ;;  %v1693_v32 = vadd.f32 %v4097_v54, %v1692_v35  ;;  %v1745_v23 = vmul.f32 %v1740_v21, %v1687_v6  ;;  %v1636_v18 = vmul.f32 0.5, %v5299_v47 }
 0x6de   :  { %v1769_v51 = vadd.f32 0.2548296, %v1764_v61  ;;  %v1697_v15 = vsel %vm1696_vm15, %v4097_v54, %v1693_v32  ;;  %v1750_v30 = vadd.f32 1.4214138, %v1745_v23 }
 0x6df   :  { %v1702_v28 = vsel %vm1699_vm0, %v1701_v50, %v1697_v15 }
 0x6e0   :  { %v1774_v34 = vmul.f32 %v1769_v51, %v1672_v27  ;;  %v1736_v36 = vmul.f32 1.0614054, %v1702_v28  ;;  %v1755_v55 = vmul.f32 %v1750_v30, %v1687_v6 }
 0x6e2   :  { %v1799_v1 = vmul.f32 %v4099_v60, %v1774_v34  ;;  %v1741_v37 = vadd.f32 -1.4531521, %v1736_v36  ;;  %v1760_v25 = vadd.f32 -0.28449672, %v1755_v55 }
 0x6e4   :  { %v1804_v56 = vsub.f32 1.0, %v1799_v1  ;;  %v1746_v2 = vmul.f32 %v1741_v37, %v1702_v28  ;;  %v1765_v45 = vmul.f32 %v1760_v25, %v1687_v6 }
 0x6e6   :  { %v1814_v41 = vsub.f32 0.0, %v1804_v56  ;;  %v1751_v40 = vadd.f32 1.4214138, %v1746_v2  ;;  %v1770_v4 = vadd.f32 0.2548296, %v1765_v45 }
 0x6e8   :  { %v1819_v27 = vsel %vm1809_vm1, %v1814_v41, %v1804_v56  ;;  %v1756_v29 = vmul.f32 %v1751_v40, %v1702_v28  ;;  %v1775_v8 = vmul.f32 %v1770_v4, %v1687_v6 }
 0x6e9   :  { %v1824_v52 = vadd.f32 1.0, %v1819_v27 }
 0x6ea   :  { %v1761_v31 = vadd.f32 -0.28449672, %v1756_v29  ;;  %v1800_v54 = vmul.f32 %v4101_v33, %v1775_v8 }
 0x6eb   :  { %v1829_v24 = vmul.f32 %v1824_v52, %v1634_v57 }
 0x6ec   :  { %v1766_v42 = vmul.f32 %v1761_v31, %v1702_v28  ;;  %v1805_v62 = vsub.f32 1.0, %v1800_v54 }
 0x6ed   :  { %1870 = vmatmul.f32.vlgmr.msrb.gmra.mxu3 %v1829_v24 }
 0x6ee   :  { %v1771_v46 = vadd.f32 0.2548296, %v1766_v42  ;;  %v1815_v48 = vsub.f32 0.0, %v1805_v62 }
 0x6f0   :  { %v1776_v49 = vmul.f32 %v1771_v46, %v1702_v28  ;;  %v1820_v13 = vsel %vm1810_vm4, %v1815_v48, %v1805_v62 }
 0x6f1   :  { %v1825_v10 = vadd.f32 1.0, %v1820_v13 }
 0x6f2   :  { %v1801_v53 = vmul.f32 %v4103_v3, %v1776_v49 }
 0x6f3   :  { %v1830_v43 = vmul.f32 %v1825_v10, %v1635_v9 }
 0x6f4   :  { %v1806_v6 = vsub.f32 1.0, %v1801_v53 }
 0x6f5   :  { %1873 = vmatmul.f32.gmra.mxu3 %v1830_v43 }
 0x6f6   :  { %v1816_v7 = vsub.f32 0.0, %v1806_v6 }
 0x6f8   :  { %v1821_v17 = vsel %vm1811_vm5, %v1816_v7, %v1806_v6 }
 0x6f9   :  { %v1826_v35 = vadd.f32 1.0, %v1821_v17 }
 0x6fb   :  { %v1831_v22 = vmul.f32 %v1826_v35, %v1636_v18 }
 0x6fd   :  { %1876 = vmatmul.f32.gmra.mxu3 %v1831_v22 }
 0x71b   :  { %v1628_v11 = vpop.f32.mrf.mxu2 }
 0x71c   :  { %v5342_v21 = vadd.f32 %v5249_v44, %v1628_v11 }
 0x71e   :  { %v5345_v14 = vmul.f32 0.70710677, %v5342_v21  ;;  %v1637_v11 = vmul.f32 0.5, %v5342_v21  ;;  %v3976_v21 = vld [vmem:[%s6394_s21] ss:$0 sm:$0xff] }
 0x720   :  { %v1647_v61 = vand.u32 2147483647, %v5345_v14  ;;  %vm1812_vm1 = vcmp.lt.f32.partialorder %v5345_v14, 0.0 }
 0x722   :  { %v1652_v26 = vmul.f32 0.3275911, %v1647_v61  ;;  %v1782_v1 = vsub.f32 0.0, %v1647_v61 }
 0x724   :  { %v1657_v32 = vadd.f32 1.0, %v1652_v26  ;;  %v1787_v2 = vmul.f32 %v1782_v1, %v1647_v61 }
 0x726   :  { %4104 = vrcp.f32 %v1657_v32  ;;  %v1715_v28 = vand.u32 2147483648, %v1657_v32  ;;  %v1713_v63 = vand.u32 2147483647, %v1657_v32  ;;  %vm1709_vm11 = vweird.f32 %v1657_v32 }
 0x727   :  { %v1795_v4 = vmul.f32 1.442695, %v1787_v2 }
 0x728   :  { %vm1714_vm9 = vcmp.eq.f32.partialorder %v1713_v63, 8.507059e+37 }
 0x729   :  { %v1631_v23 = vpop.f32.mrf.mxu2 }
 0x72a   :  { %v5349_v19 = vadd.f32 %v5249_v44, %v1631_v23  ;;  %v1716_v44 = vor.u32 1.1754944e-38, %v1715_v28 }
 0x72c   :  { %v4105_v47 = vpop.eup %4104  ;;  %v5352_v50 = vmul.f32 0.70710677, %v5349_v19  ;;  %v1638_v14 = vmul.f32 0.5, %v5349_v19 }
 0x72d   :  { %v1705_v51 = vmul.f32 %v4105_v47, %v1657_v32  ;;  %vm1710_vm10 = vweird.f32 %v4105_v47 }
 0x72e   :  { %v1648_v15 = vand.u32 2147483647, %v5352_v50  ;;  %vm1711_vm12 = vmor %vm1709_vm11, %vm1710_vm10  ;;  %vm1813_vm4 = vcmp.lt.f32.partialorder %v5352_v50, 0.0 }
 0x72f   :  { %v1706_v16 = vsub.f32 1.0, %v1705_v51 }
 0x730   :  { %v1653_v30 = vmul.f32 0.3275911, %v1648_v15  ;;  %v1783_v42 = vsub.f32 0.0, %v1648_v15 }
 0x731   :  { %v1707_v34 = vmul.f32 %v4105_v47, %v1706_v16 }
 0x732   :  { %v1658_v36 = vadd.f32 1.0, %v1653_v30  ;;  %v1788_v9 = vmul.f32 %v1783_v42, %v1648_v15 }
 0x733   :  { %v1708_v60 = vadd.f32 %v4105_v47, %v1707_v34 }
 0x734   :  { %4106 = vrcp.f32 %v1658_v36  ;;  %v1730_v27 = vand.u32 2147483648, %v1658_v36  ;;  %v1728_v52 = vand.u32 2147483647, %v1658_v36  ;;  %vm1724_vm14 = vweird.f32 %v1658_v36 }
 0x735   :  { %v1712_v55 = vsel %vm1711_vm12, %v4105_v47, %v1708_v60  ;;  %4108 = vpow2.f32 %v1795_v4  ;;  %v1797_v7 = vmul.f32 1.442695, %v1788_v9 }
 0x736   :  { %v1717_v37 = vsel %vm1714_vm9, %v1716_v44, %v1712_v55  ;;  %v1731_v31 = vor.u32 1.1754944e-38, %v1730_v27  ;;  %vm1729_vm0 = vcmp.eq.f32.partialorder %v1728_v52, 8.507059e+37 }
 0x737   :  { %v1737_v39 = vmul.f32 1.0614054, %v1717_v37  ;;  %4110 = vpow2.f32 %v1797_v7  ;;  %v3820_v7 = vld [vmem:[%s6424_s30 + $0x38] sm:$0xff] }
 0x738   :  { %2058 = vmatpush.msra.mxu0 %v3820_v7 }
 0x739   :  { %v1742_v25 = vadd.f32 -1.4531521, %v1737_v39 }
 0x73a   :  { %v4107_v56 = vpop.eup %4106 }
 0x73b   :  { %v1720_v45 = vmul.f32 %v4107_v56, %v1658_v36  ;;  %v1747_v41 = vmul.f32 %v1742_v25, %v1717_v37  ;;  %vm1725_vm13 = vweird.f32 %v4107_v56  ;;  %v4109_v13 = vpop.eup %4108 }
 0x73c   :  { %vm1726_vm15 = vmor %vm1724_vm14, %vm1725_vm13 }
 0x73d   :  { %v1721_v40 = vsub.f32 1.0, %v1720_v45  ;;  %v1752_v59 = vadd.f32 1.4214138, %v1747_v41  ;;  %v4111_v51 = vpop.eup %4110 }
 0x73f   :  { %v1722_v29 = vmul.f32 %v4107_v56, %v1721_v40  ;;  %v1757_v57 = vmul.f32 %v1752_v59, %v1717_v37 }
 0x741   :  { %v1762_v8 = vadd.f32 -0.28449672, %v1757_v57  ;;  %v1723_v33 = vadd.f32 %v4107_v56, %v1722_v29 }
 0x743   :  { %v1767_v24 = vmul.f32 %v1762_v8, %v1717_v37  ;;  %v1727_v54 = vsel %vm1726_vm15, %v4107_v56, %v1723_v33 }
 0x744   :  { %v1732_v62 = vsel %vm1729_vm0, %v1731_v31, %v1727_v54 }
 0x745   :  { %v1772_v46 = vadd.f32 0.2548296, %v1767_v24  ;;  %v1738_v48 = vmul.f32 1.0614054, %v1732_v62 }
 0x747   :  { %v1777_v49 = vmul.f32 %v1772_v46, %v1717_v37  ;;  %v1743_v3 = vadd.f32 -1.4531521, %v1738_v48 }
 0x749   :  { %v1802_v10 = vmul.f32 %v4109_v13, %v1777_v49  ;;  %v1748_v53 = vmul.f32 %v1743_v3, %v1732_v62 }
 0x74b   :  { %v1807_v43 = vsub.f32 1.0, %v1802_v10  ;;  %v1753_v6 = vadd.f32 1.4214138, %v1748_v53 }
 0x74d   :  { %v1817_v17 = vsub.f32 0.0, %v1807_v43  ;;  %v1758_v18 = vmul.f32 %v1753_v6, %v1732_v62 }
 0x74f   :  { %v1822_v35 = vsel %vm1812_vm1, %v1817_v17, %v1807_v43  ;;  %v1763_v22 = vadd.f32 -0.28449672, %v1758_v18  ;;  %v3830_v17 = vld [vmem:[%s6425_s10 + $0x38] sm:$0xff] }
 0x750   :  { %v1827_v61 = vadd.f32 1.0, %v1822_v35  ;;  %v3840_v18 = vld [vmem:[%s6385_s12 + $0x38] sm:$0xff]  ;;  %2100 = vmatpush.msra.mxu1 %v3830_v17 }
 0x751   :  { %v1768_v26 = vmul.f32 %v1763_v22, %v1732_v62  ;;  %2142 = vmatpush.msrb.mxu2 %v3840_v18  ;;  %v3819_v22 = vld [vmem:[%s6424_s30 + $0x30] sm:$0xff] }
 0x752   :  { %v1832_v32 = vmul.f32 %v1827_v61, %v1637_v11  ;;  %v3829_v11 = vld [vmem:[%s6425_s10 + $0x30] sm:$0xff]  ;;  %2059 = vmatpush.msra.mxu0 %v3819_v22 }
 0x753   :  { %v1773_v23 = vadd.f32 0.2548296, %v1768_v26  ;;  %v3839_v61 = vld [vmem:[%s6385_s12 + $0x30] sm:$0xff]  ;;  %2101 = vmatpush.msra.mxu1 %v3829_v11 }
 0x754   :  { %1879 = vmatmul.f32.gmra.mxu3 %v1832_v32  ;;  %2143 = vmatpush.msrb.mxu2 %v3839_v61 }
 0x755   :  { %v1778_v47 = vmul.f32 %v1773_v23, %v1732_v62  ;;  %v3818_v23 = vld [vmem:[%s6424_s30 + $0x28] sm:$0xff] }
 0x756   :  { %2060 = vmatpush.msra.mxu0 %v3818_v23 }
 0x757   :  { %v1803_v15 = vmul.f32 %v4111_v51, %v1778_v47  ;;  %v3828_v47 = vld [vmem:[%s6425_s10 + $0x28] sm:$0xff] }
 0x758   :  { %v3838_v51 = vld [vmem:[%s6385_s12 + $0x28] sm:$0xff]  ;;  %2102 = vmatpush.msra.mxu1 %v3828_v47 }
 0x759   :  { %v1808_v16 = vsub.f32 1.0, %v1803_v15  ;;  %2144 = vmatpush.msrb.mxu2 %v3838_v51 }
 0x75b   :  { %v1818_v30 = vsub.f32 0.0, %v1808_v16 }
 0x75d   :  { %v1823_v28 = vsel %vm1813_vm4, %v1818_v30, %v1808_v16  ;;  %v3817_v16 = vld [vmem:[%s6424_s30 + $0x20] sm:$0xff] }
 0x75e   :  { %v1828_v34 = vadd.f32 1.0, %v1823_v28  ;;  %v3827_v30 = vld [vmem:[%s6425_s10 + $0x20] sm:$0xff]  ;;  %2061 = vmatpush.msra.mxu0 %v3817_v16 }
 0x75f   :  { %v3837_v28 = vld [vmem:[%s6385_s12 + $0x20] sm:$0xff]  ;;  %2103 = vmatpush.msra.mxu1 %v3827_v30 }
 0x760   :  { %v1833_v63 = vmul.f32 %v1828_v34, %v1638_v14  ;;  %2145 = vmatpush.msrb.mxu2 %v3837_v28 }
 0x762   :  { %1882 = vmatmul.f32.gmra.mxu3 %v1833_v63 }
 0x770   :  { %v1871_v36 = vpop.f32.mrf.mxu3 }
 0x771   :  { %v1872_v60 = vadd.f32 %v3976_v21, %v1871_v36 }
 0x773   :  { %v5363_v44 = vadd.f32 %v1872_v60, %v5145_v0 }
 0x775   :  { %v1895_v55 = vsel %vm167_vm2, %v5363_v44, 0.0 }
 0x776   :  { %1896 = vadd.xlane.f32.xlu0 %v1895_v55 }
 0x778   :  { %v1874_v50 = vpop.f32.mrf.mxu3 }
 0x779   :  { %v1875_v1 = vadd.f32 %v3976_v21, %v1874_v50 }
 0x77b   :  { %v5368_v19 = vadd.f32 %v1875_v1, %v5150_v58 }
 0x77d   :  { %v1898_v37 = vsel %vm167_vm2, %v5368_v19, 0.0 }
 0x77e   :  { %1899 = vadd.xlane.f32.xlu1 %v1898_v37 }
 0x780   :  { %v1877_v39 = vpop.f32.mrf.mxu3 }
 0x781   :  { %v1878_v25 = vadd.f32 %v3976_v21, %v1877_v39 }
 0x783   :  { %v5373_v56 = vadd.f32 %v1878_v25, %v5155_v12 }
 0x785   :  { %v1901_v0 = vsel %vm167_vm2, %v5373_v56, 0.0 }
 0x786   :  { %1902 = vadd.xlane.f32.xlu2 %v1901_v0 }
 0x7d7   :  { %v1880_v2 = vpop.f32.mrf.mxu3 }
 0x7d8   :  { %v1881_v45 = vadd.f32 %v3976_v21, %v1880_v2 }
 0x7da   :  { %v5378_v41 = vadd.f32 %v1881_v45, %v5160_v20  ;;  %v5464_v45 = vld [vmem:[%s6426_s7 + $0x1] ss:$0 sm:$0xff]  ;;  %s4278_s7 = smov [#allocation2]  }
 0x7dc   :  { %v1904_v58 = vsel %vm167_vm2, %v5378_v41, 0.0 }
 0x7dd   :  { %1905 = vadd.xlane.f32.xlu0 %v1904_v58 }
 0x7e5   :  { %v1883_v40 = vpop.f32.mrf.mxu3 }
 0x7e6   :  { %v1884_v59 = vadd.f32 %v3976_v21, %v1883_v40 }
 0x7e8   :  { %v5383_v4 = vadd.f32 %v1884_v59, %v5165_v5 }
 0x7e9   :  { %v1897_v12 = vpop.xlane.xlu0 %1896 }
 0x7ea   :  { %v1907_v27 = vsel %vm180_vm3, %v5383_v4, 0.0  ;;  %v1910_v29 = vmul.f32 %v1897_v12, %v4490_v38 }
 0x7eb   :  { %1908 = vadd.xlane.f32.xlu1 %v1907_v27  ;;  %v5470_v27 = vld [vmem:[%s6427_s5 + $0x1] ss:$0 sm:$0xff]  ;;  %s3706_s5 = sshll.u32 %s4278_s7, 4  ;;  %s3707_s5 = int_to_ptr.vmem [resolvable:$true] %s3706_s5 }
 0x7ec   :  { %v5389_v57 = vsub.f32 %v5363_v44, %v1910_v29 }
 0x7ee   :  { %v1920_v20 = vmul.f32 %v5389_v57, %v5389_v57 }
 0x7f0   :  { %v1925_v52 = vsel %vm167_vm2, %v1920_v20, 0.0 }
 0x7f1   :  { %1926 = vadd.xlane.f32.xlu2 %v1925_v52  ;;  %v1900_v8 = vpop.xlane.xlu1 %1899 }
 0x7f2   :  { %v1911_v5 = vmul.f32 %v1900_v8, %v4490_v38 }
 0x7f4   :  { %v5396_v33 = vsub.f32 %v5368_v19, %v1911_v5 }
 0x7f6   :  { %v1921_v31 = vmul.f32 %v5396_v33, %v5396_v33 }
 0x7f8   :  { %v1928_v24 = vsel %vm167_vm2, %v1921_v31, 0.0 }
 0x7f9   :  { %1929 = vadd.xlane.f32.xlu0 %v1928_v24  ;;  %v1903_v54 = vpop.xlane.xlu2 %1902 }
 0x7fa   :  { %v1912_v42 = vmul.f32 %v1903_v54, %v4490_v38 }
 0x7fc   :  { %v5403_v62 = vsub.f32 %v5373_v56, %v1912_v42 }
 0x7fe   :  { %v1922_v46 = vmul.f32 %v5403_v62, %v5403_v62 }
 0x800   :  { %v1931_v48 = vsel %vm167_vm2, %v1922_v46, 0.0 }
 0x801   :  { %1932 = vadd.xlane.f32.xlu1 %v1931_v48 }
 0x850   :  { %v1906_v49 = vpop.xlane.xlu0 %1905 }
 0x851   :  { %v1913_v3 = vmul.f32 %v1906_v49, %v4490_v38 }
 0x853   :  { %v5410_v13 = vsub.f32 %v5378_v41, %v1913_v3 }
 0x855   :  { %v1923_v9 = vmul.f32 %v5410_v13, %v5410_v13 }
 0x857   :  { %v1934_v10 = vsel %vm167_vm2, %v1923_v9, 0.0 }
 0x858   :  { %1935 = vadd.xlane.f32.xlu2 %v1934_v10 }
 0x85e   :  { %v1909_v53 = vpop.xlane.xlu1 %1908 }
 0x85f   :  { %v1914_v43 = vmul.f32 %v1909_v53, %v4490_v38 }
 0x861   :  { %v5417_v6 = vsub.f32 %v5383_v4, %v1914_v43 }
 0x863   :  { %v1924_v35 = vmul.f32 %v5417_v6, %v5417_v6 }
 0x864   :  { %v1927_v26 = vpop.xlane.xlu2 %1926 }
 0x865   :  { %v1937_v32 = vsel %vm180_vm3, %v1924_v35, 0.0  ;;  %v1940_v15 = vmul.f32 %v1927_v26, %v4490_v38 }
 0x866   :  { %1938 = vadd.xlane.f32.xlu0 %v1937_v32 }
 0x867   :  { %v1945_v14 = vadd.f32 1e-06, %v1940_v15 }
 0x869   :  { %4112 = vrsqrt.f32 %v1945_v14  ;;  %vm1956_vm10 = vweird.f32 %v1945_v14 }
 0x86c   :  { %v1930_v34 = vpop.xlane.xlu0 %1929 }
 0x86d   :  { %v1941_v63 = vmul.f32 %v1930_v34, %v4490_v38 }
 0x86f   :  { %v4113_v21 = vpop.eup %4112  ;;  %v1946_v60 = vadd.f32 1e-06, %v1941_v63 }
 0x870   :  { %v1951_v36 = vmul.f32 %v4113_v21, %v1945_v14  ;;  %vm1957_vm5 = vweird.f32 %v4113_v21 }
 0x871   :  { %4114 = vrsqrt.f32 %v1946_v60  ;;  %vm1958_vm11 = vmor %vm1956_vm10, %vm1957_vm5  ;;  %vm1966_vm9 = vweird.f32 %v1946_v60 }
 0x872   :  { %v1952_v55 = vmul.f32 %v4113_v21, %v1951_v36 }
 0x874   :  { %v1953_v50 = vmul.f32 0.5, %v1952_v55  ;;  %v1933_v1 = vpop.xlane.xlu1 %1932 }
 0x875   :  { %v1942_v39 = vmul.f32 %v1933_v1, %v4490_v38 }
 0x876   :  { %v1954_v37 = vsub.f32 1.5, %v1953_v50 }
 0x877   :  { %v4115_v25 = vpop.eup %4114  ;;  %v1947_v2 = vadd.f32 1e-06, %v1942_v39 }
 0x878   :  { %v1955_v0 = vmul.f32 %v4113_v21, %v1954_v37  ;;  %v1961_v58 = vmul.f32 %v4115_v25, %v1946_v60  ;;  %vm1967_vm12 = vweird.f32 %v4115_v25 }
 0x879   :  { %4116 = vrsqrt.f32 %v1947_v2  ;;  %vm1968_vm13 = vmor %vm1966_vm9, %vm1967_vm12  ;;  %vm1976_vm15 = vweird.f32 %v1947_v2 }
 0x87a   :  { %v1959_v40 = vsel %vm1958_vm11, %v4113_v21, %v1955_v0  ;;  %v1962_v12 = vmul.f32 %v4115_v25, %v1961_v58 }
 0x87b   :  { %v2000_v59 = vmul.f32 %v1959_v40, %v5389_v57 }
 0x87c   :  { %v1963_v20 = vmul.f32 0.5, %v1962_v12 }
 0x87d   :  { %v2008_v29 = vmul.f32 %v5464_v45, %v2000_v59 }
 0x87e   :  { %v1964_v52 = vsub.f32 1.5, %v1963_v20 }
 0x87f   :  { %v2016_v8 = vadd.f32 %v5470_v27, %v2008_v29  ;;  %v4117_v5 = vpop.eup %4116 }
 0x880   :  { %v1965_v31 = vmul.f32 %v4115_v25, %v1964_v52  ;;  %v1971_v24 = vmul.f32 %v4117_v5, %v1947_v2  ;;  %vm1977_vm14 = vweird.f32 %v4117_v5 }
 0x881   :  { %3822 = vmatmul.msk.f32.vlgmr.msra.gmra.mxu0 %vm167_vm2, %v2016_v8  ;;  %3832 = vmatmul.msk.f32.vlgmr.msra.gmra.mxu1 %vm167_vm2, %v2016_v8  ;;  %vm1978_vm0 = vmor %vm1976_vm15, %vm1977_vm14 }
 0x882   :  { %3842 = vmatmul.msk.f32.vlgmr.msrb.gmra.mxu2 %vm167_vm2, %v2016_v8  ;;  %v1969_v57 = vsel %vm1968_vm13, %v4115_v25, %v1965_v31  ;;  %v1972_v54 = vmul.f32 %v4117_v5, %v1971_v24  ;;  %v3979_v24 = vld [vmem:[%s6428_s4 + $0x1] ss:$0 sm:$0xff] }
 0x883   :  { %v2001_v42 = vmul.f32 %v1969_v57, %v5396_v33 }
 0x884   :  { %v1973_v46 = vmul.f32 0.5, %v1972_v54 }
 0x885   :  { %v2009_v48 = vmul.f32 %v5464_v45, %v2001_v42 }
 0x886   :  { %v1974_v49 = vsub.f32 1.5, %v1973_v46 }
 0x887   :  { %v2017_v3 = vadd.f32 %v5470_v27, %v2009_v48 }
 0x888   :  { %v1975_v9 = vmul.f32 %v4117_v5, %v1974_v49 }
 0x889   :  { %3823 = vmatmul.msk.f32.gmra.mxu0 %vm167_vm2, %v2017_v3  ;;  %3833 = vmatmul.msk.f32.gmra.mxu1 %vm167_vm2, %v2017_v3 }
 0x88a   :  { %v1979_v10 = vsel %vm1978_vm0, %v4117_v5, %v1975_v9  ;;  %3843 = vmatmul.msk.f32.gmra.mxu2 %vm167_vm2, %v2017_v3  ;;  %v4238_v3 = vld [vmem:[%s6429_s9] ss:$0 sm:$0xff] }
 0x88b   :  { %v2002_v53 = vmul.f32 %v1979_v10, %v5403_v62  ;;  %v4239_v10 = vld [vmem:[%s6429_s9 + $0x1] ss:$0 sm:$0xff] }
 0x88d   :  { %v2010_v33 = vmul.f32 %v5464_v45, %v2002_v53 }
 0x88f   :  { %v2018_v43 = vadd.f32 %v5470_v27, %v2010_v33 }
 0x891   :  { %3824 = vmatmul.msk.f32.gmra.mxu0 %vm167_vm2, %v2018_v43  ;;  %3834 = vmatmul.msk.f32.gmra.mxu1 %vm167_vm2, %v2018_v43 }
 0x892   :  { %3844 = vmatmul.msk.f32.gmra.mxu2 %vm167_vm2, %v2018_v43 }
 0x8cb   :  { %v1936_v7 = vpop.xlane.xlu2 %1935 }
 0x8cc   :  { %v1943_v17 = vmul.f32 %v1936_v7, %v4490_v38 }
 0x8ce   :  { %v1948_v18 = vadd.f32 1e-06, %v1943_v17 }
 0x8d0   :  { %4118 = vrsqrt.f32 %v1948_v18  ;;  %vm1986_vm4 = vweird.f32 %v1948_v18 }
 0x8d6   :  { %v4119_v35 = vpop.eup %4118 }
 0x8d7   :  { %v1981_v22 = vmul.f32 %v4119_v35, %v1948_v18  ;;  %vm1987_vm1 = vweird.f32 %v4119_v35 }
 0x8d8   :  { %vm1988_vm5 = vmor %vm1986_vm4, %vm1987_vm1 }
 0x8d9   :  { %v1982_v11 = vmul.f32 %v4119_v35, %v1981_v22  ;;  %v1939_v61 = vpop.xlane.xlu0 %1938 }
 0x8da   :  { %v1944_v62 = vmul.f32 %v1939_v61, %v4490_v38 }
 0x8db   :  { %v1983_v26 = vmul.f32 0.5, %v1982_v11 }
 0x8dc   :  { %v1949_v32 = vadd.f32 1e-06, %v1944_v62 }
 0x8dd   :  { %v1984_v23 = vsub.f32 1.5, %v1983_v26 }
 0x8de   :  { %4120 = vrsqrt.f32 %v1949_v32  ;;  %vm1996_vm11 = vweird.f32 %v1949_v32 }
 0x8df   :  { %v1985_v47 = vmul.f32 %v4119_v35, %v1984_v23 }
 0x8e1   :  { %v1989_v51 = vsel %vm1988_vm5, %v4119_v35, %v1985_v47 }
 0x8e2   :  { %v2003_v15 = vmul.f32 %v1989_v51, %v5410_v13 }
 0x8e4   :  { %v4121_v16 = vpop.eup %4120  ;;  %v2011_v30 = vmul.f32 %v5464_v45, %v2003_v15  ;;  %v4240_v15 = vld [vmem:[%s6429_s9 + $0x2] ss:$0 sm:$0xff] }
 0x8e5   :  { %v1991_v28 = vmul.f32 %v4121_v16, %v1949_v32  ;;  %vm1997_vm10 = vweird.f32 %v4121_v16 }
 0x8e6   :  { %v2019_v14 = vadd.f32 %v5470_v27, %v2011_v30  ;;  %vm1998_vm12 = vmor %vm1996_vm11, %vm1997_vm10  ;;  %v4241_v30 = vld [vmem:[%s6429_s9 + $0x3] ss:$0 sm:$0xff] }
 0x8e7   :  { %v1992_v34 = vmul.f32 %v4121_v16, %v1991_v28 }
 0x8e8   :  { %3825 = vmatmul.msk.f32.gmra.mxu0 %vm167_vm2, %v2019_v14  ;;  %3835 = vmatmul.msk.f32.gmra.mxu1 %vm167_vm2, %v2019_v14 }
 0x8e9   :  { %v1993_v63 = vmul.f32 0.5, %v1992_v34  ;;  %3845 = vmatmul.msk.f32.gmra.mxu2 %vm167_vm2, %v2019_v14 }
 0x8eb   :  { %v1994_v21 = vsub.f32 1.5, %v1993_v63 }
 0x8ed   :  { %v1995_v36 = vmul.f32 %v4121_v16, %v1994_v21 }
 0x8ef   :  { %v1999_v13 = vsel %vm1998_vm12, %v4121_v16, %v1995_v36 }
 0x8f0   :  { %v2004_v60 = vmul.f32 %v1999_v13, %v5417_v6  ;;  %v3980_v6 = vld [vmem:[%s6384_s11 + $0x1] ss:$0 sm:$0xff] }
 0x8f2   :  { %v2012_v55 = vmul.f32 %v5464_v45, %v2004_v60 }
 0x8f4   :  { %v2020_v50 = vadd.f32 %v5470_v27, %v2012_v55  ;;  %v3981_v27 = vld [vmem:[%s6386_s13 + $0x1] ss:$0 sm:$0xff] }
 0x8f6   :  { %3826 = vmatmul.msk.f32.gmra.mxu0 %vm167_vm2, %v2020_v50  ;;  %3836 = vmatmul.msk.f32.gmra.mxu1 %vm167_vm2, %v2020_v50 }
 0x8f7   :  { %3846 = vmatmul.msk.f32.gmra.mxu2 %vm167_vm2, %v2020_v50 }
 0x8fe   :  { %v2105_v1 = vpop.f32.mrf.mxu1  ;;  %v2063_v8 = vpop.f32.mrf.mxu0 }
 0x8ff   :  { %v2064_v46 = vadd.f32 %v3979_v24, %v2063_v8  ;;  %v2106_v48 = vadd.f32 %v3980_v6, %v2105_v1  ;;  %v4242_v1 = vld [vmem:[%s6430_s0] sm:$0xff] }
 0x901   :  { %v2162_v9 = vmul.f32 %v4238_v3, %v2064_v46  ;;  %v2409_v53 = vmul.f32 %v4239_v10, %v2064_v46  ;;  %v2638_v16 = vmul.f32 %v4240_v15, %v2064_v46  ;;  %v2867_v28 = vmul.f32 %v4241_v30, %v2064_v46 }
 0x905   :  { %v2147_v37 = vpop.f32.mrf.mxu2 }
 0x906   :  { %v2108_v39 = vpop.f32.mrf.mxu1  ;;  %v2148_v42 = vadd.f32 %v3981_v27, %v2147_v37  ;;  %v2066_v49 = vpop.f32.mrf.mxu0 }
 0x907   :  { %v2109_v57 = vadd.f32 %v3980_v6, %v2108_v39  ;;  %v2067_v33 = vadd.f32 %v3979_v24, %v2066_v49 }
 0x909   :  { %v2163_v43 = vmul.f32 %v4238_v3, %v2067_v33  ;;  %v2410_v7 = vmul.f32 %v4239_v10, %v2067_v33  ;;  %v2639_v14 = vmul.f32 %v4240_v15, %v2067_v33  ;;  %v2868_v34 = vmul.f32 %v4241_v30, %v2067_v33 }
 0x90d   :  { %v2150_v25 = vpop.f32.mrf.mxu2 }
 0x90e   :  { %v2111_v0 = vpop.f32.mrf.mxu1  ;;  %v2151_v54 = vadd.f32 %v3981_v27, %v2150_v25  ;;  %v2069_v17 = vpop.f32.mrf.mxu0 }
 0x90f   :  { %v2112_v52 = vadd.f32 %v3980_v6, %v2111_v0  ;;  %v2070_v18 = vadd.f32 %v3979_v24, %v2069_v17 }
 0x911   :  { %v2164_v35 = vmul.f32 %v4238_v3, %v2070_v18  ;;  %v2411_v22 = vmul.f32 %v4239_v10, %v2070_v18  ;;  %v2640_v63 = vmul.f32 %v4240_v15, %v2070_v18  ;;  %v2869_v21 = vmul.f32 %v4241_v30, %v2070_v18 }
 0x915   :  { %v2153_v2 = vpop.f32.mrf.mxu2 }
 0x916   :  { %v2154_v31 = vadd.f32 %v3981_v27, %v2153_v2 }
 0x965   :  { %v2114_v58 = vpop.f32.mrf.mxu1  ;;  %v2072_v11 = vpop.f32.mrf.mxu0 }
 0x966   :  { %v2115_v12 = vadd.f32 %v3980_v6, %v2114_v58  ;;  %v2073_v61 = vadd.f32 %v3979_v24, %v2072_v11  ;;  %v4243_v58 = vld [vmem:[%s6430_s0 + $0x8] sm:$0xff] }
 0x968   :  { %v2165_v62 = vmul.f32 %v4238_v3, %v2073_v61  ;;  %v2412_v26 = vmul.f32 %v4239_v10, %v2073_v61  ;;  %v2641_v36 = vmul.f32 %v4240_v15, %v2073_v61  ;;  %v2870_v13 = vmul.f32 %v4241_v30, %v2073_v61 }
 0x96c   :  { %v2156_v45 = vpop.f32.mrf.mxu2 }
 0x96d   :  { %v2157_v5 = vadd.f32 %v3981_v27, %v2156_v45 }
 0x973   :  { %v2117_v40 = vpop.f32.mrf.mxu1  ;;  %v2075_v32 = vpop.f32.mrf.mxu0 }
 0x974   :  { %v2118_v59 = vadd.f32 %v3980_v6, %v2117_v40  ;;  %v2076_v23 = vadd.f32 %v3979_v24, %v2075_v32 }
 0x976   :  { %3847 = vmatpush.xpose.msk.msra.mxu3 %vm167_vm2, %v2118_v59  ;;  %3863 = vmatpush.xpose.msk.msrb.mxu1 %vm167_vm2, %v2118_v59  ;;  %v2166_v47 = vmul.f32 %v4238_v3, %v2076_v23  ;;  %v2413_v51 = vmul.f32 %v4239_v10, %v2076_v23  ;;  %v2642_v60 = vmul.f32 %v4240_v15, %v2076_v23 }
 0x977   :  { %v2871_v55 = vmul.f32 %v4241_v30, %v2076_v23 }
 0x97a   :  { %v2159_v29 = vpop.f32.mrf.mxu2  ;;  %3848 = vmatpush.xpose.msk.msra.mxu3 %vm167_vm2, %v2115_v12  ;;  %3864 = vmatpush.xpose.msk.msrb.mxu1 %vm167_vm2, %v2115_v12 }
 0x97b   :  { %v2160_v20 = vadd.f32 %v3981_v27, %v2159_v29  ;;  %v4244_v29 = vld [vmem:[%s6430_s0 + $0x10] sm:$0xff] }
 0x97d   :  { %3857 = vmatpush.msk.msrb.mxu0 %vm644_vm6, %v2160_v20  ;;  %3873 = vmatpush.msk.msra.mxu2 %vm644_vm6, %v2160_v20 }
 0x97e   :  { %3849 = vmatpush.xpose.msk.msra.mxu3 %vm167_vm2, %v2112_v52  ;;  %3865 = vmatpush.xpose.msk.msrb.mxu1 %vm167_vm2, %v2112_v52 }
 0x97f   :  { %2379 = vmatpush.msrb.mxu0 %v2157_v5  ;;  %2608 = vmatpush.msra.mxu2 %v2157_v5 }
 0x981   :  { %2380 = vmatpush.msrb.mxu0 %v2154_v31  ;;  %2609 = vmatpush.msra.mxu2 %v2154_v31 }
 0x982   :  { %3850 = vmatpush.xpose.msk.msra.mxu3 %vm167_vm2, %v2109_v57  ;;  %3866 = vmatpush.xpose.msk.msrb.mxu1 %vm167_vm2, %v2109_v57 }
 0x983   :  { %2381 = vmatpush.msrb.mxu0 %v2151_v54  ;;  %2610 = vmatpush.msra.mxu2 %v2151_v54 }
 0x985   :  { %2382 = vmatpush.msrb.mxu0 %v2148_v42  ;;  %2611 = vmatpush.msra.mxu2 %v2148_v42 }
 0x986   :  { %3851 = vmatpush.xpose.msk.msra.mxu3 %vm167_vm2, %v2106_v48  ;;  %3867 = vmatpush.xpose.msk.msrb.mxu1 %vm167_vm2, %v2106_v48 }
 0x987   :  { %3889 = vmatpush.msk.msra.mxu0 %vm644_vm6, %v2160_v20  ;;  %3905 = vmatpush.msk.msrb.mxu2 %vm644_vm6, %v2160_v20 }
 0x989   :  { %2837 = vmatpush.msra.mxu0 %v2157_v5  ;;  %3066 = vmatpush.msrb.mxu2 %v2157_v5 }
 0x98a   :  { %3879 = vmatpush.xpose.msk.msrb.mxu3 %vm167_vm2, %v2118_v59  ;;  %3895 = vmatpush.xpose.msk.msra.mxu1 %vm167_vm2, %v2118_v59 }
 0x98b   :  { %3852 = vmatmul.msk.f32.vlgmr.msra.gmra.mxu3 %vm167_vm2, %v2162_v9  ;;  %3868 = vmatmul.msk.f32.vlgmr.msrb.gmra.mxu1 %vm167_vm2, %v2409_v53  ;;  %v5617_v9 = vld [vmem:[%s6430_s0 + $0x20] sm:$0x3] }
 0x98c   :  { %2838 = vmatpush.msra.mxu0 %v2154_v31  ;;  %3067 = vmatpush.msrb.mxu2 %v2154_v31 }
 0x98e   :  { %3880 = vmatpush.xpose.msk.msrb.mxu3 %vm167_vm2, %v2115_v12  ;;  %2839 = vmatpush.msra.mxu0 %v2151_v54 }
 0x98f   :  { %3896 = vmatpush.xpose.msk.msra.mxu1 %vm167_vm2, %v2115_v12  ;;  %3068 = vmatpush.msrb.mxu2 %v2151_v54 }
 0x990   :  { %2840 = vmatpush.msra.mxu0 %v2148_v42 }
 0x991   :  { %3069 = vmatpush.msrb.mxu2 %v2148_v42 }
 0x992   :  { %3881 = vmatpush.xpose.msk.msrb.mxu3 %vm167_vm2, %v2112_v52 }
 0x993   :  { %3897 = vmatpush.xpose.msk.msra.mxu1 %vm167_vm2, %v2112_v52  ;;  %3853 = vmatmul.msk.f32.gmra.mxu3 %vm167_vm2, %v2163_v43 }
 0x994   :  { %3869 = vmatmul.msk.f32.gmra.mxu1 %vm167_vm2, %v2410_v7 }
 0x996   :  { %3882 = vmatpush.xpose.msk.msrb.mxu3 %vm167_vm2, %v2109_v57 }
 0x997   :  { %3898 = vmatpush.xpose.msk.msra.mxu1 %vm167_vm2, %v2109_v57  ;;  %v5602_v57 = vld [vmem:[%s6430_s0 + $0x18] sm:$0xff] }
 0x99a   :  { %3883 = vmatpush.xpose.msk.msrb.mxu3 %vm167_vm2, %v2106_v48 }
 0x99b   :  { %3899 = vmatpush.xpose.msk.msra.mxu1 %vm167_vm2, %v2106_v48  ;;  %3854 = vmatmul.msk.f32.gmra.mxu3 %vm167_vm2, %v2164_v35 }
 0x99c   :  { %3870 = vmatmul.msk.f32.gmra.mxu1 %vm167_vm2, %v2411_v22 }
 0x9a3   :  { %3855 = vmatmul.msk.f32.gmra.mxu3 %vm167_vm2, %v2165_v62 }
 0x9a4   :  { %3871 = vmatmul.msk.f32.gmra.mxu1 %vm167_vm2, %v2412_v26 }
 0x9ab   :  { %3856 = vmatmul.msk.f32.gmra.mxu3 %vm167_vm2, %v2166_v47 }
 0x9ac   :  { %3872 = vmatmul.msk.f32.gmra.mxu1 %vm167_vm2, %v2413_v51 }
 0x9b3   :  { %3884 = vmatmul.msk.f32.vlgmr.msrb.gmra.mxu3 %vm167_vm2, %v2638_v16 }
 0x9b4   :  { %3900 = vmatmul.msk.f32.vlgmr.msra.gmra.mxu1 %vm167_vm2, %v2867_v28 }
 0x9bb   :  { %3885 = vmatmul.msk.f32.gmra.mxu3 %vm167_vm2, %v2639_v14 }
 0x9bc   :  { %3901 = vmatmul.msk.f32.gmra.mxu1 %vm167_vm2, %v2868_v34 }
 0x9c3   :  { %3886 = vmatmul.msk.f32.gmra.mxu3 %vm167_vm2, %v2640_v63 }
 0x9c4   :  { %3902 = vmatmul.msk.f32.gmra.mxu1 %vm167_vm2, %v2869_v21 }
 0x9cb   :  { %3887 = vmatmul.msk.f32.gmra.mxu3 %vm167_vm2, %v2641_v36 }
 0x9cc   :  { %3903 = vmatmul.msk.f32.gmra.mxu1 %vm167_vm2, %v2870_v13 }
 0x9d3   :  { %3888 = vmatmul.msk.f32.gmra.mxu3 %vm167_vm2, %v2642_v60 }
 0x9d4   :  { %3904 = vmatmul.msk.f32.gmra.mxu1 %vm167_vm2, %v2871_v55 }
 0xa08   :  { %v2446_v50 = vpop.f32.mrf.mxu1 }
 0xa09   :  { %v5571_v37 = vadd.f32 %v4242_v1, %v2446_v50 }
 0xa0b   :  { %v2461_v39 = vsel %vm507_vm7, %v5571_v37, -inf }
 0xa0c   :  { %2462 = vmax.xlane.f32.xlu1 %v2461_v39 }
 0xa0e   :  { %v2214_v25 = vpop.f32.mrf.mxu3 }
 0xa0f   :  { %v5575_v0 = vadd.f32 %v4242_v1, %v2214_v25 }
 0xa11   :  { %v2449_v2 = vpop.f32.mrf.mxu1  ;;  %v2229_v45 = vsel %vm507_vm7, %v5575_v0, -inf }
 0xa12   :  { %v5580_v6 = vadd.f32 %v4243_v58, %v2449_v2  ;;  %2230 = vmax.xlane.f32.xlu2 %v2229_v45 }
 0xa14   :  { %v2464_v40 = vsel %vm507_vm7, %v5580_v6, -inf }
 0xa15   :  { %2465 = vmax.xlane.f32.xlu0 %v2464_v40 }
 0xa16   :  { %v2217_v59 = vpop.f32.mrf.mxu3 }
 0xa17   :  { %v5586_v12 = vadd.f32 %v4243_v58, %v2217_v59 }
 0xa19   :  { %v2452_v27 = vpop.f32.mrf.mxu1  ;;  %v2232_v52 = vsel %vm507_vm7, %v5586_v12, -inf }
 0xa1a   :  { %v5591_v20 = vadd.f32 %v4244_v29, %v2452_v27  ;;  %2233 = vmax.xlane.f32.xlu1 %v2232_v52 }
 0xa1c   :  { %v2467_v8 = vsel %vm507_vm7, %v5591_v20, -inf }
 0xa1d   :  { %2468 = vmax.xlane.f32.xlu2 %v2467_v8 }
 0xa1e   :  { %v2220_v5 = vpop.f32.mrf.mxu3 }
 0xa1f   :  { %v5597_v31 = vadd.f32 %v4244_v29, %v2220_v5 }
 0xa21   :  { %v2455_v24 = vpop.f32.mrf.mxu1  ;;  %v2235_v42 = vsel %vm507_vm7, %v5597_v31, -inf }
 0xa22   :  { %v5605_v54 = vadd.f32 %v5602_v57, %v2455_v24  ;;  %2236 = vmax.xlane.f32.xlu0 %v2235_v42 }
 0xa24   :  { %v2470_v46 = vsel %vm507_vm7, %v5605_v54, -inf }
 0xa25   :  { %2471 = vmax.xlane.f32.xlu1 %v2470_v46 }
 0xa26   :  { %v2223_v48 = vpop.f32.mrf.mxu3 }
 0xa27   :  { %v5612_v49 = vadd.f32 %v5602_v57, %v2223_v48 }
 0xa29   :  { %v2458_v3 = vpop.f32.mrf.mxu1  ;;  %v2238_v53 = vsel %vm507_vm7, %v5612_v49, -inf }
 0xa2a   :  { %v5620_v10 = vadd.f32 %v5617_v9, %v2458_v3  ;;  %2239 = vmax.xlane.f32.xlu2 %v2238_v53 }
 0xa2c   :  { %v2473_v33 = vsel %vm520_vm8, %v5620_v10, -inf }
 0xa2d   :  { %2474 = vmax.xlane.f32.xlu0 %v2473_v33 }
 0xa2e   :  { %v2226_v43 = vpop.f32.mrf.mxu3 }
 0xa2f   :  { %v5627_v7 = vadd.f32 %v5617_v9, %v2226_v43 }
 0xa31   :  { %v2904_v17 = vpop.f32.mrf.mxu1  ;;  %v2241_v35 = vsel %vm520_vm8, %v5627_v7, -inf }
 0xa32   :  { %v5629_v18 = vadd.f32 %v4242_v1, %v2904_v17  ;;  %2242 = vmax.xlane.f32.xlu1 %v2241_v35 }
 0xa34   :  { %v2919_v22 = vsel %vm507_vm7, %v5629_v18, -inf }
 0xa35   :  { %2920 = vmax.xlane.f32.xlu2 %v2919_v22 }
 0xa36   :  { %v2675_v11 = vpop.f32.mrf.mxu3 }
 0xa37   :  { %v5635_v61 = vadd.f32 %v4242_v1, %v2675_v11 }
 0xa39   :  { %v2907_v62 = vpop.f32.mrf.mxu1  ;;  %v2690_v32 = vsel %vm507_vm7, %v5635_v61, -inf }
 0xa3a   :  { %v5637_v26 = vadd.f32 %v4243_v58, %v2907_v62  ;;  %2691 = vmax.xlane.f32.xlu0 %v2690_v32 }
 0xa3c   :  { %v2922_v23 = vsel %vm507_vm7, %v5637_v26, -inf }
 0xa3d   :  { %2923 = vmax.xlane.f32.xlu1 %v2922_v23 }
 0xa3e   :  { %v2678_v47 = vpop.f32.mrf.mxu3 }
 0xa3f   :  { %v5643_v51 = vadd.f32 %v4243_v58, %v2678_v47 }
 0xa41   :  { %v2910_v15 = vpop.f32.mrf.mxu1  ;;  %v2693_v30 = vsel %vm507_vm7, %v5643_v51, -inf }
 0xa42   :  { %v5645_v16 = vadd.f32 %v4244_v29, %v2910_v15  ;;  %2694 = vmax.xlane.f32.xlu0 %v2693_v30 }
 0xa44   :  { %v2925_v28 = vsel %vm507_vm7, %v5645_v16, -inf }
 0xa45   :  { %2926 = vmax.xlane.f32.xlu2 %v2925_v28 }
 0xa46   :  { %v2681_v14 = vpop.f32.mrf.mxu3 }
 0xa47   :  { %v5651_v34 = vadd.f32 %v4244_v29, %v2681_v14 }
 0xa49   :  { %v2913_v63 = vpop.f32.mrf.mxu1  ;;  %v2696_v36 = vsel %vm507_vm7, %v5651_v34, -inf }
 0xa4a   :  { %v5654_v21 = vadd.f32 %v5602_v57, %v2913_v63  ;;  %2697 = vmax.xlane.f32.xlu1 %v2696_v36 }
 0xa4c   :  { %v2928_v13 = vsel %vm507_vm7, %v5654_v21, -inf }
 0xa4d   :  { %2929 = vmax.xlane.f32.xlu0 %v2928_v13 }
 0xa51   :  { %v2916_v22 = vpop.f32.mrf.mxu1 }
 0xa7f   :  { %v2463_v60 = vpop.xlane.xlu1 %2462 }
 0xa80   :  { %v2476_v55 = vsub.f32 %v5571_v37, %v2463_v60 }
 0xa82   :  { %v2481_v50 = vmul.f32 1.442695, %v2476_v55 }
 0xa84   :  { %4122 = vpow2.f32 %v2481_v50 }
 0xa85   :  { %v2231_v1 = vpop.xlane.xlu2 %2230 }
 0xa86   :  { %v2244_v39 = vsub.f32 %v5575_v0, %v2231_v1 }
 0xa88   :  { %v2466_v25 = vpop.xlane.xlu0 %2465  ;;  %v2249_v2 = vmul.f32 1.442695, %v2244_v39 }
 0xa89   :  { %v2477_v58 = vsub.f32 %v5580_v6, %v2466_v25 }
 0xa8a   :  { %v5663_v45 = vpop.eup %4122  ;;  %4124 = vpow2.f32 %v2249_v2 }
 0xa8b   :  { %v2483_v40 = vmul.f32 1.442695, %v2477_v58  ;;  %v2491_v59 = vsel %vm507_vm7, %v5663_v45, 0.0 }
 0xa8c   :  { %2492 = vadd.xlane.f32.xlu2 %v2491_v59 }
 0xa8d   :  { %4126 = vpow2.f32 %v2483_v40  ;;  %v2234_v27 = vpop.xlane.xlu1 %2233 }
 0xa8e   :  { %v2245_v37 = vsub.f32 %v5586_v12, %v2234_v27 }
 0xa90   :  { %v2469_v29 = vpop.xlane.xlu2 %2468  ;;  %v5668_v52 = vpop.eup %4124  ;;  %v2251_v0 = vmul.f32 1.442695, %v2245_v37 }
 0xa91   :  { %v2478_v8 = vsub.f32 %v5591_v20, %v2469_v29  ;;  %v2259_v6 = vsel %vm507_vm7, %v5668_v52, 0.0  ;;  %v2684_v20 = vpop.f32.mrf.mxu3 }
 0xa92   :  { %4128 = vpow2.f32 %v2251_v0  ;;  %2260 = vadd.xlane.f32.xlu1 %v2259_v6 }
 0xa93   :  { %v5673_v5 = vpop.eup %4126  ;;  %v2485_v24 = vmul.f32 1.442695, %v2478_v8 }
 0xa94   :  { %v2494_v42 = vsel %vm507_vm7, %v5673_v5, 0.0 }
 0xa95   :  { %4130 = vpow2.f32 %v2485_v24  ;;  %2495 = vadd.xlane.f32.xlu0 %v2494_v42  ;;  %v2237_v12 = vpop.xlane.xlu0 %2236 }
 0xa96   :  { %v2246_v46 = vsub.f32 %v5597_v31, %v2237_v12  ;;  %v5688_v31 = vadd.f32 %v5602_v57, %v2684_v20 }
 0xa98   :  { %v2472_v48 = vpop.xlane.xlu1 %2471  ;;  %v5678_v3 = vpop.eup %4128  ;;  %v2253_v53 = vmul.f32 1.442695, %v2246_v46  ;;  %v2699_v57 = vsel %vm507_vm7, %v5688_v31, -inf }
 0xa99   :  { %v2479_v33 = vsub.f32 %v5605_v54, %v2472_v48  ;;  %v2262_v43 = vsel %vm507_vm7, %v5678_v3, 0.0  ;;  %v5692_v54 = vadd.f32 %v5617_v9, %v2916_v22  ;;  %v2687_v14 = vpop.f32.mrf.mxu3 }
 0xa9a   :  { %4132 = vpow2.f32 %v2253_v53  ;;  %2263 = vadd.xlane.f32.xlu2 %v2262_v43  ;;  %v5704_v36 = vadd.f32 %v5617_v9, %v2687_v14 }
 0xa9b   :  { %v5683_v17 = vpop.eup %4130  ;;  %v2487_v11 = vmul.f32 1.442695, %v2479_v33 }
 0xa9c   :  { %v2497_v35 = vsel %vm507_vm7, %v5683_v17, 0.0  ;;  %v2702_v25 = vsel %vm520_vm8, %v5704_v36, -inf }
 0xa9d   :  { %2498 = vadd.xlane.f32.xlu1 %v2497_v35  ;;  %v2240_v62 = vpop.xlane.xlu2 %2239  ;;  %4134 = vpow2.f32 %v2487_v11 }
 0xa9e   :  { %v2247_v32 = vsub.f32 %v5612_v49, %v2240_v62  ;;  %v2931_v49 = vsel %vm520_vm8, %v5692_v54, -inf }
 0xaa0   :  { %v2475_v23 = vpop.xlane.xlu0 %2474  ;;  %v5694_v47 = vpop.eup %4132  ;;  %v2255_v15 = vmul.f32 1.442695, %v2247_v32 }
 0xaa1   :  { %v2480_v30 = vsub.f32 %v5620_v10, %v2475_v23  ;;  %v2265_v28 = vsel %vm507_vm7, %v5694_v47, 0.0 }
 0xaa2   :  { %4136 = vpow2.f32 %v2255_v15  ;;  %2266 = vadd.xlane.f32.xlu0 %v2265_v28  ;;  %2700 = vmax.xlane.f32.xlu2 %v2699_v57 }
 0xaa3   :  { %v2489_v63 = vmul.f32 1.442695, %v2480_v30  ;;  %v5706_v10 = vpop.eup %4134 }
 0xaa4   :  { %v2500_v2 = vsel %vm507_vm7, %v5706_v10, 0.0 }
 0xaa5   :  { %2932 = vmax.xlane.f32.xlu1 %v2931_v49  ;;  %v2243_v13 = vpop.xlane.xlu1 %2242  ;;  %4138 = vpow2.f32 %v2489_v63 }
 0xaa6   :  { %v2248_v60 = vsub.f32 %v5627_v7, %v2243_v13 }
 0xaa8   :  { %v2921_v55 = vpop.xlane.xlu2 %2920  ;;  %v5709_v50 = vpop.eup %4136  ;;  %v2257_v1 = vmul.f32 1.442695, %v2248_v60 }
 0xaa9   :  { %v2934_v39 = vsub.f32 %v5629_v18, %v2921_v55  ;;  %v2268_v7 = vsel %vm507_vm7, %v5709_v50, 0.0 }
 0xaaa   :  { %4140 = vpow2.f32 %v2257_v1  ;;  %2703 = vmax.xlane.f32.xlu0 %v2702_v25  ;;  %2501 = vadd.xlane.f32.xlu2 %v2500_v2 }
 0xaab   :  { %v2939_v9 = vmul.f32 1.442695, %v2934_v39  ;;  %v5718_v40 = vpop.eup %4138 }
 0xaac   :  { %v2503_v8 = vsel %vm520_vm8, %v5718_v40, 0.0 }
 0xaad   :  { %4142 = vpow2.f32 %v2939_v9  ;;  %2269 = vadd.xlane.f32.xlu1 %v2268_v7  ;;  %v2692_v58 = vpop.xlane.xlu0 %2691 }
 0xaae   :  { %v2705_v18 = vsub.f32 %v5635_v61, %v2692_v58 }
 0xab0   :  { %v2924_v59 = vpop.xlane.xlu1 %2923  ;;  %v5721_v27 = vpop.eup %4140  ;;  %v2710_v37 = vmul.f32 1.442695, %v2705_v18 }
 0xab1   :  { %v2935_v29 = vsub.f32 %v5637_v26, %v2924_v59  ;;  %v2271_v0 = vsel %vm520_vm8, %v5721_v27, 0.0 }
 0xab2   :  { %4144 = vpow2.f32 %v2710_v37  ;;  %2272 = vadd.xlane.f32.xlu0 %v2271_v0  ;;  %2504 = vadd.xlane.f32.xlu2 %v2503_v8 }
 0xab3   :  { %v5728_v6 = vpop.eup %4142  ;;  %v2941_v24 = vmul.f32 1.442695, %v2935_v29 }
 0xab4   :  { %v2949_v61 = vsel %vm507_vm7, %v5728_v6, 0.0 }
 0xab5   :  { %4146 = vpow2.f32 %v2941_v24  ;;  %2950 = vadd.xlane.f32.xlu1 %v2949_v61  ;;  %v2695_v42 = vpop.xlane.xlu0 %2694 }
 0xab6   :  { %v2706_v26 = vsub.f32 %v5643_v51, %v2695_v42 }
 0xab8   :  { %v2927_v12 = vpop.xlane.xlu2 %2926  ;;  %v5733_v46 = vpop.eup %4144  ;;  %v2712_v48 = vmul.f32 1.442695, %v2706_v26 }
 0xab9   :  { %v2936_v20 = vsub.f32 %v5645_v16, %v2927_v12  ;;  %v2720_v53 = vsel %vm507_vm7, %v5733_v46, 0.0 }
 0xaba   :  { %4148 = vpow2.f32 %v2712_v48  ;;  %2721 = vadd.xlane.f32.xlu2 %v2720_v53 }
 0xabb   :  { %v5738_v33 = vpop.eup %4146  ;;  %v2943_v43 = vmul.f32 1.442695, %v2936_v20 }
 0xabc   :  { %v2952_v35 = vsel %vm507_vm7, %v5738_v33, 0.0 }
 0xabd   :  { %4150 = vpow2.f32 %v2943_v43  ;;  %2953 = vadd.xlane.f32.xlu0 %v2952_v35  ;;  %v2698_v51 = vpop.xlane.xlu1 %2697 }
 0xabe   :  { %v2707_v22 = vsub.f32 %v5651_v34, %v2698_v51 }
 0xac0   :  { %v2930_v11 = vpop.xlane.xlu0 %2929  ;;  %v5743_v62 = vpop.eup %4148  ;;  %v2714_v16 = vmul.f32 1.442695, %v2707_v22 }
 0xac1   :  { %v2937_v32 = vsub.f32 %v5654_v21, %v2930_v11  ;;  %v2723_v23 = vsel %vm507_vm7, %v5743_v62, 0.0 }
 0xac2   :  { %4152 = vpow2.f32 %v2714_v16  ;;  %2724 = vadd.xlane.f32.xlu1 %v2723_v23 }
 0xac3   :  { %v5748_v15 = vpop.eup %4150  ;;  %v2945_v30 = vmul.f32 1.442695, %v2937_v32 }
 0xac4   :  { %v2955_v28 = vsel %vm507_vm7, %v5748_v15, 0.0 }
 0xac5   :  { %4154 = vpow2.f32 %v2945_v30  ;;  %2956 = vadd.xlane.f32.xlu2 %v2955_v28 }
 0xac8   :  { %v5752_v34 = vpop.eup %4152 }
 0xac9   :  { %v2726_v57 = vsel %vm507_vm7, %v5752_v34, 0.0 }
 0xaca   :  { %2727 = vadd.xlane.f32.xlu0 %v2726_v57 }
 0xacb   :  { %v5756_v14 = vpop.eup %4154 }
 0xacc   :  { %v2958_v21 = vsel %vm507_vm7, %v5756_v14, 0.0 }
 0xacd   :  { %2959 = vadd.xlane.f32.xlu1 %v2958_v21 }
 0xaff   :  { %v2493_v49 = vpop.xlane.xlu2 %2492 }
 0xb00   :  { %4156 = vrcp.f32 %v2493_v49  ;;  %v2517_v39 = vand.u32 2147483648, %v2493_v49  ;;  %v2515_v2 = vand.u32 2147483647, %v2493_v49  ;;  %vm2511_vm13 = vweird.f32 %v2493_v49 }
 0xb02   :  { %v2518_v37 = vor.u32 1.1754944e-38, %v2517_v39  ;;  %vm2516_vm15 = vcmp.eq.f32.partialorder %v2515_v2, 8.507059e+37 }
 0xb05   :  { %v2261_v63 = vpop.xlane.xlu1 %2260 }
 0xb06   :  { %v4157_v13 = vpop.eup %4156  ;;  %4158 = vrcp.f32 %v2261_v63  ;;  %v2283_v42 = vand.u32 2147483647, %v2261_v63  ;;  %v2285_v26 = vand.u32 2147483648, %v2261_v63  ;;  %vm2279_vm1 = vweird.f32 %v2261_v63 }
 0xb07   :  { %v2507_v60 = vmul.f32 %v4157_v13, %v2493_v49  ;;  %vm2512_vm9 = vweird.f32 %v4157_v13 }
 0xb08   :  { %v2496_v55 = vpop.xlane.xlu0 %2495  ;;  %vm2513_vm14 = vmor %vm2511_vm13, %vm2512_vm9  ;;  %vm2284_vm5 = vcmp.eq.f32.partialorder %v2283_v42, 8.507059e+37  ;;  %v2286_v11 = vor.u32 1.1754944e-38, %v2285_v26 }
 0xb09   :  { %4160 = vrcp.f32 %v2496_v55  ;;  %v2508_v1 = vsub.f32 1.0, %v2507_v60  ;;  %v2530_v35 = vand.u32 2147483647, %v2496_v55  ;;  %v2532_v51 = vand.u32 2147483648, %v2496_v55 }
 0xb0a   :  { %vm2526_vm11 = vweird.f32 %v2496_v55 }
 0xb0b   :  { %v2509_v25 = vmul.f32 %v4157_v13, %v2508_v1  ;;  %vm5775_vm12 = vcmp.eq.f32.partialorder %v2530_v35, 8.507059e+37  ;;  %v2533_v49 = vor.u32 1.1754944e-38, %v2532_v51 }
 0xb0c   :  { %v4159_v9 = vpop.eup %4158 }
 0xb0d   :  { %v2510_v7 = vadd.f32 %v4157_v13, %v2509_v25  ;;  %v2275_v58 = vmul.f32 %v4159_v9, %v2261_v63  ;;  %v5760_v18 = vpop.xlane.xlu2 %2263  ;;  %vm2280_vm0 = vweird.f32 %v4159_v9 }
 0xb0e   :  { %4162 = vrcp.f32 %v5760_v18  ;;  %vm2281_vm4 = vmor %vm2279_vm1, %vm2280_vm0  ;;  %vm2294_vm13 = vweird.f32 %v5760_v18  ;;  %v2300_v2 = vand.u32 2147483648, %v5760_v18 }
 0xb0f   :  { %v4161_v59 = vpop.eup %4160  ;;  %v2514_v29 = vsel %vm2513_vm14, %v4157_v13, %v2510_v7  ;;  %v2276_v0 = vsub.f32 1.0, %v2275_v58 }
 0xb10   :  { %v2522_v8 = vmul.f32 %v4161_v59, %v2496_v55  ;;  %v5763_v24 = vpop.xlane.xlu1 %2498  ;;  %v2519_v61 = vsel %vm2516_vm15, %v2518_v37, %v2514_v29  ;;  %vm2527_vm10 = vweird.f32 %v4161_v59  ;;  %v2301_v51 = vor.u32 1.1754944e-38, %v2300_v2 }
 0xb11   :  { %4164 = vrcp.f32 %v5763_v24  ;;  %v2520_v12 = vmul.f32 %v5663_v45, %v2519_v61  ;;  %v2277_v48 = vmul.f32 %v4159_v9, %v2276_v0  ;;  %vm2528_vm9 = vmor %vm2526_vm11, %vm2527_vm10  ;;  %vm2541_vm0 = vweird.f32 %v5763_v24 }
 0xb12   :  { %v2523_v20 = vsub.f32 1.0, %v2522_v8  ;;  %v2298_v8 = vand.u32 2147483647, %v5760_v18  ;;  %v2545_v42 = vand.u32 2147483647, %v5763_v24 }
 0xb13   :  { %v2278_v53 = vadd.f32 %v4159_v9, %v2277_v48  ;;  %3874 = vmatmul.msk.f32.vlgmr.msra.gmra.mxu2 %vm507_vm7, %v2520_v12 }
 0xb14   :  { %v2524_v43 = vmul.f32 %v4161_v59, %v2523_v20  ;;  %v5768_v22 = vpop.eup %4162  ;;  %vm2299_vm10 = vcmp.eq.f32.partialorder %v2298_v8, 8.507059e+37 }
 0xb15   :  { %v2282_v16 = vsel %vm2281_vm4, %v4159_v9, %v2278_v53  ;;  %v2290_v45 = vmul.f32 %v5768_v22, %v5760_v18  ;;  %v5772_v23 = vpop.xlane.xlu0 %2266  ;;  %v2701_v30 = vpop.xlane.xlu2 %2700  ;;  %vm2295_vm14 = vweird.f32 %v5768_v22 }
 0xb16   :  { %v2525_v32 = vadd.f32 %v4161_v59, %v2524_v43  ;;  %v2287_v57 = vsel %vm2284_vm5, %v2286_v11, %v2282_v16  ;;  %4166 = vrcp.f32 %v5772_v23  ;;  %v2708_v1 = vsub.f32 %v5688_v31, %v2701_v30  ;;  %vm5807_vm1 = vmor %vm2294_vm13, %vm2295_vm14 }
 0xb17   :  { %v4165_v28 = vpop.eup %4164  ;;  %v2291_v63 = vsub.f32 1.0, %v2290_v45  ;;  %v2288_v55 = vmul.f32 %v5668_v52, %v2287_v57  ;;  %vm2546_vm5 = vcmp.eq.f32.partialorder %v2545_v42, 8.507059e+37 }
 0xb18   :  { %v2537_v13 = vmul.f32 %v4165_v28, %v5763_v24  ;;  %v2933_v60 = vpop.xlane.xlu1 %2932  ;;  %v2529_v7 = vsel %vm2528_vm9, %v4161_v59, %v2525_v32  ;;  %v2716_v58 = vmul.f32 1.442695, %v2708_v1  ;;  %vm2542_vm15 = vweird.f32 %v4165_v28 }
 0xb19   :  { %v2938_v39 = vsub.f32 %v5692_v54, %v2933_v60  ;;  %v2292_v25 = vmul.f32 %v5768_v22, %v2291_v63  ;;  %3858 = vmatmul.msk.f32.vlgmr.msrb.gmra.mxu0 %vm507_vm7, %v2288_v55  ;;  %v2534_v29 = vsel %vm5775_vm12, %v2533_v49, %v2529_v7  ;;  %v2547_v59 = vand.u32 2147483648, %v5763_v24  ;;  %vm5812_vm4 = vmor %vm2541_vm0, %vm2542_vm15 }
 0xb1a   :  { %v2538_v9 = vsub.f32 1.0, %v2537_v13  ;;  %v2535_v54 = vmul.f32 %v5673_v5, %v2534_v29  ;;  %4168 = vpow2.f32 %v2716_v58  ;;  %vm2309_vm12 = vweird.f32 %v5772_v23 }
 0xb1b   :  { %v2947_v37 = vmul.f32 1.442695, %v2938_v39  ;;  %v2293_v52 = vadd.f32 %v5768_v22, %v2292_v25  ;;  %v2548_v11 = vor.u32 1.1754944e-38, %v2547_v59  ;;  %v2313_v25 = vand.u32 2147483647, %v5772_v23 }
 0xb1c   :  { %v2539_v31 = vmul.f32 %v4165_v28, %v2538_v9  ;;  %v5792_v0 = vpop.eup %4166  ;;  %3875 = vmatmul.msk.f32.gmra.mxu2 %vm507_vm7, %v2535_v54 }
 0xb1d   :  { %v2305_v26 = vmul.f32 %v5792_v0, %v5772_v23  ;;  %4170 = vpow2.f32 %v2947_v37  ;;  %v2704_v5 = vpop.xlane.xlu0 %2703  ;;  %v5801_v12 = vpop.xlane.xlu2 %2501  ;;  %v2297_v18 = vsel %vm5807_vm1, %v5768_v22, %v2293_v52  ;;  %vm2310_vm11 = vweird.f32 %v5792_v0 }
 0xb1e   :  { %v2540_v61 = vadd.f32 %v4165_v28, %v2539_v31  ;;  %v2709_v20 = vsub.f32 %v5704_v36, %v2704_v5  ;;  %4172 = vrcp.f32 %v5801_v12  ;;  %v2302_v45 = vsel %vm2299_vm10, %v2301_v51, %v2297_v18  ;;  %vm5854_vm9 = vmor %vm2309_vm12, %vm2310_vm11 }
 0xb1f   :  { %v2306_v53 = vsub.f32 1.0, %v2305_v26  ;;  %v2315_v22 = vand.u32 2147483648, %v5772_v23  ;;  %v2560_v58 = vand.u32 2147483647, %v5801_v12  ;;  %vm2314_vm14 = vcmp.eq.f32.partialorder %v2313_v25, 8.507059e+37 }
 0xb20   :  { %v5818_v43 = vpop.xlane.xlu1 %2269  ;;  %v2544_v35 = vsel %vm5812_vm4, %v4165_v28, %v2540_v61  ;;  %v2718_v16 = vmul.f32 1.442695, %v2709_v20  ;;  %v5827_v32 = vpop.eup %4168  ;;  %v2303_v28 = vmul.f32 %v5678_v3, %v2302_v45  ;;  %v2562_v52 = vand.u32 2147483648, %v5801_v12 }
 0xb21   :  { %4174 = vrcp.f32 %v5818_v43  ;;  %v2307_v36 = vmul.f32 %v5792_v0, %v2306_v53  ;;  %v2549_v30 = vsel %vm2546_vm5, %v2548_v11, %v2544_v35  ;;  %v2729_v63 = vsel %vm507_vm7, %v5827_v32, 0.0 }
 0xb22   :  { %4176 = vpow2.f32 %v2718_v16  ;;  %v2550_v13 = vmul.f32 %v5683_v17, %v2549_v30  ;;  %3859 = vmatmul.msk.f32.gmra.mxu0 %vm507_vm7, %v2303_v28  ;;  %2730 = vadd.xlane.f32.xlu2 %v2729_v63  ;;  %v2316_v23 = vor.u32 1.1754944e-38, %v2315_v22  ;;  %vm2556_vm15 = vweird.f32 %v5801_v12 }
 0xb23   :  { %v5829_v57 = vpop.eup %4170  ;;  %v2308_v49 = vadd.f32 %v5792_v0, %v2307_v36  ;;  %vm5884_vm1 = vcmp.eq.f32.partialorder %v2560_v58, 8.507059e+37  ;;  %v2563_v18 = vor.u32 1.1754944e-38, %v2562_v52  ;;  %v2330_v16 = vand.u32 2147483648, %v5818_v43 }
 0xb24   :  { %v4173_v21 = vpop.eup %4172  ;;  %v2961_v60 = vsel %vm520_vm8, %v5829_v57, 0.0  ;;  %3876 = vmatmul.msk.f32.gmra.mxu2 %vm507_vm7, %v2550_v13  ;;  %vm2324_vm4 = vweird.f32 %v5818_v43 }
 0xb25   :  { %v2552_v1 = vmul.f32 %v4173_v21, %v5801_v12  ;;  %v5842_v39 = vpop.xlane.xlu0 %2272  ;;  %v5844_v55 = vpop.xlane.xlu2 %2504  ;;  %2962 = vadd.xlane.f32.xlu0 %v2961_v60  ;;  %v2312_v37 = vsel %vm5854_vm9, %v5792_v0, %v2308_v49  ;;  %vm2557_vm13 = vweird.f32 %v4173_v21  ;;  %v2331_v63 = vor.u32 1.1754944e-38, %v2330_v16 }
 0xb26   :  { %4178 = vrcp.f32 %v5842_v39  ;;  %v2317_v61 = vsel %vm2314_vm14, %v2316_v23, %v2312_v37  ;;  %vm5875_vm0 = vmor %vm2556_vm15, %vm2557_vm13  ;;  %vm2339_vm11 = vweird.f32 %v5842_v39  ;;  %v2575_v37 = vand.u32 2147483647, %v5844_v55 }
 0xb27   :  { %v5846_v3 = vpop.eup %4174  ;;  %v2553_v2 = vsub.f32 1.0, %v2552_v1  ;;  %4180 = vrcp.f32 %v5844_v55  ;;  %v2318_v26 = vmul.f32 %v5694_v47, %v2317_v61  ;;  %v2328_v47 = vand.u32 2147483647, %v5818_v43 }
 0xb28   :  { %v2320_v9 = vmul.f32 %v5846_v3, %v5818_v43  ;;  %v5861_v7 = vpop.xlane.xlu1 %2950  ;;  %v5867_v29 = vpop.eup %4176  ;;  %vm2571_vm15 = vweird.f32 %v5844_v55 }
 0xb29   :  { %v2554_v31 = vmul.f32 %v4173_v21, %v2553_v2  ;;  %4182 = vrcp.f32 %v5861_v7  ;;  %v2732_v5 = vsel %vm520_vm8, %v5867_v29, 0.0  ;;  %vm2325_vm8 = vweird.f32 %v5846_v3 }
 0xb2a   :  { %v2321_v54 = vsub.f32 1.0, %v2320_v9  ;;  %2733 = vadd.xlane.f32.xlu1 %v2732_v5  ;;  %3860 = vmatmul.msk.f32.gmra.mxu0 %vm507_vm7, %v2318_v26  ;;  %vm5913_vm5 = vmor %vm2324_vm4, %vm2325_vm8  ;;  %vm2329_vm10 = vcmp.eq.f32.partialorder %v2328_v47, 8.507059e+37  ;;  %v2343_v2 = vand.u32 2147483647, %v5842_v39  ;;  %v2345_v9 = vand.u32 2147483648, %v5842_v39 }
 0xb2b   :  { %v2555_v59 = vadd.f32 %v4173_v21, %v2554_v31  ;;  %v2577_v31 = vand.u32 2147483648, %v5844_v55  ;;  %vm2969_vm8 = vweird.f32 %v5861_v7  ;;  %v2975_v16 = vand.u32 2147483648, %v5861_v7 }
 0xb2c   :  { %v2322_v8 = vmul.f32 %v5846_v3, %v2321_v54  ;;  %v5873_v42 = vpop.eup %4178  ;;  %vm2344_vm14 = vcmp.eq.f32.partialorder %v2343_v2, 8.507059e+37  ;;  %v2346_v26 = vor.u32 1.1754944e-38, %v2345_v9 }
 0xb2d   :  { %v5882_v48 = vpop.eup %4180  ;;  %v2335_v12 = vmul.f32 %v5873_v42, %v5842_v39  ;;  %v5890_v20 = vpop.xlane.xlu2 %2721  ;;  %v2559_v53 = vsel %vm5875_vm0, %v4173_v21, %v2555_v59  ;;  %vm2340_vm12 = vweird.f32 %v5873_v42  ;;  %v2578_v24 = vor.u32 1.1754944e-38, %v2577_v31 }
 0xb2e   :  { %v2567_v35 = vmul.f32 %v5882_v48, %v5844_v55  ;;  %4184 = vrcp.f32 %v5890_v20  ;;  %v2323_v11 = vadd.f32 %v5846_v3, %v2322_v8  ;;  %v2564_v28 = vsel %vm5884_vm1, %v2563_v18, %v2559_v53  ;;  %vm5940_vm9 = vmor %vm2339_vm11, %vm2340_vm12 }
 0xb2f   :  { %v5899_v51 = vpop.eup %4182  ;;  %v2336_v36 = vsub.f32 1.0, %v2335_v12  ;;  %v2565_v60 = vmul.f32 %v5706_v10, %v2564_v28  ;;  %vm2572_vm13 = vweird.f32 %v5882_v48  ;;  %vm2576_vm1 = vcmp.eq.f32.partialorder %v2575_v37, 8.507059e+37 }
 0xb30   :  { %v5904_v45 = vpop.xlane.xlu0 %2953  ;;  %v2568_v30 = vsub.f32 1.0, %v2567_v35  ;;  %v2965_v22 = vmul.f32 %v5899_v51, %v5861_v7  ;;  %v2327_v1 = vsel %vm5913_vm5, %v5846_v3, %v2323_v11  ;;  %vm2573_vm0 = vmor %vm2571_vm15, %vm2572_vm13  ;;  %v2973_v12 = vand.u32 2147483647, %v5861_v7 }
 0xb31   :  { %4186 = vrcp.f32 %v5904_v45  ;;  %v2337_v21 = vmul.f32 %v5873_v42, %v2336_v36  ;;  %3877 = vmatmul.msk.f32.gmra.mxu2 %vm507_vm7, %v2565_v60  ;;  %v2332_v23 = vsel %vm2329_vm10, %v2331_v63, %v2327_v1  ;;  %vm2970_vm4 = vweird.f32 %v5899_v51 }
 0xb32   :  { %v2569_v13 = vmul.f32 %v5882_v48, %v2568_v30  ;;  %v2966_v17 = vsub.f32 1.0, %v2965_v22  ;;  %v2333_v54 = vmul.f32 %v5709_v50, %v2332_v23  ;;  %vm2740_vm10 = vweird.f32 %v5890_v20  ;;  %vm5980_vm11 = vmor %vm2969_vm8, %vm2970_vm4 }
 0xb33   :  { %v2338_v43 = vadd.f32 %v5873_v42, %v2337_v21  ;;  %v2746_v36 = vand.u32 2147483648, %v5890_v20  ;;  %v2744_v21 = vand.u32 2147483647, %v5890_v20  ;;  %vm2984_vm15 = vweird.f32 %v5904_v45 }
 0xb34   :  { %v5922_v25 = vpop.eup %4184  ;;  %v2570_v52 = vadd.f32 %v5882_v48, %v2569_v13  ;;  %v2967_v0 = vmul.f32 %v5899_v51, %v2966_v17  ;;  %3861 = vmatmul.msk.f32.gmra.mxu0 %vm507_vm7, %v2333_v54  ;;  %v2988_v31 = vand.u32 2147483647, %v5904_v45  ;;  %v2990_v54 = vand.u32 2147483648, %v5904_v45 }
 0xb35   :  { %v2736_v10 = vmul.f32 %v5922_v25, %v5890_v20  ;;  %v5932_v3 = vpop.xlane.xlu1 %2724  ;;  %v2342_v50 = vsel %vm5940_vm9, %v5873_v42, %v2338_v43  ;;  %vm2741_vm5 = vweird.f32 %v5922_v25  ;;  %v2976_v20 = vor.u32 1.1754944e-38, %v2975_v16 }
 0xb36   :  { %4188 = vrcp.f32 %v5932_v3  ;;  %v2574_v18 = vsel %vm2573_vm0, %v5882_v48, %v2570_v52  ;;  %v2347_v47 = vsel %vm2344_vm14, %v2346_v26, %v2342_v50  ;;  %v2968_v35 = vadd.f32 %v5899_v51, %v2967_v0  ;;  %vm5988_vm12 = vmor %vm2740_vm10, %vm2741_vm5 }
 0xb37   :  { %v5934_v58 = vpop.eup %4186  ;;  %v2737_v59 = vsub.f32 1.0, %v2736_v10  ;;  %v2579_v11 = vsel %vm2576_vm1, %v2578_v24, %v2574_v18  ;;  %v2348_v63 = vmul.f32 %v5721_v27, %v2347_v47  ;;  %v2747_v17 = vor.u32 1.1754944e-38, %v2746_v36 }
 0xb38   :  { %v2980_v8 = vmul.f32 %v5934_v58, %v5904_v45  ;;  %v5948_v61 = vpop.xlane.xlu2 %2956  ;;  %v2580_v49 = vmul.f32 %v5718_v40, %v2579_v11  ;;  %v2972_v43 = vsel %vm5980_vm11, %v5899_v51, %v2968_v35  ;;  %vm2974_vm9 = vcmp.eq.f32.partialorder %v2973_v12, 8.507059e+37 }
 0xb39   :  { %4190 = vrcp.f32 %v5948_v61  ;;  %v2738_v5 = vmul.f32 %v5922_v25, %v2737_v59  ;;  %vm2745_vm13 = vcmp.eq.f32.partialorder %v2744_v21, 8.507059e+37  ;;  %v2977_v51 = vsel %vm2974_vm9, %v2976_v20, %v2972_v43 }
 0xb3a   :  { %v2981_v53 = vsub.f32 1.0, %v2980_v8  ;;  %3878 = vmatmul.msk.f32.gmra.mxu2 %vm507_vm7, %v2580_v49  ;;  %vm2985_vm14 = vweird.f32 %v5934_v58  ;;  %v2761_v39 = vand.u32 2147483648, %v5932_v3  ;;  %v2978_v8 = vmul.f32 %v5728_v6, %v2977_v51 }
 0xb3b   :  { %v2739_v55 = vadd.f32 %v5922_v25, %v2738_v5  ;;  %vm6018_vm1 = vmor %vm2984_vm15, %vm2985_vm14  ;;  %vm2755_vm8 = vweird.f32 %v5932_v3  ;;  %v2759_v26 = vand.u32 2147483647, %v5932_v3  ;;  %v2991_v12 = vor.u32 1.1754944e-38, %v2990_v54 }
 0xb3c   :  { %v5962_v42 = vpop.eup %4188  ;;  %v2982_v60 = vmul.f32 %v5934_v58, %v2981_v53  ;;  %3862 = vmatmul.msk.f32.gmra.mxu0 %vm507_vm7, %v2348_v63  ;;  %v2762_v53 = vor.u32 1.1754944e-38, %v2761_v39  ;;  %vm2989_vm5 = vcmp.eq.f32.partialorder %v2988_v31, 8.507059e+37  ;;  %vm2999_vm9 = vweird.f32 %v5948_v61 }
 0xb3d   :  { %v2751_v30 = vmul.f32 %v5962_v42, %v5932_v3  ;;  %v5972_v48 = vpop.xlane.xlu0 %2727  ;;  %v2743_v40 = vsel %vm5988_vm12, %v5922_v25, %v2739_v55  ;;  %vm2756_vm0 = vweird.f32 %v5962_v42  ;;  %vm2760_vm10 = vcmp.eq.f32.partialorder %v2759_v26, 8.507059e+37 }
 0xb3e   :  { %4192 = vrcp.f32 %v5972_v48  ;;  %v2748_v9 = vsel %vm2745_vm13, %v2747_v17, %v2743_v40  ;;  %v2983_v10 = vadd.f32 %v5934_v58, %v2982_v60  ;;  %vm6024_vm4 = vmor %vm2755_vm8, %vm2756_vm0  ;;  %v3003_v16 = vand.u32 2147483647, %v5948_v61 }
 0xb3f   :  { %v5974_v22 = vpop.eup %4190  ;;  %v2752_v1 = vsub.f32 1.0, %v2751_v30  ;;  %v2749_v0 = vmul.f32 %v5733_v46, %v2748_v9  ;;  %v2776_v36 = vand.u32 2147483648, %v5972_v48  ;;  %vm2770_vm14 = vweird.f32 %v5972_v48 }
 0xb40   :  { %v5993_v7 = vpop.xlane.xlu1 %2959  ;;  %v2995_v27 = vmul.f32 %v5974_v22, %v5948_v61  ;;  %v2987_v24 = vsel %vm6018_vm1, %v5934_v58, %v2983_v10  ;;  %vm3000_vm11 = vweird.f32 %v5974_v22  ;;  %v2774_v28 = vand.u32 2147483647, %v5972_v48 }
 0xb41   :  { %4194 = vrcp.f32 %v5993_v7  ;;  %v2753_v2 = vmul.f32 %v5962_v42, %v2752_v1  ;;  %v2992_v58 = vsel %vm2989_vm5, %v2991_v12, %v2987_v24  ;;  %vm6044_vm13 = vmor %vm2999_vm9, %vm3000_vm11  ;;  %v2777_v1 = vor.u32 1.1754944e-38, %v2776_v36  ;;  %v3913_v36 = vld [vmem:[%s6387_s14 + $0x30] sm:$0xff] }
 0xb42   :  { %v2996_v37 = vsub.f32 1.0, %v2995_v27  ;;  %3906 = vmatmul.msk.f32.vlgmr.msrb.gmra.mxu2 %vm507_vm7, %v2978_v8  ;;  %v2993_v21 = vmul.f32 %v5738_v33, %v2992_v58  ;;  %vm3004_vm0 = vcmp.eq.f32.partialorder %v3003_v16, 8.507059e+37  ;;  %vm2775_vm1 = vcmp.eq.f32.partialorder %v2774_v28, 8.507059e+37 }
 0xb43   :  { %v2754_v23 = vadd.f32 %v5962_v42, %v2753_v2  ;;  %v3018_v40 = vand.u32 2147483647, %v5993_v7 }
 0xb44   :  { %v4193_v25 = vpop.eup %4192  ;;  %v2997_v6 = vmul.f32 %v5974_v22, %v2996_v37  ;;  %3890 = vmatmul.msk.f32.vlgmr.msra.gmra.mxu0 %vm507_vm7, %v2749_v0 }
 0xb45   :  { %v2766_v52 = vmul.f32 %v4193_v25, %v5972_v48  ;;  %v2758_v3 = vsel %vm6024_vm4, %v5962_v42, %v2754_v23  ;;  %vm2771_vm12 = vweird.f32 %v4193_v25  ;;  %v3005_v42 = vand.u32 2147483648, %v5948_v61 }
 0xb46   :  { %v2763_v47 = vsel %vm2760_vm10, %v2762_v53, %v2758_v3  ;;  %v2998_v35 = vadd.f32 %v5974_v22, %v2997_v6  ;;  %vm2772_vm15 = vmor %vm2770_vm14, %vm2771_vm12  ;;  %vm3014_vm4 = vweird.f32 %v5993_v7  ;;  %vm3019_vm10 = vcmp.eq.f32.partialorder %v3018_v40, 8.507059e+37  ;;  %v4248_v40 = vld [vmem:[%s6429_s9 + $0x1] ss:$0 sm:$0xff] }
 0xb47   :  { %v4195_v59 = vpop.eup %4194  ;;  %v2767_v45 = vsub.f32 1.0, %v2766_v52  ;;  %v2764_v49 = vmul.f32 %v5743_v62, %v2763_v47  ;;  %v3006_v60 = vor.u32 1.1754944e-38, %v3005_v42  ;;  %v3020_v62 = vand.u32 2147483648, %v5993_v7 }
 0xb48   :  { %v3010_v46 = vmul.f32 %v4195_v59, %v5993_v7  ;;  %v3002_v61 = vsel %vm6044_vm13, %v5974_v22, %v2998_v35  ;;  %vm3015_vm8 = vweird.f32 %v4195_v59 }
 0xb49   :  { %v2768_v18 = vmul.f32 %v4193_v25, %v2767_v45  ;;  %v3007_v48 = vsel %vm3004_vm0, %v3006_v60, %v3002_v61  ;;  %vm3016_vm5 = vmor %vm3014_vm4, %vm3015_vm8  ;;  %v3021_v17 = vor.u32 1.1754944e-38, %v3020_v62 }
 0xb4a   :  { %v3011_v11 = vsub.f32 1.0, %v3010_v46  ;;  %3907 = vmatmul.msk.f32.gmra.mxu2 %vm507_vm7, %v2993_v21  ;;  %v3008_v27 = vmul.f32 %v5748_v15, %v3007_v48 }
 0xb4b   :  { %v2769_v55 = vadd.f32 %v4193_v25, %v2768_v18  ;;  %v3914_v18 = vld [vmem:[%s6387_s14 + $0x38] sm:$0xff] }
 0xb4c   :  { %v3012_v63 = vmul.f32 %v4195_v59, %v3011_v11  ;;  %3891 = vmatmul.msk.f32.gmra.mxu0 %vm507_vm7, %v2764_v49  ;;  %3128 = vmatpush.msra.mxu3 %v3914_v18 }
 0xb4d   :  { %v2773_v13 = vsel %vm2772_vm15, %v4193_v25, %v2769_v55 }
 0xb4e   :  { %v2778_v43 = vsel %vm2775_vm1, %v2777_v1, %v2773_v13  ;;  %v3013_v33 = vadd.f32 %v4195_v59, %v3012_v63  ;;  %3129 = vmatpush.msra.mxu3 %v3913_v36  ;;  %v3911_v63 = vld [vmem:[%s6387_s14 + $0x20] sm:$0xff] }
 0xb4f   :  { %v2779_v20 = vmul.f32 %v5752_v34, %v2778_v43 }
 0xb50   :  { %v3017_v22 = vsel %vm3016_vm5, %v4195_v59, %v3013_v33  ;;  %v4247_v33 = vld [vmem:[%s6429_s9] ss:$0 sm:$0xff] }
 0xb51   :  { %v3022_v2 = vsel %vm3019_vm10, %v3021_v17, %v3017_v22 }
 0xb52   :  { %3908 = vmatmul.msk.f32.gmra.mxu2 %vm507_vm7, %v3008_v27  ;;  %v3023_v51 = vmul.f32 %v5756_v14, %v3022_v2 }
 0xb54   :  { %3892 = vmatmul.msk.f32.gmra.mxu0 %vm507_vm7, %v2779_v20 }
 0xb5a   :  { %3909 = vmatmul.msk.f32.gmra.mxu2 %vm507_vm7, %v3023_v51 }
 0xb95   :  { %v2731_v9 = vpop.xlane.xlu2 %2730 }
 0xb96   :  { %4196 = vrcp.f32 %v2731_v9  ;;  %v6066_v7 = vpop.f32.mrf.mxu0  ;;  %v6068_v34 = vpop.f32.mrf.mxu2  ;;  %v2791_v39 = vand.u32 2147483648, %v2731_v9  ;;  %v2789_v8 = vand.u32 2147483647, %v2731_v9  ;;  %vm2785_vm9 = vweird.f32 %v2731_v9 }
 0xb98   :  { %v2963_v15 = vpop.xlane.xlu0 %2962  ;;  %v2792_v6 = vor.u32 1.1754944e-38, %v2791_v39  ;;  %vm2790_vm15 = vcmp.eq.f32.partialorder %v2789_v8, 8.507059e+37  ;;  %v4250_v39 = vld [vmem:[%s6429_s9 + $0x3] ss:$0 sm:$0xff] }
 0xb99   :  { %4198 = vrcp.f32 %v2963_v15  ;;  %v3035_v0 = vand.u32 2147483648, %v2963_v15  ;;  %v3033_v26 = vand.u32 2147483647, %v2963_v15  ;;  %vm3029_vm14 = vweird.f32 %v2963_v15 }
 0xb9b   :  { %v3036_v3 = vor.u32 1.1754944e-38, %v3035_v0  ;;  %vm3034_vm1 = vcmp.eq.f32.partialorder %v3033_v26, 8.507059e+37 }
 0xb9c   :  { %v4197_v10 = vpop.eup %4196 }
 0xb9d   :  { %v2781_v23 = vmul.f32 %v4197_v10, %v2731_v9  ;;  %v2734_v37 = vpop.xlane.xlu1 %2733  ;;  %vm2786_vm11 = vweird.f32 %v4197_v10  ;;  %v2399_v9 = vmul.f32 %v4247_v33, %v6066_v7 }
 0xb9e   :  { %4200 = vrcp.f32 %v2734_v37  ;;  %vm2787_vm13 = vmor %vm2785_vm9, %vm2786_vm11  ;;  %v2806_v16 = vand.u32 2147483648, %v2734_v37  ;;  %v2804_v28 = vand.u32 2147483647, %v2734_v37  ;;  %vm2800_vm4 = vweird.f32 %v2734_v37 }
 0xb9f   :  { %v4199_v25 = vpop.eup %4198  ;;  %v2782_v54 = vsub.f32 1.0, %v2781_v23  ;;  %v6070_v14 = vpop.f32.mrf.mxu0 }
 0xba0   :  { %v3025_v31 = vmul.f32 %v4199_v25, %v2963_v15  ;;  %vm3030_vm12 = vweird.f32 %v4199_v25  ;;  %v6072_v45 = vpop.f32.mrf.mxu2  ;;  %vm2805_vm10 = vcmp.eq.f32.partialorder %v2804_v28, 8.507059e+37  ;;  %v2628_v15 = vmul.f32 %v4248_v40, %v6068_v34 }
 0xba1   :  { %v2783_v59 = vmul.f32 %v4197_v10, %v2782_v54  ;;  %vm3031_vm0 = vmor %vm3029_vm14, %vm3030_vm12  ;;  %v2400_v8 = vmul.f32 %v4247_v33, %v6070_v14  ;;  %v2629_v7 = vmul.f32 %v4248_v40, %v6072_v45 }
 0xba2   :  { %v3026_v52 = vsub.f32 1.0, %v3025_v31 }
 0xba3   :  { %v2784_v5 = vadd.f32 %v4197_v10, %v2783_v59 }
 0xba4   :  { %v3027_v50 = vmul.f32 %v4199_v25, %v3026_v52  ;;  %v4201_v24 = vpop.eup %4200 }
 0xba5   :  { %v2796_v12 = vmul.f32 %v4201_v24, %v2734_v37  ;;  %v2788_v53 = vsel %vm2787_vm13, %v4197_v10, %v2784_v5  ;;  %vm2801_vm8 = vweird.f32 %v4201_v24  ;;  %v2633_v37 = vadd.f32 %v2628_v15, %v2399_v9 }
 0xba6   :  { %v3028_v46 = vadd.f32 %v4199_v25, %v3027_v50  ;;  %v2793_v58 = vsel %vm2790_vm15, %v2792_v6, %v2788_v53  ;;  %vm2802_vm5 = vmor %vm2800_vm4, %vm2801_vm8  ;;  %v2634_v50 = vadd.f32 %v2629_v7, %v2400_v8 }
 0xba7   :  { %v2797_v35 = vsub.f32 1.0, %v2796_v12  ;;  %v2794_v55 = vmul.f32 %v5827_v32, %v2793_v58  ;;  %v2390_v21 = vpop.f32.mrf.mxu0  ;;  %v3912_v32 = vld [vmem:[%s6387_s14 + $0x28] sm:$0xff] }
 0xba8   :  { %v3032_v47 = vsel %vm3031_vm0, %v4199_v25, %v3028_v46  ;;  %3130 = vmatpush.msra.mxu3 %v3912_v32  ;;  %v2619_v61 = vpop.f32.mrf.mxu2  ;;  %v4249_v25 = vld [vmem:[%s6429_s9 + $0x2] ss:$0 sm:$0xff]  ;;  %v2401_v46 = vmul.f32 %v4247_v33, %v2390_v21 }
 0xba9   :  { %v3037_v11 = vsel %vm3034_vm1, %v3036_v3, %v3032_v47  ;;  %v2798_v30 = vmul.f32 %v4201_v24, %v2797_v35  ;;  %3893 = vmatmul.msk.f32.gmra.mxu0 %vm507_vm7, %v2794_v55  ;;  %v2630_v3 = vmul.f32 %v4248_v40, %v2619_v61 }
 0xbaa   :  { %v3038_v42 = vmul.f32 %v5829_v57, %v3037_v11  ;;  %v2807_v57 = vor.u32 1.1754944e-38, %v2806_v16  ;;  %3131 = vmatpush.msra.mxu3 %v3911_v63  ;;  %v3982_v63 = vld [vmem:[%s6388_s15 + $0x1] ss:$0 sm:$0xff]  ;;  %s6469_s15 = sld [smem:[#allocation10_spill]] }
 0xbab   :  { %v2799_v49 = vadd.f32 %v4201_v24, %v2798_v30  ;;  %v2635_v18 = vadd.f32 %v2630_v3, %v2401_v46 }
 0xbac   :  { %3910 = vmatmul.msk.f32.gmra.mxu2 %vm507_vm7, %v3038_v42 }
 0xbad   :  { %v2803_v13 = vsel %vm2802_vm5, %v4201_v24, %v2799_v49 }
 0xbae   :  { %v2808_v60 = vsel %vm2805_vm10, %v2807_v57, %v2803_v13 }
 0xbaf   :  { %v2809_v1 = vmul.f32 %v5867_v29, %v2808_v60 }
 0xbb1   :  { %3894 = vmatmul.msk.f32.gmra.mxu0 %vm507_vm7, %v2809_v1  ;;  %v2393_v48 = vpop.f32.mrf.mxu0 }
 0xbb2   :  { %v2402_v62 = vmul.f32 %v4247_v33, %v2393_v48 }
 0xbb4   :  { %v2622_v43 = vpop.f32.mrf.mxu2 }
 0xbb5   :  { %v2631_v27 = vmul.f32 %v4248_v40, %v2622_v43 }
 0xbb7   :  { %v2636_v20 = vadd.f32 %v2631_v27, %v2402_v62 }
 0xbb9   :  { %v2396_v22 = vpop.f32.mrf.mxu0 }
 0xbba   :  { %v2403_v2 = vmul.f32 %v4247_v33, %v2396_v22 }
 0xbbd   :  { %v2625_v17 = vpop.f32.mrf.mxu2 }
 0xbbe   :  { %v2632_v51 = vmul.f32 %v4248_v40, %v2625_v17 }
 0xbc0   :  { %v2637_v10 = vadd.f32 %v2632_v51, %v2403_v2 }
 0xbc1   :  { %v2842_v29 = vpop.f32.mrf.mxu0 }
 0xbc2   :  { %v2857_v23 = vmul.f32 %v4249_v25, %v2842_v29 }
 0xbc4   :  { %v2862_v54 = vadd.f32 %v2857_v23, %v2633_v37 }
 0xbc5   :  { %v3071_v31 = vpop.f32.mrf.mxu2 }
 0xbc6   :  { %v3086_v52 = vmul.f32 %v4250_v39, %v3071_v31 }
 0xbc8   :  { %v3091_v34 = vadd.f32 %v3086_v52, %v2862_v54 }
 0xbc9   :  { %v2845_v59 = vpop.f32.mrf.mxu0 }
 0xbca   :  { %v2858_v0 = vmul.f32 %v4249_v25, %v2845_v59  ;;  %3915 = vmatmul.msk.f32.vlgmr.msra.gmra.mxu3 %vm167_vm2, %v3091_v34 }
 0xbcc   :  { %v2863_v5 = vadd.f32 %v2858_v0, %v2634_v50 }
 0xbcd   :  { %v3074_v26 = vpop.f32.mrf.mxu2 }
 0xbce   :  { %v3087_v24 = vmul.f32 %v4250_v39, %v3074_v26 }
 0xbd0   :  { %v3092_v12 = vadd.f32 %v3087_v24, %v2863_v5 }
 0xbd1   :  { %v2848_v6 = vpop.f32.mrf.mxu0 }
 0xbd2   :  { %v2859_v53 = vmul.f32 %v4249_v25, %v2848_v6  ;;  %3916 = vmatmul.msk.f32.gmra.mxu3 %vm167_vm2, %v3092_v12 }
 0xbd4   :  { %v2864_v14 = vadd.f32 %v2859_v53, %v2635_v18  ;;  %v3926_v18 = vld [vmem:[%s6391_s18 + $0x38] sm:$0xff] }
 0xbd5   :  { %v3077_v58 = vpop.f32.mrf.mxu2  ;;  %3330 = vmatpush.msrb.mxu0 %v3926_v18 }
 0xbd6   :  { %v3088_v47 = vmul.f32 %v4250_v39, %v3077_v58  ;;  %v3925_v58 = vld [vmem:[%s6391_s18 + $0x30] sm:$0xff] }
 0xbd7   :  { %3331 = vmatpush.msrb.mxu0 %v3925_v58 }
 0xbd8   :  { %v3093_v45 = vadd.f32 %v3088_v47, %v2864_v14  ;;  %v3924_v14 = vld [vmem:[%s6391_s18 + $0x28] sm:$0xff]  ;;  %v3923_v47 = vld [vmem:[%s6391_s18 + $0x20] sm:$0xff] }
 0xbd9   :  { %3332 = vmatpush.msrb.mxu0 %v3924_v14 }
 0xbda   :  { %3917 = vmatmul.msk.f32.gmra.mxu3 %vm167_vm2, %v3093_v45 }
 0xbdb   :  { %3333 = vmatpush.msrb.mxu0 %v3923_v47 }
 0xbdd   :  { %v3080_v35 = vpop.f32.mrf.mxu2 }
 0xbde   :  { %v3089_v16 = vmul.f32 %v4250_v39, %v3080_v35 }
 0xc26   :  { %v2851_v55 = vpop.f32.mrf.mxu0 }
 0xc27   :  { %v2860_v11 = vmul.f32 %v4249_v25, %v2851_v55 }
 0xc29   :  { %v2865_v42 = vadd.f32 %v2860_v11, %v2636_v20 }
 0xc2b   :  { %v3094_v36 = vadd.f32 %v3089_v16, %v2865_v42 }
 0xc2d   :  { %3918 = vmatmul.msk.f32.gmra.mxu3 %vm167_vm2, %v3094_v36 }
 0xc2e   :  { %v2854_v30 = vpop.f32.mrf.mxu0 }
 0xc2f   :  { %v3083_v28 = vpop.f32.mrf.mxu2  ;;  %v2861_v21 = vmul.f32 %v4249_v25, %v2854_v30 }
 0xc30   :  { %v3090_v49 = vmul.f32 %v4250_v39, %v3083_v28 }
 0xc31   :  { %v2866_v32 = vadd.f32 %v2861_v21, %v2637_v10 }
 0xc33   :  { %v3095_v57 = vadd.f32 %v3090_v49, %v2866_v32 }
 0xc35   :  { %3919 = vmatmul.msk.f32.gmra.mxu3 %vm167_vm2, %v3095_v57 }
 0xc4d   :  { %v3133_v61 = vpop.f32.mrf.mxu3 }
 0xc4e   :  { %v3148_v13 = vadd.f32 %v3133_v61, %v5363_v44 }
 0xc50   :  { %v6117_v60 = vadd.f32 %v3982_v63, %v3148_v13 }
 0xc52   :  { %v3167_v1 = vsel %vm167_vm2, %v6117_v60, 0.0 }
 0xc53   :  { %3168 = vadd.xlane.f32.xlu2 %v3167_v1 }
 0xc55   :  { %v3136_v48 = vpop.f32.mrf.mxu3 }
 0xc56   :  { %v3149_v43 = vadd.f32 %v3136_v48, %v5368_v19  ;;  %v6194_v48 = vld [vmem:[%s6389_s16 + $0x1] ss:$0 sm:$0xff] }
 0xc58   :  { %v6122_v33 = vadd.f32 %v3982_v63, %v3149_v43 }
 0xc5a   :  { %v3170_v62 = vsel %vm167_vm2, %v6122_v33, 0.0 }
 0xc5b   :  { %3171 = vadd.xlane.f32.xlu0 %v3170_v62 }
 0xc5d   :  { %v3139_v40 = vpop.f32.mrf.mxu3 }
 0xc5e   :  { %v3150_v27 = vadd.f32 %v3139_v40, %v5373_v56  ;;  %v6199_v40 = vld [vmem:[%s6390_s17 + $0x1] ss:$0 sm:$0xff] }
 0xc60   :  { %v6127_v20 = vadd.f32 %v3982_v63, %v3150_v27 }
 0xc62   :  { %v3173_v44 = vsel %vm167_vm2, %v6127_v20, 0.0 }
 0xc63   :  { %3174 = vadd.xlane.f32.xlu1 %v3173_v44 }
 0xcb0   :  { %v3142_v22 = vpop.f32.mrf.mxu3 }
 0xcb1   :  { %v3151_v17 = vadd.f32 %v3142_v22, %v5378_v41 }
 0xcb3   :  { %v6132_v2 = vadd.f32 %v3982_v63, %v3151_v17 }
 0xcb5   :  { %v3176_v19 = vsel %vm167_vm2, %v6132_v2, 0.0 }
 0xcb6   :  { %3177 = vadd.xlane.f32.xlu2 %v3176_v19 }
 0xcb8   :  { %v3145_v51 = vpop.f32.mrf.mxu3 }
 0xcb9   :  { %v3152_v29 = vadd.f32 %v3145_v51, %v5383_v4 }
 0xcbb   :  { %v6137_v9 = vadd.f32 %v3982_v63, %v3152_v29 }
 0xcbd   :  { %v3179_v56 = vsel %vm180_vm3, %v6137_v9, 0.0 }
 0xcbe   :  { %3180 = vadd.xlane.f32.xlu0 %v3179_v56 }
 0xcc6   :  { %v3169_v15 = vpop.xlane.xlu2 %3168 }
 0xcc7   :  { %v3182_v10 = vmul.f32 %v3169_v15, %v4490_v38 }
 0xcc9   :  { %v6143_v41 = vsub.f32 %v6117_v60, %v3182_v10 }
 0xccb   :  { %v3192_v25 = vmul.f32 %v6143_v41, %v6143_v41 }
 0xccd   :  { %v3197_v23 = vsel %vm167_vm2, %v3192_v25, 0.0 }
 0xcce   :  { %v3172_v37 = vpop.xlane.xlu0 %3171  ;;  %3198 = vadd.xlane.f32.xlu1 %v3197_v23 }
 0xccf   :  { %v3183_v4 = vmul.f32 %v3172_v37, %v4490_v38 }
 0xcd1   :  { %v6150_v31 = vsub.f32 %v6122_v33, %v3183_v4 }
 0xcd3   :  { %v3193_v54 = vmul.f32 %v6150_v31, %v6150_v31 }
 0xcd5   :  { %v3200_v39 = vsel %vm167_vm2, %v3193_v54, 0.0 }
 0xcd6   :  { %v3175_v52 = vpop.xlane.xlu1 %3174  ;;  %3201 = vadd.xlane.f32.xlu2 %v3200_v39 }
 0xcd7   :  { %v3184_v59 = vmul.f32 %v3175_v52, %v4490_v38 }
 0xcd9   :  { %v6157_v8 = vsub.f32 %v6127_v20, %v3184_v59 }
 0xcdb   :  { %v3194_v7 = vmul.f32 %v6157_v8, %v6157_v8 }
 0xcdd   :  { %v3203_v34 = vsel %vm167_vm2, %v3194_v7, 0.0 }
 0xcde   :  { %3204 = vadd.xlane.f32.xlu0 %v3203_v34 }
 0xd29   :  { %v3178_v0 = vpop.xlane.xlu2 %3177 }
 0xd2a   :  { %v3185_v50 = vmul.f32 %v3178_v0, %v4490_v38 }
 0xd2c   :  { %v6164_v26 = vsub.f32 %v6132_v2, %v3185_v50 }
 0xd2e   :  { %v3195_v5 = vmul.f32 %v6164_v26, %v6164_v26 }
 0xd30   :  { %v3206_v24 = vsel %vm167_vm2, %v3195_v5, 0.0 }
 0xd31   :  { %v3181_v6 = vpop.xlane.xlu0 %3180  ;;  %3207 = vadd.xlane.f32.xlu1 %v3206_v24 }
 0xd32   :  { %v3186_v46 = vmul.f32 %v3181_v6, %v4490_v38 }
 0xd34   :  { %v6171_v3 = vsub.f32 %v6137_v9, %v3186_v46 }
 0xd36   :  { %v3196_v12 = vmul.f32 %v6171_v3, %v6171_v3 }
 0xd38   :  { %v3209_v53 = vsel %vm180_vm3, %v3196_v12, 0.0 }
 0xd39   :  { %3210 = vadd.xlane.f32.xlu2 %v3209_v53 }
 0xd41   :  { %v3199_v45 = vpop.xlane.xlu1 %3198 }
 0xd42   :  { %v3212_v35 = vmul.f32 %v3199_v45, %v4490_v38 }
 0xd44   :  { %v3217_v55 = vadd.f32 1e-06, %v3212_v35 }
 0xd46   :  { %4202 = vrsqrt.f32 %v3217_v55  ;;  %vm3228_vm12 = vweird.f32 %v3217_v55 }
 0xd49   :  { %v3202_v11 = vpop.xlane.xlu2 %3201 }
 0xd4a   :  { %v3213_v16 = vmul.f32 %v3202_v11, %v4490_v38 }
 0xd4c   :  { %v4203_v42 = vpop.eup %4202  ;;  %v3218_v36 = vadd.f32 1e-06, %v3213_v16 }
 0xd4d   :  { %v3223_v30 = vmul.f32 %v4203_v42, %v3217_v55  ;;  %vm3229_vm11 = vweird.f32 %v4203_v42 }
 0xd4e   :  { %4204 = vrsqrt.f32 %v3218_v36  ;;  %vm3230_vm9 = vmor %vm3228_vm12, %vm3229_vm11  ;;  %vm3238_vm14 = vweird.f32 %v3218_v36 }
 0xd4f   :  { %v3224_v28 = vmul.f32 %v4203_v42, %v3223_v30 }
 0xd51   :  { %v3225_v21 = vmul.f32 0.5, %v3224_v28  ;;  %v3205_v32 = vpop.xlane.xlu0 %3204 }
 0xd52   :  { %v3214_v49 = vmul.f32 %v3205_v32, %v4490_v38 }
 0xd53   :  { %v3226_v57 = vsub.f32 1.5, %v3225_v21 }
 0xd54   :  { %v4205_v63 = vpop.eup %4204  ;;  %v3219_v61 = vadd.f32 1e-06, %v3214_v49  ;;  %v6229_v49 = vld [vmem:[%s6392_s19 + $0x1] ss:$0 sm:$0xff] }
 0xd55   :  { %v3227_v13 = vmul.f32 %v4203_v42, %v3226_v57  ;;  %v3233_v1 = vmul.f32 %v4205_v63, %v3218_v36  ;;  %vm3239_vm13 = vweird.f32 %v4205_v63  ;;  %v3946_v57 = vld [vmem:[%s6393_s20 + $0xe8] sm:$0xff] }
 0xd56   :  { %4206 = vrsqrt.f32 %v3219_v61  ;;  %vm3240_vm15 = vmor %vm3238_vm14, %vm3239_vm13  ;;  %vm3248_vm1 = vweird.f32 %v3219_v61 }
 0xd57   :  { %v3231_v43 = vsel %vm3230_vm9, %v4203_v42, %v3227_v13  ;;  %v3234_v62 = vmul.f32 %v4205_v63, %v3233_v1  ;;  %v3945_v13 = vld [vmem:[%s6393_s20 + $0xe0] sm:$0xff] }
 0xd58   :  { %v3272_v27 = vmul.f32 %v3231_v43, %v6143_v41 }
 0xd59   :  { %v3235_v44 = vmul.f32 0.5, %v3234_v62  ;;  %v3943_v62 = vld [vmem:[%s6393_s20 + $0xd0] sm:$0xff] }
 0xd5a   :  { %v3280_v22 = vmul.f32 %v6194_v48, %v3272_v27  ;;  %v3942_v27 = vld [vmem:[%s6393_s20 + $0xc8] sm:$0xff] }
 0xd5b   :  { %v3236_v17 = vsub.f32 1.5, %v3235_v44 }
 0xd5c   :  { %v4207_v19 = vpop.eup %4206  ;;  %v3288_v51 = vadd.f32 %v6199_v40, %v3280_v22 }
 0xd5d   :  { %v3237_v29 = vmul.f32 %v4205_v63, %v3236_v17  ;;  %v3243_v56 = vmul.f32 %v4207_v19, %v3219_v61  ;;  %vm3249_vm0 = vweird.f32 %v4207_v19 }
 0xd5e   :  { %3928 = vmatmul.msk.f32.vlgmr.msrb.gmra.mxu0 %vm167_vm2, %v3288_v51  ;;  %vm3250_vm8 = vmor %vm3248_vm1, %vm3249_vm0  ;;  %v3940_v51 = vld [vmem:[%s6393_s20 + $0xb8] sm:$0xff] }
 0xd5f   :  { %v3241_v15 = vsel %vm3240_vm15, %v4205_v63, %v3237_v29  ;;  %v3244_v10 = vmul.f32 %v4207_v19, %v3243_v56  ;;  %v3939_v56 = vld [vmem:[%s6393_s20 + $0xb0] sm:$0xff] }
 0xd60   :  { %v3273_v25 = vmul.f32 %v3241_v15, %v6150_v31 }
 0xd61   :  { %v3245_v23 = vmul.f32 0.5, %v3244_v10  ;;  %v3938_v10 = vld [vmem:[%s6393_s20 + $0xa8] sm:$0xff] }
 0xd62   :  { %v3281_v41 = vmul.f32 %v6194_v48, %v3273_v25 }
 0xd63   :  { %v3246_v37 = vsub.f32 1.5, %v3245_v23 }
 0xd64   :  { %v3289_v4 = vadd.f32 %v6199_v40, %v3281_v41 }
 0xd65   :  { %v3247_v54 = vmul.f32 %v4207_v19, %v3246_v37 }
 0xd66   :  { %3929 = vmatmul.msk.f32.gmra.mxu0 %vm167_vm2, %v3289_v4  ;;  %v3937_v4 = vld [vmem:[%s6393_s20 + $0xa0] sm:$0xff] }
 0xd67   :  { %v3251_v39 = vsel %vm3250_vm8, %v4207_v19, %v3247_v54  ;;  %v3941_v19 = vld [vmem:[%s6393_s20 + $0xc0] sm:$0xff] }
 0xd68   :  { %v3274_v52 = vmul.f32 %v3251_v39, %v6157_v8 }
 0xd6a   :  { %v3282_v59 = vmul.f32 %v6194_v48, %v3274_v52 }
 0xd6c   :  { %v3290_v7 = vadd.f32 %v6199_v40, %v3282_v59  ;;  %v3936_v59 = vld [vmem:[%s6393_s20 + $0x98] sm:$0xff] }
 0xd6e   :  { %3930 = vmatmul.msk.f32.gmra.mxu0 %vm167_vm2, %v3290_v7 }
 0xda4   :  { %v3208_v31 = vpop.xlane.xlu1 %3207 }
 0xda5   :  { %v3215_v34 = vmul.f32 %v3208_v31, %v4490_v38 }
 0xda7   :  { %v3220_v0 = vadd.f32 1e-06, %v3215_v34 }
 0xda9   :  { %4208 = vrsqrt.f32 %v3220_v0  ;;  %vm3258_vm5 = vweird.f32 %v3220_v0 }
 0xdac   :  { %v3211_v50 = vpop.xlane.xlu2 %3210 }
 0xdad   :  { %v3216_v5 = vmul.f32 %v3211_v50, %v4490_v38 }
 0xdaf   :  { %v4209_v24 = vpop.eup %4208  ;;  %v3221_v6 = vadd.f32 1e-06, %v3216_v5  ;;  %v3935_v5 = vld [vmem:[%s6393_s20 + $0x90] sm:$0xff] }
 0xdb0   :  { %v3253_v46 = vmul.f32 %v4209_v24, %v3220_v0  ;;  %vm3259_vm4 = vweird.f32 %v4209_v24 }
 0xdb1   :  { %4210 = vrsqrt.f32 %v3221_v6  ;;  %vm3260_vm10 = vmor %vm3258_vm5, %vm3259_vm4  ;;  %vm3268_vm12 = vweird.f32 %v3221_v6 }
 0xdb2   :  { %v3254_v12 = vmul.f32 %v4209_v24, %v3253_v46 }
 0xdb4   :  { %v3255_v8 = vmul.f32 0.5, %v3254_v12  ;;  %v3933_v12 = vld [vmem:[%s6393_s20 + $0x80] sm:$0xff] }
 0xdb6   :  { %v3256_v53 = vsub.f32 1.5, %v3255_v8 }
 0xdb7   :  { %v4211_v18 = vpop.eup %4210 }
 0xdb8   :  { %v3257_v58 = vmul.f32 %v4209_v24, %v3256_v53  ;;  %v3263_v14 = vmul.f32 %v4211_v18, %v3221_v6  ;;  %vm3269_vm11 = vweird.f32 %v4211_v18  ;;  %v3934_v6 = vld [vmem:[%s6393_s20 + $0x88] sm:$0xff] }
 0xdb9   :  { %vm3270_vm9 = vmor %vm3268_vm12, %vm3269_vm11 }
 0xdba   :  { %v3261_v47 = vsel %vm3260_vm10, %v4209_v24, %v3257_v58  ;;  %v3264_v45 = vmul.f32 %v4211_v18, %v3263_v14 }
 0xdbb   :  { %v3275_v35 = vmul.f32 %v3261_v47, %v6164_v26  ;;  %v3948_v26 = vld [vmem:[%s6393_s20 + $0xf8] sm:$0xff] }
 0xdbc   :  { %v3265_v55 = vmul.f32 0.5, %v3264_v45  ;;  %3572 = vmatpush.msrb.mxu1 %v3948_v26 }
 0xdbd   :  { %v3283_v11 = vmul.f32 %v6194_v48, %v3275_v35 }
 0xdbe   :  { %v3266_v16 = vsub.f32 1.5, %v3265_v55 }
 0xdbf   :  { %v3291_v42 = vadd.f32 %v6199_v40, %v3283_v11 }
 0xdc0   :  { %v3267_v36 = vmul.f32 %v4211_v18, %v3266_v16 }
 0xdc1   :  { %3931 = vmatmul.msk.f32.gmra.mxu0 %vm167_vm2, %v3291_v42 }
 0xdc2   :  { %v3271_v30 = vsel %vm3270_vm9, %v4211_v18, %v3267_v36 }
 0xdc3   :  { %v3276_v28 = vmul.f32 %v3271_v30, %v6171_v3  ;;  %v3947_v3 = vld [vmem:[%s6393_s20 + $0xf0] sm:$0xff] }
 0xdc4   :  { %3573 = vmatpush.msrb.mxu1 %v3947_v3 }
 0xdc5   :  { %v3284_v21 = vmul.f32 %v6194_v48, %v3276_v28  ;;  %v3944_v48 = vld [vmem:[%s6393_s20 + $0xd8] sm:$0xff] }
 0xdc6   :  { %3574 = vmatpush.msrb.mxu1 %v3946_v57 }
 0xdc7   :  { %v3292_v32 = vadd.f32 %v6199_v40, %v3284_v21 }
 0xdc8   :  { %3575 = vmatpush.msrb.mxu1 %v3945_v13 }
 0xdc9   :  { %3932 = vmatmul.msk.f32.gmra.mxu0 %vm167_vm2, %v3292_v32 }
 0xdca   :  { %3576 = vmatpush.msrb.mxu1 %v3944_v48 }
 0xdcc   :  { %3577 = vmatpush.msrb.mxu1 %v3943_v62 }
 0xdce   :  { %3578 = vmatpush.msrb.mxu1 %v3942_v27 }
 0xdd0   :  { %3579 = vmatpush.msrb.mxu1 %v3941_v19 }
 0xdd2   :  { %3580 = vmatpush.msrb.mxu1 %v3940_v51 }
 0xdd4   :  { %3581 = vmatpush.msrb.mxu1 %v3939_v56 }
 0xdd6   :  { %3582 = vmatpush.msrb.mxu1 %v3938_v10 }
 0xdd8   :  { %3583 = vmatpush.msrb.mxu1 %v3937_v4 }
 0xdda   :  { %3584 = vmatpush.msrb.mxu1 %v3936_v59 }
 0xddb   :  { %v3335_v63 = vpop.f32.mrf.mxu0 }
 0xddc   :  { %v6238_v61 = vadd.f32 %v6229_v49, %v3335_v63  ;;  %3585 = vmatpush.msrb.mxu1 %v3935_v5 }
 0xdde   :  { %v6244_v1 = vmul.f32 0.70710677, %v6238_v61  ;;  %3586 = vmatpush.msrb.mxu1 %v3934_v6 }
 0xde0   :  { %v3360_v43 = vand.u32 2147483647, %v6244_v1  ;;  %3587 = vmatpush.msrb.mxu1 %v3933_v12 }
 0xde2   :  { %v3365_v40 = vmul.f32 0.3275911, %v3360_v43  ;;  %v3495_v47 = vsub.f32 0.0, %v3360_v43 }
 0xde3   :  { %v3338_v44 = vpop.f32.mrf.mxu0 }
 0xde4   :  { %v3370_v22 = vadd.f32 1.0, %v3365_v40  ;;  %v6257_v17 = vadd.f32 %v6229_v49, %v3338_v44  ;;  %v3500_v42 = vmul.f32 %v3495_v47, %v3360_v43 }
 0xde6   :  { %4212 = vrcp.f32 %v3370_v22  ;;  %v6266_v29 = vmul.f32 0.70710677, %v6257_v17  ;;  %v3386_v31 = vand.u32 2147483648, %v3370_v22  ;;  %v3384_v50 = vand.u32 2147483647, %v3370_v22 }
 0xde7   :  { %vm3380_vm14 = vweird.f32 %v3370_v22  ;;  %v3505_v63 = vmul.f32 1.442695, %v3500_v42 }
 0xde8   :  { %v6272_v15 = vand.u32 2147483647, %v6266_v29  ;;  %v3387_v8 = vor.u32 1.1754944e-38, %v3386_v31  ;;  %vm3385_vm0 = vcmp.eq.f32.partialorder %v3384_v50, 8.507059e+37 }
 0xdea   :  { %v3366_v25 = vmul.f32 0.3275911, %v6272_v15  ;;  %v3496_v62 = vsub.f32 0.0, %v6272_v15 }
 0xdeb   :  { %v3341_v23 = vpop.f32.mrf.mxu0 }
 0xdec   :  { %v4213_v41 = vpop.eup %4212  ;;  %v6279_v37 = vadd.f32 %v6229_v49, %v3341_v23  ;;  %v3371_v39 = vadd.f32 1.0, %v3366_v25  ;;  %v3501_v25 = vmul.f32 %v3496_v62, %v6272_v15 }
 0xded   :  { %v3376_v54 = vmul.f32 %v4213_v41, %v3370_v22  ;;  %vm3381_vm13 = vweird.f32 %v4213_v41 }
 0xdee   :  { %v6285_v52 = vmul.f32 0.70710677, %v6279_v37  ;;  %4214 = vrcp.f32 %v3371_v39  ;;  %vm3382_vm15 = vmor %vm3380_vm14, %vm3381_vm13  ;;  %v3401_v16 = vand.u32 2147483648, %v3371_v39  ;;  %v3399_v30 = vand.u32 2147483647, %v3371_v39 }
 0xdef   :  { %v3377_v7 = vsub.f32 1.0, %v3376_v54  ;;  %vm3395_vm8 = vweird.f32 %v3371_v39  ;;  %v3507_v50 = vmul.f32 1.442695, %v3501_v25  ;;  %vm3525_vm13 = vcmp.lt.f32.partialorder %v6244_v1, 0.0 }
 0xdf0   :  { %v6291_v34 = vand.u32 2147483647, %v6285_v52  ;;  %v3402_v3 = vor.u32 1.1754944e-38, %v3401_v16  ;;  %vm3400_vm5 = vcmp.eq.f32.partialorder %v3399_v30, 8.507059e+37  ;;  %v3350_v16 = vmul.f32 0.5, %v6238_v61 }
 0xdf1   :  { %v3378_v0 = vmul.f32 %v4213_v41, %v3377_v7  ;;  %vm3526_vm14 = vcmp.lt.f32.partialorder %v6266_v29, 0.0 }
 0xdf2   :  { %v3367_v24 = vmul.f32 0.3275911, %v6291_v34  ;;  %v3497_v59 = vsub.f32 0.0, %v6291_v34 }
 0xdf3   :  { %v3379_v46 = vadd.f32 %v4213_v41, %v3378_v0 }
 0xdf4   :  { %v3372_v53 = vadd.f32 1.0, %v3367_v24  ;;  %v4215_v18 = vpop.eup %4214  ;;  %v3502_v15 = vmul.f32 %v3497_v59, %v6291_v34 }
 0xdf5   :  { %v3383_v58 = vsel %vm3382_vm15, %v4213_v41, %v3379_v46  ;;  %v3391_v45 = vmul.f32 %v4215_v18, %v3371_v39  ;;  %vm3396_vm1 = vweird.f32 %v4215_v18  ;;  %vm3527_vm15 = vcmp.lt.f32.partialorder %v6285_v52, 0.0 }
 0xdf6   :  { %v3388_v14 = vsel %vm3385_vm0, %v3387_v8, %v3383_v58  ;;  %4216 = vrcp.f32 %v3372_v53  ;;  %vm3397_vm4 = vmor %vm3395_vm8, %vm3396_vm1  ;;  %v3416_v43 = vand.u32 2147483648, %v3372_v53  ;;  %v3414_v51 = vand.u32 2147483647, %v3372_v53 }
 0xdf7   :  { %v3450_v35 = vmul.f32 1.0614054, %v3388_v14  ;;  %v3392_v55 = vsub.f32 1.0, %v3391_v45  ;;  %4218 = vpow2.f32 %v3505_v63  ;;  %vm3410_vm11 = vweird.f32 %v3372_v53 }
 0xdf8   :  { %v3417_v41 = vor.u32 1.1754944e-38, %v3416_v43  ;;  %vm3415_vm9 = vcmp.eq.f32.partialorder %v3414_v51, 8.507059e+37  ;;  %4220 = vpow2.f32 %v3507_v50 }
 0xdf9   :  { %v3455_v11 = vadd.f32 -1.4531521, %v3450_v35  ;;  %v3393_v36 = vmul.f32 %v4215_v18, %v3392_v55  ;;  %v3509_v35 = vmul.f32 1.442695, %v3502_v15 }
 0xdfb   :  { %v3460_v28 = vmul.f32 %v3455_v11, %v3388_v14  ;;  %v3394_v32 = vadd.f32 %v4215_v18, %v3393_v36  ;;  %4222 = vpow2.f32 %v3509_v35 }
 0xdfc   :  { %v4217_v21 = vpop.eup %4216 }
 0xdfd   :  { %v3465_v26 = vadd.f32 1.4214138, %v3460_v28  ;;  %v3406_v57 = vmul.f32 %v4217_v21, %v3372_v53  ;;  %v3398_v13 = vsel %vm3397_vm4, %v4215_v18, %v3394_v32  ;;  %vm3411_vm10 = vweird.f32 %v4217_v21  ;;  %v4219_v24 = vpop.eup %4218 }
 0xdfe   :  { %v3403_v27 = vsel %vm3400_vm5, %v3402_v3, %v3398_v13  ;;  %vm3412_vm12 = vmor %vm3410_vm11, %vm3411_vm10  ;;  %v4221_v30 = vpop.eup %4220 }
 0xdff   :  { %v3470_v48 = vmul.f32 %v3465_v26, %v3388_v14  ;;  %v3407_v40 = vsub.f32 1.0, %v3406_v57  ;;  %v3451_v44 = vmul.f32 1.0614054, %v3403_v27 }
 0xe01   :  { %v3475_v22 = vadd.f32 -0.28449672, %v3470_v48  ;;  %v3408_v19 = vmul.f32 %v4217_v21, %v3407_v40  ;;  %v3456_v56 = vadd.f32 -1.4531521, %v3451_v44  ;;  %v4223_v63 = vpop.eup %4222  ;;  %v3351_v48 = vmul.f32 0.5, %v6257_v17 }
 0xe03   :  { %v3480_v10 = vmul.f32 %v3475_v22, %v3388_v14  ;;  %v3409_v23 = vadd.f32 %v4217_v21, %v3408_v19  ;;  %v3461_v4 = vmul.f32 %v3456_v56, %v3403_v27  ;;  %v3352_v22 = vmul.f32 0.5, %v6279_v37 }
 0xe05   :  { %v3485_v54 = vadd.f32 0.2548296, %v3480_v10  ;;  %v3413_v39 = vsel %vm3412_vm12, %v4217_v21, %v3409_v23  ;;  %v3466_v7 = vadd.f32 1.4214138, %v3461_v4 }
 0xe06   :  { %v3418_v31 = vsel %vm3415_vm9, %v3417_v41, %v3413_v39 }
 0xe07   :  { %v3490_v0 = vmul.f32 %v3485_v54, %v3388_v14  ;;  %v3452_v5 = vmul.f32 1.0614054, %v3418_v31  ;;  %v3471_v6 = vmul.f32 %v3466_v7, %v3403_v27 }
 0xe09   :  { %v3515_v46 = vmul.f32 %v4219_v24, %v3490_v0  ;;  %v3457_v12 = vadd.f32 -1.4531521, %v3452_v5  ;;  %v3476_v8 = vadd.f32 -0.28449672, %v3471_v6 }
 0xe0b   :  { %v3520_v53 = vsub.f32 1.0, %v3515_v46  ;;  %v3462_v18 = vmul.f32 %v3457_v12, %v3418_v31  ;;  %v3481_v58 = vmul.f32 %v3476_v8, %v3403_v27 }
 0xe0d   :  { %v3530_v47 = vsub.f32 0.0, %v3520_v53  ;;  %v3467_v45 = vadd.f32 1.4214138, %v3462_v18  ;;  %v3486_v55 = vadd.f32 0.2548296, %v3481_v58 }
 0xe0f   :  { %v3535_v14 = vsel %vm3525_vm13, %v3530_v47, %v3520_v53  ;;  %v3472_v11 = vmul.f32 %v3467_v45, %v3418_v31  ;;  %v3491_v36 = vmul.f32 %v3486_v55, %v3403_v27 }
 0xe10   :  { %v3540_v42 = vadd.f32 1.0, %v3535_v14 }
 0xe11   :  { %v3477_v28 = vadd.f32 -0.28449672, %v3472_v11  ;;  %v3516_v21 = vmul.f32 %v4221_v30, %v3491_v36 }
 0xe12   :  { %v3545_v34 = vmul.f32 %v3540_v42, %v3350_v16 }
 0xe13   :  { %v3482_v32 = vmul.f32 %v3477_v28, %v3418_v31  ;;  %v3521_v26 = vsub.f32 1.0, %v3516_v21 }
 0xe14   :  { %3588 = vmatmul.f32.vlgmr.msrb.gmra.mxu1 %v3545_v34 }
 0xe15   :  { %v3487_v3 = vadd.f32 0.2548296, %v3482_v32  ;;  %v3531_v57 = vsub.f32 0.0, %v3521_v26 }
 0xe17   :  { %v3492_v1 = vmul.f32 %v3487_v3, %v3418_v31  ;;  %v3536_v13 = vsel %vm3526_vm14, %v3531_v57, %v3521_v26  ;;  %vm3699_vm14 = vcmask 74752  }
 0xe18   :  { %v3541_v61 = vadd.f32 1.0, %v3536_v13 }
 0xe19   :  { %v3517_v62 = vmul.f32 %v4223_v63, %v3492_v1 }
 0xe1a   :  { %v3546_v40 = vmul.f32 %v3541_v61, %v3351_v48 }
 0xe1b   :  { %v3522_v27 = vsub.f32 1.0, %v3517_v62 }
 0xe1c   :  { %3591 = vmatmul.f32.gmra.mxu1 %v3546_v40 }
 0xe1d   :  { %v3532_v43 = vsub.f32 0.0, %v3522_v27 }
 0xe1f   :  { %v3537_v44 = vsel %vm3527_vm15, %v3532_v43, %v3522_v27 }
 0xe20   :  { %v3542_v19 = vadd.f32 1.0, %v3537_v44 }
 0xe22   :  { %v3547_v51 = vmul.f32 %v3542_v19, %v3352_v22 }
 0xe24   :  { %3594 = vmatmul.f32.gmra.mxu1 %v3547_v51 }
 0xe3e   :  { %v3344_v29 = vpop.f32.mrf.mxu0 }
 0xe3f   :  { %v6314_v56 = vadd.f32 %v6229_v49, %v3344_v29 }
 0xe41   :  { %v6317_v17 = vmul.f32 0.70710677, %v6314_v56 }
 0xe43   :  { %v3363_v10 = vand.u32 2147483647, %v6317_v17  ;;  %vm3528_vm9 = vcmp.lt.f32.partialorder %v6317_v17, 0.0 }
 0xe45   :  { %v3368_v25 = vmul.f32 0.3275911, %v3363_v10  ;;  %v3498_v12 = vsub.f32 0.0, %v3363_v10 }
 0xe46   :  { %v3347_v23 = vpop.f32.mrf.mxu0 }
 0xe47   :  { %v3373_v41 = vadd.f32 1.0, %v3368_v25  ;;  %v6321_v52 = vadd.f32 %v6229_v49, %v3347_v23  ;;  %v3503_v45 = vmul.f32 %v3498_v12, %v3363_v10  ;;  %v3353_v25 = vmul.f32 0.5, %v6314_v56 }
 0xe49   :  { %4224 = vrcp.f32 %v3373_v41  ;;  %v6324_v37 = vmul.f32 0.70710677, %v6321_v52  ;;  %v3431_v0 = vand.u32 2147483648, %v3373_v41  ;;  %v3429_v5 = vand.u32 2147483647, %v3373_v41 }
 0xe4a   :  { %vm3425_vm1 = vweird.f32 %v3373_v41  ;;  %v3511_v36 = vmul.f32 1.442695, %v3503_v45 }
 0xe4b   :  { %v3364_v4 = vand.u32 2147483647, %v6324_v37  ;;  %v3432_v49 = vor.u32 1.1754944e-38, %v3431_v0  ;;  %vm3430_vm4 = vcmp.eq.f32.partialorder %v3429_v5, 8.507059e+37  ;;  %vm3529_vm13 = vcmp.lt.f32.partialorder %v6324_v37, 0.0 }
 0xe4c   :  { %v3354_v0 = vmul.f32 0.5, %v6321_v52 }
 0xe4d   :  { %v3369_v54 = vmul.f32 0.3275911, %v3364_v4  ;;  %v3499_v28 = vsub.f32 0.0, %v3364_v4 }
 0xe4f   :  { %v4225_v39 = vpop.eup %4224  ;;  %v3374_v7 = vadd.f32 1.0, %v3369_v54  ;;  %v3504_v57 = vmul.f32 %v3499_v28, %v3364_v4 }
 0xe50   :  { %v3421_v59 = vmul.f32 %v4225_v39, %v3373_v41  ;;  %vm3426_vm0 = vweird.f32 %v4225_v39 }
 0xe51   :  { %4226 = vrcp.f32 %v3374_v7  ;;  %vm3427_vm8 = vmor %vm3425_vm1, %vm3426_vm0  ;;  %v3446_v58 = vand.u32 2147483648, %v3374_v7  ;;  %v3444_v55 = vand.u32 2147483647, %v3374_v7  ;;  %vm3440_vm10 = vweird.f32 %v3374_v7 }
 0xe52   :  { %v3422_v31 = vsub.f32 1.0, %v3421_v59  ;;  %4228 = vpow2.f32 %v3511_v36  ;;  %v3513_v61 = vmul.f32 1.442695, %v3504_v57  ;;  %v3668_v36 = vld [vmem:[%s6397_s24] sm:$0xff] }
 0xe53   :  { %v3447_v16 = vor.u32 1.1754944e-38, %v3446_v58  ;;  %vm3445_vm12 = vcmp.eq.f32.partialorder %v3444_v55, 8.507059e+37 }
 0xe54   :  { %v3423_v50 = vmul.f32 %v4225_v39, %v3422_v31  ;;  %4230 = vpow2.f32 %v3513_v61 }
 0xe56   :  { %v3424_v24 = vadd.f32 %v4225_v39, %v3423_v50 }
 0xe57   :  { %v4227_v6 = vpop.eup %4226 }
 0xe58   :  { %v3428_v46 = vsel %vm3427_vm8, %v4225_v39, %v3424_v24  ;;  %v3436_v15 = vmul.f32 %v4227_v6, %v3374_v7  ;;  %vm3441_vm5 = vweird.f32 %v4227_v6  ;;  %v4229_v40 = vpop.eup %4228 }
 0xe59   :  { %v3433_v8 = vsel %vm3430_vm4, %v3432_v49, %v3428_v46  ;;  %vm3442_vm11 = vmor %vm3440_vm10, %vm3441_vm5 }
 0xe5a   :  { %v3453_v53 = vmul.f32 1.0614054, %v3433_v8  ;;  %v3437_v18 = vsub.f32 1.0, %v3436_v15  ;;  %v4231_v4 = vpop.eup %4230 }
 0xe5c   :  { %v3458_v47 = vadd.f32 -1.4531521, %v3453_v53  ;;  %v3438_v35 = vmul.f32 %v4227_v6, %v3437_v18 }
 0xe5e   :  { %v3463_v14 = vmul.f32 %v3458_v47, %v3433_v8  ;;  %v3439_v11 = vadd.f32 %v4227_v6, %v3438_v35  ;;  %v3609_v35 = vld [vmem:[%s6469_s15] sm:$0x3] }
 0xe60   :  { %v3468_v42 = vadd.f32 1.4214138, %v3463_v14  ;;  %v3443_v30 = vsel %vm3442_vm11, %v4227_v6, %v3439_v11  ;;  %v3986_v6 = vld [vmem:[%s6394_s21 + $0x1] ss:$0 sm:$0xff] }
 0xe61   :  { %v3448_v21 = vsel %vm3445_vm12, %v3447_v16, %v3443_v30  ;;  %v3670_v16 = vld [vmem:[%s6397_s24 + $0x10] sm:$0xff] }
 0xe62   :  { %v3473_v34 = vmul.f32 %v3468_v42, %v3433_v8  ;;  %v3454_v32 = vmul.f32 1.0614054, %v3448_v21  ;;  %v3669_v42 = vld [vmem:[%s6397_s24 + $0x8] sm:$0xff] }
 0xe64   :  { %v3478_v26 = vadd.f32 -0.28449672, %v3473_v34  ;;  %v3459_v3 = vadd.f32 -1.4531521, %v3454_v32 }
 0xe66   :  { %v3483_v1 = vmul.f32 %v3478_v26, %v3433_v8  ;;  %v3464_v63 = vmul.f32 %v3459_v3, %v3448_v21 }
 0xe68   :  { %v3488_v13 = vadd.f32 0.2548296, %v3483_v1  ;;  %v3469_v48 = vadd.f32 1.4214138, %v3464_v63  ;;  %v3987_v63 = vld [vmem:[%s6395_s22] ss:$0 sm:$0xff] }
 0xe69   :  { %s3708_s22 = sshll.u32 %s6399_s26, 4  ;;  %s3709_s22 = int_to_ptr.hbm [resolvable:$true] %s3708_s22 }
 0xe6a   :  { %v3493_v62 = vmul.f32 %v3488_v13, %v3433_v8  ;;  %v3474_v27 = vmul.f32 %v3469_v48, %v3448_v21 }
 0xe6c   :  { %v3518_v43 = vmul.f32 %v4229_v40, %v3493_v62  ;;  %v3479_v44 = vadd.f32 -0.28449672, %v3474_v27  ;;  %v3989_v40 = vld [vmem:[%s6398_s25] ss:$0 sm:$0xff] }
 0xe6e   :  { %v3523_v22 = vsub.f32 1.0, %v3518_v43  ;;  %v3484_v19 = vmul.f32 %v3479_v44, %v3448_v21 }
 0xe70   :  { %v3533_v51 = vsub.f32 0.0, %v3523_v22  ;;  %v3489_v29 = vadd.f32 0.2548296, %v3484_v19 }
 0xe72   :  { %v3538_v10 = vsel %vm3528_vm9, %v3533_v51, %v3523_v22  ;;  %v3494_v41 = vmul.f32 %v3489_v29, %v3448_v21 }
 0xe73   :  { %v3543_v23 = vadd.f32 1.0, %v3538_v10 }
 0xe74   :  { %v3519_v39 = vmul.f32 %v4231_v4, %v3494_v41 }
 0xe75   :  { %v3548_v54 = vmul.f32 %v3543_v23, %v3353_v25 }
 0xe76   :  { %v3524_v59 = vsub.f32 1.0, %v3519_v39 }
 0xe77   :  { %3597 = vmatmul.f32.gmra.mxu1 %v3548_v54 }
 0xe78   :  { %v3534_v7 = vsub.f32 0.0, %v3524_v59 }
 0xe7a   :  { %v3539_v31 = vsel %vm3529_vm13, %v3534_v7, %v3524_v59 }
 0xe7b   :  { %v3544_v50 = vadd.f32 1.0, %v3539_v31 }
 0xe7d   :  { %v3549_v5 = vmul.f32 %v3544_v50, %v3354_v0 }
 0xe7f   :  { %3600 = vmatmul.f32.gmra.mxu1 %v3549_v5 }
 0xe91   :  { %v3589_v17 = vpop.f32.mrf.mxu1 }
 0xe92   :  { %v3590_v18 = vadd.f32 %v3986_v6, %v3589_v17 }
 0xe94   :  { %v3604_v45 = vadd.f32 %v3590_v18, %v6117_v60  ;;  %v3671_v60 = vld [vmem:[%s6397_s24 + $0x18] sm:$0xff] }
 0xe95   :  { %3691 = vmatpush.msrb.mxu3 %v3671_v60 }
 0xe97   :  { %3692 = vmatpush.msrb.mxu3 %v3670_v16 }
 0xe99   :  { %v3592_v24 = vpop.f32.mrf.mxu1  ;;  %3693 = vmatpush.msrb.mxu3 %v3669_v42 }
 0xe9a   :  { %v3593_v53 = vadd.f32 %v3986_v6, %v3592_v24 }
 0xe9b   :  { %3694 = vmatpush.msrb.mxu3 %v3668_v36 }
 0xe9c   :  { %v3605_v47 = vadd.f32 %v3593_v53, %v6122_v33 }
 0xea1   :  { %v3595_v49 = vpop.f32.mrf.mxu1 }
 0xea2   :  { %v3596_v8 = vadd.f32 %v3986_v6, %v3595_v49 }
 0xea4   :  { %v3606_v58 = vadd.f32 %v3596_v8, %v6127_v20 }
 0xef4   :  { %v3598_v56 = vpop.f32.mrf.mxu1 }
 0xef5   :  { %v3599_v12 = vadd.f32 %v3986_v6, %v3598_v56 }
 0xef7   :  { %v3607_v52 = vadd.f32 %v3599_v12, %v6132_v2 }
 0xefc   :  { %v3601_v46 = vpop.f32.mrf.mxu1 }
 0xefd   :  { %v3602_v15 = vadd.f32 %v3986_v6, %v3601_v46 }
 0xeff   :  { %v3608_v37 = vadd.f32 %v3602_v15, %v6137_v9 }
 0xf01   :  { %3950 = vmatpush.msk.msra.mxu2 %vm644_vm6, %v3608_v37 }
 0xf03   :  { %3628 = vmatpush.msra.mxu2 %v3607_v52 }
 0xf05   :  { %3629 = vmatpush.msra.mxu2 %v3606_v58 }
 0xf07   :  { %3630 = vmatpush.msra.mxu2 %v3605_v47 }
 0xf09   :  { %3631 = vmatpush.msra.mxu2 %v3604_v45 }
 0xf0a   :  { %3951 = vmatmul.msk.f32.vlgmr.msra.gmra.mxu2 %vm507_vm7, %v3609_v35 }
 0xf8d   :  { %v3633_v2 = vpop.f32.mrf.mxu2 }
 0xf8e   :  { %v3638_v9 = vsel %vm180_vm3, %v3633_v2, 0.0 }
 0xf8f   :  { %3639 = vadd.xlane.f32.xlu0 %v3638_v9 }
0x1002   :  { %v3640_v55 = vpop.xlane.xlu0 %3639 }
0x1003   :  { %v3641_v20 = vmul.f32 %v3640_v55, %v4490_v38 }
0x1005   :  { %v3642_v14 = vsub.f32 %v3633_v2, %v3641_v20 }
0x1007   :  { %v3643_v33 = vmul.f32 %v3642_v14, %v3642_v14 }
0x1009   :  { %v3644_v11 = vsel %vm180_vm3, %v3643_v33, 0.0 }
0x100a   :  { %3645 = vadd.xlane.f32.xlu1 %v3644_v11 }
0x107d   :  { %v3646_v30 = vpop.xlane.xlu1 %3645 }
0x107e   :  { %v3647_v28 = vmul.f32 %v3646_v30, %v4490_v38  ;;  %v3988_v38 = vld [vmem:[%s6396_s23] ss:$0 sm:$0xff] }
0x1080   :  { %v3648_v34 = vadd.f32 1e-06, %v3647_v28 }
0x1082   :  { %4232 = vrsqrt.f32 %v3648_v34  ;;  %vm3655_vm6 = vweird.f32 %v3648_v34 }
0x1088   :  { %v4233_v21 = vpop.eup %4232 }
0x1089   :  { %v3650_v32 = vmul.f32 %v4233_v21, %v3648_v34  ;;  %vm3656_vm3 = vweird.f32 %v4233_v21 }
0x108a   :  { %vm3657_vm7 = vmor %vm3655_vm6, %vm3656_vm3 }
0x108b   :  { %v3651_v26 = vmul.f32 %v4233_v21, %v3650_v32 }
0x108d   :  { %v3652_v3 = vmul.f32 0.5, %v3651_v26 }
0x108f   :  { %v3653_v57 = vsub.f32 1.5, %v3652_v3 }
0x1091   :  { %v3654_v1 = vmul.f32 %v4233_v21, %v3653_v57 }
0x1093   :  { %v3658_v13 = vsel %vm3657_vm7, %v4233_v21, %v3654_v1 }
0x1094   :  { %v3659_v48 = vmul.f32 %v3658_v13, %v3642_v14 }
0x1096   :  { %v3663_v61 = vmul.f32 %v3987_v63, %v3659_v48 }
0x1098   :  { %v3667_v62 = vadd.f32 %v3988_v38, %v3663_v61 }
0x109a   :  { %3952 = vmatmul.msk.f32.vlgmr.msrb.gmra.mxu3 %vm167_vm2, %v3667_v62 }
0x111d   :  { %v3696_v27 = vpop.f32.mrf.mxu3 }
0x111e   :  { %v3697_v43 = vadd.f32 %v3989_v40, %v3696_v27 }
0x1120   :  { %3700 = vst.msk [vmem:[#allocation2] sm:$0x3] %vm3699_vm14, %v3697_v43 }
0x1121   :  { %3711 = dma.vmem_to_hbm [thread:$0]  %s3707_s5, 32, %s3709_s22, [#allocation3]  }
0x1122   :  { %4275 = dma.done.wait [#allocation3], 32  }
0x1123   :  { %4276 = vsyncadd [#allocation3], 4294967264 }
0x1124   :  { %3716 = vsyncpa [#allocation3], 1 }

</bundles_post_ra>
